<compile_context>
chip_gen: v7x
topology: tpu7x:2x2x1
jax: 0.10.0
libtpu: 0.0.40
codegen_flags: <defaults>
</compile_context>

<pallas_src>
import functools

import numpy as np
import jax
import jax.numpy as jnp
from jax import lax
from jax.experimental import pallas as pl
from jax.experimental.pallas import tpu as pltpu

CLASSES = 50
L_IN = 30            # input length -> 256 channels * length 2 = 512 feeds Linear(512, 64)
BN_EPS = 1e-5
OUT_PAD = 128        # lane-dense output width (CLASSES padded to 128)
NEG = -1e30          # logit value for padded classes (exp underflows to 0)
ALIGN = 16           # batch-tile granularity (bf16 sublane packing = 16)


# ----------------------------------------------------------------------------
# Host-side parameter folding (run ONCE; result cached on device by the caller)
# ----------------------------------------------------------------------------
def _conv_pool_dense(w, l_in):
    """Dense matrix for: zero-pad(1) -> Conv1d(K, stride 1) evaluated at the even
    and odd output positions (the two MaxPool1d(2) taps), channels-last layout.

    Input rows  : i * Cin + ci                   (i in [0, l_in))
    Output cols : half * Lp*Cout + j*Cout + co   (half 0: t=2j, half 1: t=2j+1)
    """
    w = np.asarray(w, np.float32)            # (Cout, Cin, K)
    cout, cin, k = w.shape
    l_out = l_in + 2 - k + 1
    lp = l_out // 2
    m = np.zeros((l_in * cin, 2 * lp * cout), np.float32)
    for half in range(2):
        for j in range(lp):
            t = 2 * j + half
            for kk in range(k):
                i = t + kk - 1               # input position after removing pad of 1
                if 0 <= i < l_in:
                    m[i * cin:(i + 1) * cin,
                      half * lp * cout + j * cout: half * lp * cout + (j + 1) * cout] += w[:, :, kk].T
    return m


def pack_params(p):
    """Fold conv/pool/BN into 5 dense matrices + 2 bias rows; returns device arrays.
    Call this once and reuse the result across cnn_forward calls."""
    f32 = np.float32
    # Layer 1: Conv1d(1, 64, 5, pad=1) + bias.  Bias folded via the ones column of x_aug.
    m1 = _conv_pool_dense(p["w1"], L_IN)                       # (30, 2*14*64 = 1792)
    w1 = np.zeros((32, m1.shape[1]), f32)
    w1[:L_IN] = m1
    w1[L_IN] = np.tile(np.asarray(p["b1"], f32), 2 * 14)       # bias row (ones column)
    # Layers 2 / 3: bias-free convs on pooled inputs of length 14 / 6.
    w2 = _conv_pool_dense(p["w2"], 14)                          # (896, 1536)
    w3 = _conv_pool_dense(p["w3"], 6)                           # (768, 1024)
    # Linear(512, 64) re-ordered to the kernel's length-major flatten (l*256 + c),
    # with eval-mode BatchNorm folded in.
    wfc = np.asarray(p["w_fc"], f32).reshape(64, 256, 2).transpose(2, 1, 0).reshape(512, 64)
    scale = np.asarray(p["bn_gamma"], f32) / np.sqrt(np.asarray(p["bn_var"], f32) + BN_EPS)
    wfc = wfc * scale[None, :]
    bfc = (np.asarray(p["b_fc"], f32) - np.asarray(p["bn_mean"], f32)) * scale \
        + np.asarray(p["bn_beta"], f32)
    # Linear(64, 50) padded to a lane-dense 128-wide slab; pad classes get -1e30 bias.
    wout = np.zeros((64, OUT_PAD), f32)
    wout[:, :CLASSES] = np.asarray(p["w_out"], f32).T
    bout = np.full((1, OUT_PAD), NEG, f32)
    bout[0, :CLASSES] = np.asarray(p["b_out"], f32)

    bf16 = jnp.bfloat16
    return (jnp.asarray(w1, bf16), jnp.asarray(w2, bf16), jnp.asarray(w3, bf16),
            jnp.asarray(wfc, bf16), jnp.asarray(bfc[None, :], jnp.float32),
            jnp.asarray(wout, bf16), jnp.asarray(bout, jnp.float32))


# ----------------------------------------------------------------------------
# Pallas kernel: one tile of TB samples per grid step, 5 matmuls total.
# ----------------------------------------------------------------------------
def cnn_kernel(x_ref, w1_ref, w2_ref, w3_ref, wfc_ref, bfc_ref, wout_ref, bout_ref, o_ref):
    bf16 = jnp.bfloat16
    x = x_ref[...]                                                           # (TB, 32) bf16

    # conv1 + MaxPool(2) + ReLU (== ReLU + MaxPool; ReLU is monotone) : halves = pool taps.
    h1 = jnp.dot(x, w1_ref[...], preferred_element_type=jnp.float32)        # (TB, 1792)
    p1 = jnp.maximum(jnp.maximum(h1[:, :896], h1[:, 896:]), 0.0).astype(bf16)   # (TB, 896)

    # conv2 (bias-free) + MaxPool(2) + ReLU
    h2 = jnp.dot(p1, w2_ref[...], preferred_element_type=jnp.float32)       # (TB, 1536)
    p2 = jnp.maximum(jnp.maximum(h2[:, :768], h2[:, 768:]), 0.0).astype(bf16)   # (TB, 768)

    # conv3 (bias-free) + MaxPool(2) + ReLU
    h3 = jnp.dot(p2, w3_ref[...], preferred_element_type=jnp.float32)       # (TB, 1024)
    p3 = jnp.maximum(jnp.maximum(h3[:, :512], h3[:, 512:]), 0.0).astype(bf16)   # (TB, 512)

    # Dropout(0.5): identity in eval mode.  Linear(512,64) + folded BatchNorm + ReLU.
    y = jnp.dot(p3, wfc_ref[...], preferred_element_type=jnp.float32) + bfc_ref[...]
    y = jnp.maximum(y, 0.0).astype(bf16)                                    # (TB, 64)

    # Linear(64, 50) into a 128-wide slab; padded classes carry -1e30 logits.
    logits = jnp.dot(y, wout_ref[...], preferred_element_type=jnp.float32) + bout_ref[...]

    # LogSoftmax over the last axis (pad classes contribute exp(..) == 0).
    m = jnp.max(logits, axis=-1, keepdims=True)
    z = logits - m
    lse = jnp.log(jnp.sum(jnp.exp(z), axis=-1, keepdims=True))
    o_ref[...] = z - lse


# ----------------------------------------------------------------------------
# Wrapper: per-generation config, batch tiling, jitted glue + pallas_call
# ----------------------------------------------------------------------------
def _default_config():
    """(batch_tile, vmem_limit_bytes) per TPU generation (review recommendations)."""
    try:
        kind = jax.devices()[0].device_kind.lower()
    except Exception:
        kind = ""
    if "v6" in kind or "v5" in kind:
        return 1024, 64 << 20          # 128 MiB physical VMEM: big tile amortizes step overhead
    return 512, 44 << 20               # v7x (64 MiB VMEM) / unknown: conservative


def _tile_batch(B, tb):
    """Batch tile TB (multiple of ALIGN) and padded batch Bp.  Batches that fit a
    single tile are split into two tiles so v7x's two TensorCores both get work."""
    tb = max(ALIGN, (tb // ALIGN) * ALIGN)
    Bp_a = ((B + ALIGN - 1) // ALIGN) * ALIGN
    if Bp_a <= ALIGN:
        TB = ALIGN
    elif Bp_a <= tb:
        TB = ALIGN * ((Bp_a + 2 * ALIGN - 1) // (2 * ALIGN))   # two ~equal tiles
    else:
        TB = tb
    Bp = ((Bp_a + TB - 1) // TB) * TB
    return TB, Bp


def _const_spec(shape):
    """Constant-block-index (resident) operand; single-buffered to save VMEM."""
    idx = lambda b: (0, 0)
    try:
        return pl.BlockSpec(shape, idx, pipeline_mode=pl.Buffered(1))
    except TypeError:   # older jax without pipeline_mode kwarg
        return pl.BlockSpec(shape, idx)


@functools.partial(jax.jit, static_argnames=("tb", "vmem_limit"))
def _cnn_forward_impl(x, packed, tb, vmem_limit):
    B = x.shape[0]
    TB, Bp = _tile_batch(B, tb)

    # glue: drop channel dim, append [1, 0] columns (bias hook + alignment to 32),
    # pre-cast to bf16 (matmul input dtype) and pad the batch to a tile multiple.
    bf16 = jnp.bfloat16
    x2 = x[:, 0, :].astype(bf16)                                            # (B, 30)
    x_aug = jnp.concatenate(
        [x2, jnp.ones((B, 1), bf16), jnp.zeros((B, 1), bf16)], axis=1)
    x_aug = jnp.pad(x_aug, ((0, Bp - B), (0, 0)))                           # (Bp, 32)

    w1, w2, w3, wfc, bfc, wout, bout = packed

    out = pl.pallas_call(
        cnn_kernel,
        out_shape=jax.ShapeDtypeStruct((Bp, OUT_PAD), jnp.float32),
        grid_spec=pltpu.PrefetchScalarGridSpec(
            num_scalar_prefetch=0,
            grid=(Bp // TB,),
            in_specs=[
                pl.BlockSpec((TB, 32), lambda b: (b, 0)),    # x tile (TB samples)
                _const_spec(w1.shape),
                _const_spec(w2.shape),
                _const_spec(w3.shape),
                _const_spec(wfc.shape),
                _const_spec(bfc.shape),
                _const_spec(wout.shape),
                _const_spec(bout.shape),
            ],
            out_specs=pl.BlockSpec((TB, OUT_PAD), lambda b: (b, 0)),
        ),
        compiler_params=pltpu.CompilerParams(
            dimension_semantics=("parallel",),               # no cross-step carry
            vmem_limit_bytes=vmem_limit),
    )(x_aug, w1, w2, w3, wfc, bfc, wout, bout)
    return out[:B, :CLASSES]


def cnn_forward(x, packed, *, tb=None, vmem_limit=None):
    """x: (B, 1, L_IN) float32 (PyTorch NCL).  packed: result of pack_params(p).
    Returns (B, CLASSES) log-probs."""
    dtb, dvm = _default_config()
    return _cnn_forward_impl(x, packed,
                             tb=int(tb if tb is not None else dtb),
                             vmem_limit=int(vmem_limit if vmem_limit is not None else dvm))


# ----------------------------------------------------------------------------
# Pure-JAX/XLA reference mirroring the PyTorch forward (eval mode)
# ----------------------------------------------------------------------------
def cnn_reference(x, p):
    def conv1d(h, w, b=None):
        out = lax.conv_general_dilated(h, w, window_strides=(1,), padding=[(1, 1)],
                                       dimension_numbers=("NCH", "OIH", "NCH"))
        if b is not None:
            out = out + b[None, :, None]
        return out

    def maxpool2(h):
        L = h.shape[-1] // 2
        return jnp.maximum(h[..., 0:2 * L:2], h[..., 1:2 * L:2])

    h = maxpool2(jax.nn.relu(conv1d(x, p["w1"], p["b1"])))
    h = maxpool2(jax.nn.relu(conv1d(h, p["w2"])))
    h = maxpool2(jax.nn.relu(conv1d(h, p["w3"])))
    h = h.reshape(h.shape[0], -1)                        # (B, 512) channel-major
    y = h @ p["w_fc"].T + p["b_fc"]
    y = (y - p["bn_mean"]) * p["bn_gamma"] / jnp.sqrt(p["bn_var"] + BN_EPS) + p["bn_beta"]
    y = jax.nn.relu(y)
    logits = y @ p["w_out"].T + p["b_out"]
    return jax.nn.log_softmax(logits, axis=-1)


def init_params(key):
    ks = jax.random.split(key, 12)
    f = jnp.float32
    return {
        "w1": 0.20 * jax.random.normal(ks[0], (64, 1, 5), f),       # Conv1d(1, 64, 5)
        "b1": 0.10 * jax.random.normal(ks[1], (64,), f),
        "w2": 0.05 * jax.random.normal(ks[2], (128, 64, 5), f),     # Conv1d(64, 128, 5, bias=False)
        "w3": 0.05 * jax.random.normal(ks[3], (256, 128, 5), f),    # Conv1d(128, 256, 5, bias=False)
        "w_fc": 0.05 * jax.random.normal(ks[4], (64, 512), f),      # Linear(512, 64)
        "b_fc": 0.10 * jax.random.normal(ks[5], (64,), f),
        "bn_gamma": 1.0 + 0.1 * jax.random.normal(ks[6], (64,), f),
        "bn_beta": 0.1 * jax.random.normal(ks[7], (64,), f),
        "bn_mean": 0.1 * jax.random.normal(ks[8], (64,), f),
        "bn_var": 0.5 + jax.random.uniform(ks[9], (64,), f),
        "w_out": 0.10 * jax.random.normal(ks[10], (CLASSES, 64), f),  # Linear(64, 50)
        "b_out": 0.10 * jax.random.normal(ks[11], (CLASSES,), f),
    }


if __name__ == "__main__":
    key = jax.random.PRNGKey(0)
    kx, kp = jax.random.split(key)
    params = init_params(kp)
    B = 40
    x = jax.random.normal(kx, (B, 1, L_IN), jnp.float32)     # (batch, channels=1, length=30)

    # One-time host-side folding + HBM upload of packed weights (cached & reused).
    packed = pack_params(params)

    # B=40 fits one tile -> split into two tiles (both v7x TensorCores, exercises grid loop).
    out = cnn_forward(x, packed)
    out = jax.block_until_ready(out)
    # Second call: hits the jit cache, no re-packing / re-upload.
    out = jax.block_until_ready(cnn_forward(x, packed))

    ref = cnn_reference(x, params)
    # bf16 matmul inputs (f32 accumulation) -> loosened tolerance vs the f32 reference.
    np.testing.assert_allclose(np.asarray(out), np.asarray(ref), atol=5e-2, rtol=5e-2)
    # log-probs must exponentiate-sum to 1
    np.testing.assert_allclose(np.exp(np.asarray(out)).sum(-1), np.ones(B), atol=1e-3)

    print("KERNEL_OK")
</pallas_src>

<mosaic_0001>
module attributes {stable_mosaic.version = 11 : i64} {
  func.func @cnn_kernel(%arg0: i32, %arg1: memref<32x32xbf16, #tpu.memory_space<vmem>>, %arg2: memref<32x1792xbf16, #tpu.memory_space<vmem>>, %arg3: memref<896x1536xbf16, #tpu.memory_space<vmem>>, %arg4: memref<768x1024xbf16, #tpu.memory_space<vmem>>, %arg5: memref<512x64xbf16, #tpu.memory_space<vmem>>, %arg6: memref<1x64xf32, #tpu.memory_space<vmem>>, %arg7: memref<64x128xbf16, #tpu.memory_space<vmem>>, %arg8: memref<1x128xf32, #tpu.memory_space<vmem>>, %arg9: memref<32x128xf32, #tpu.memory_space<vmem>>) attributes {dimension_semantics = [#tpu.dimension_semantics<parallel>], iteration_bounds = array<i64: 2>, scalar_prefetch = 0 : i64, scratch_operands = 0 : i64, tpu.core_type = #tpu.core_type<tc>, window_params = [{transform_indices = @transform_0, window_bounds = array<i64: 32, 32>}, {pipeline_mode = #tpu.pipeline_mode<synchronous>, transform_indices = @transform_1, window_bounds = array<i64: 32, 1792>}, {pipeline_mode = #tpu.pipeline_mode<synchronous>, transform_indices = @transform_2, window_bounds = array<i64: 896, 1536>}, {pipeline_mode = #tpu.pipeline_mode<synchronous>, transform_indices = @transform_3, window_bounds = array<i64: 768, 1024>}, {pipeline_mode = #tpu.pipeline_mode<synchronous>, transform_indices = @transform_4, window_bounds = array<i64: 512, 64>}, {pipeline_mode = #tpu.pipeline_mode<synchronous>, transform_indices = @transform_5, window_bounds = array<i64: 1, 64>}, {pipeline_mode = #tpu.pipeline_mode<synchronous>, transform_indices = @transform_6, window_bounds = array<i64: 64, 128>}, {pipeline_mode = #tpu.pipeline_mode<synchronous>, transform_indices = @transform_7, window_bounds = array<i64: 1, 128>}, {transform_indices = @transform_8, window_bounds = array<i64: 32, 128>}]} {
    %c0 = arith.constant 0 : index
    %c0_0 = arith.constant 0 : index
    %0 = vector.load %arg1[%c0, %c0_0] : memref<32x32xbf16, #tpu.memory_space<vmem>>, vector<32x32xbf16>
    %c0_1 = arith.constant 0 : index
    %c0_2 = arith.constant 0 : index
    %1 = vector.load %arg2[%c0_1, %c0_2] : memref<32x1792xbf16, #tpu.memory_space<vmem>>, vector<32x1792xbf16>
    %cst = arith.constant dense<0.000000e+00> : vector<32x1792xf32>
    %2 = tpu.matmul %0, %1, %cst {dimension_numbers = #tpu.dot_dimension_numbers<[1], [0], [0], [1], [0, 0, 1, 1], [], []>} : vector<32x32xbf16>, vector<32x1792xbf16>, vector<32x1792xf32> -> vector<32x1792xf32>
    %3 = vector.extract_strided_slice %2 {offsets = [0, 0], sizes = [32, 896], strides = [1, 1]} : vector<32x1792xf32> to vector<32x896xf32>
    %4 = vector.extract_strided_slice %2 {offsets = [0, 896], sizes = [32, 896], strides = [1, 1]} : vector<32x1792xf32> to vector<32x896xf32>
    %5 = arith.maximumf %3, %4 : vector<32x896xf32>
    %cst_3 = arith.constant 0.000000e+00 : f32
    %6 = vector.broadcast %cst_3 : f32 to vector<32x896xf32>
    %7 = arith.maximumf %5, %6 : vector<32x896xf32>
    %8 = arith.truncf %7 : vector<32x896xf32> to vector<32x896xbf16>
    %c0_4 = arith.constant 0 : index
    %c0_5 = arith.constant 0 : index
    %9 = vector.load %arg3[%c0_4, %c0_5] : memref<896x1536xbf16, #tpu.memory_space<vmem>>, vector<896x1536xbf16>
    %cst_6 = arith.constant dense<0.000000e+00> : vector<32x1536xf32>
    %10 = tpu.matmul %8, %9, %cst_6 {dimension_numbers = #tpu.dot_dimension_numbers<[1], [0], [0], [1], [0, 0, 1, 1], [], []>} : vector<32x896xbf16>, vector<896x1536xbf16>, vector<32x1536xf32> -> vector<32x1536xf32>
    %11 = vector.extract_strided_slice %10 {offsets = [0, 0], sizes = [32, 768], strides = [1, 1]} : vector<32x1536xf32> to vector<32x768xf32>
    %12 = vector.extract_strided_slice %10 {offsets = [0, 768], sizes = [32, 768], strides = [1, 1]} : vector<32x1536xf32> to vector<32x768xf32>
    %13 = arith.maximumf %11, %12 : vector<32x768xf32>
    %cst_7 = arith.constant 0.000000e+00 : f32
    %14 = vector.broadcast %cst_7 : f32 to vector<32x768xf32>
    %15 = arith.maximumf %13, %14 : vector<32x768xf32>
    %16 = arith.truncf %15 : vector<32x768xf32> to vector<32x768xbf16>
    %c0_8 = arith.constant 0 : index
    %c0_9 = arith.constant 0 : index
    %17 = vector.load %arg4[%c0_8, %c0_9] : memref<768x1024xbf16, #tpu.memory_space<vmem>>, vector<768x1024xbf16>
    %cst_10 = arith.constant dense<0.000000e+00> : vector<32x1024xf32>
    %18 = tpu.matmul %16, %17, %cst_10 {dimension_numbers = #tpu.dot_dimension_numbers<[1], [0], [0], [1], [0, 0, 1, 1], [], []>} : vector<32x768xbf16>, vector<768x1024xbf16>, vector<32x1024xf32> -> vector<32x1024xf32>
    %19 = vector.extract_strided_slice %18 {offsets = [0, 0], sizes = [32, 512], strides = [1, 1]} : vector<32x1024xf32> to vector<32x512xf32>
    %20 = vector.extract_strided_slice %18 {offsets = [0, 512], sizes = [32, 512], strides = [1, 1]} : vector<32x1024xf32> to vector<32x512xf32>
    %21 = arith.maximumf %19, %20 : vector<32x512xf32>
    %cst_11 = arith.constant 0.000000e+00 : f32
    %22 = vector.broadcast %cst_11 : f32 to vector<32x512xf32>
    %23 = arith.maximumf %21, %22 : vector<32x512xf32>
    %24 = arith.truncf %23 : vector<32x512xf32> to vector<32x512xbf16>
    %c0_12 = arith.constant 0 : index
    %c0_13 = arith.constant 0 : index
    %25 = vector.load %arg5[%c0_12, %c0_13] : memref<512x64xbf16, #tpu.memory_space<vmem>>, vector<512x64xbf16>
    %cst_14 = arith.constant dense<0.000000e+00> : vector<32x64xf32>
    %26 = tpu.matmul %24, %25, %cst_14 {dimension_numbers = #tpu.dot_dimension_numbers<[1], [0], [0], [1], [0, 0, 1, 1], [], []>} : vector<32x512xbf16>, vector<512x64xbf16>, vector<32x64xf32> -> vector<32x64xf32>
    %c0_15 = arith.constant 0 : index
    %c0_16 = arith.constant 0 : index
    %27 = vector.load %arg6[%c0_15, %c0_16] : memref<1x64xf32, #tpu.memory_space<vmem>>, vector<1x64xf32>
    %28 = vector.broadcast %27 : vector<1x64xf32> to vector<32x64xf32>
    %29 = arith.addf %26, %28 : vector<32x64xf32>
    %cst_17 = arith.constant 0.000000e+00 : f32
    %30 = vector.broadcast %cst_17 : f32 to vector<32x64xf32>
    %31 = arith.maximumf %29, %30 : vector<32x64xf32>
    %32 = arith.truncf %31 : vector<32x64xf32> to vector<32x64xbf16>
    %c0_18 = arith.constant 0 : index
    %c0_19 = arith.constant 0 : index
    %33 = vector.load %arg7[%c0_18, %c0_19] : memref<64x128xbf16, #tpu.memory_space<vmem>>, vector<64x128xbf16>
    %cst_20 = arith.constant dense<0.000000e+00> : vector<32x128xf32>
    %34 = tpu.matmul %32, %33, %cst_20 {dimension_numbers = #tpu.dot_dimension_numbers<[1], [0], [0], [1], [0, 0, 1, 1], [], []>} : vector<32x64xbf16>, vector<64x128xbf16>, vector<32x128xf32> -> vector<32x128xf32>
    %c0_21 = arith.constant 0 : index
    %c0_22 = arith.constant 0 : index
    %35 = vector.load %arg8[%c0_21, %c0_22] : memref<1x128xf32, #tpu.memory_space<vmem>>, vector<1x128xf32>
    %36 = vector.broadcast %35 : vector<1x128xf32> to vector<32x128xf32>
    %37 = arith.addf %34, %36 : vector<32x128xf32>
    %cst_23 = arith.constant dense<0xFF800000> : vector<32xf32>
    %38 = vector.multi_reduction <maximumf>, %37, %cst_23 [1] : vector<32x128xf32> to vector<32xf32>
    %39 = vector.shape_cast %38 : vector<32xf32> to vector<32x1xf32>
    %40 = vector.broadcast %39 : vector<32x1xf32> to vector<32x128xf32>
    %41 = arith.subf %37, %40 : vector<32x128xf32>
    %42 = math.exp %41 : vector<32x128xf32>
    %cst_24 = arith.constant dense<0.000000e+00> : vector<32xf32>
    %43 = vector.multi_reduction <add>, %42, %cst_24 [1] : vector<32x128xf32> to vector<32xf32>
    %44 = vector.shape_cast %43 : vector<32xf32> to vector<32x1xf32>
    %45 = math.log %44 : vector<32x1xf32>
    %46 = vector.broadcast %45 : vector<32x1xf32> to vector<32x128xf32>
    %47 = arith.subf %41, %46 : vector<32x128xf32>
    %c0_25 = arith.constant 0 : index
    %c0_26 = arith.constant 0 : index
    %48 = vector.load %arg9[%c0_25, %c0_26] : memref<32x128xf32, #tpu.memory_space<vmem>>, vector<32x128xf32>
    tpu.vector_store %arg9[%c0_25, %c0_26], %47 {strides = array<i32>} : memref<32x128xf32, #tpu.memory_space<vmem>>, vector<32x128xf32>,
    return
  }
  func.func @transform_0(%arg0: i32) -> (i32, i32) {
    %c0_i32 = arith.constant 0 : i32
    %c0_i32_0 = arith.constant 0 : i32
    return %arg0, %c0_i32 : i32, i32
  }
  func.func @transform_1(%arg0: i32) -> (i32, i32) {
    %c0_i32 = arith.constant 0 : i32
    %c0_i32_0 = arith.constant 0 : i32
    %c0_i32_1 = arith.constant 0 : i32
    return %c0_i32, %c0_i32_0 : i32, i32
  }
  func.func @transform_2(%arg0: i32) -> (i32, i32) {
    %c0_i32 = arith.constant 0 : i32
    %c0_i32_0 = arith.constant 0 : i32
    %c0_i32_1 = arith.constant 0 : i32
    return %c0_i32, %c0_i32_0 : i32, i32
  }
  func.func @transform_3(%arg0: i32) -> (i32, i32) {
    %c0_i32 = arith.constant 0 : i32
    %c0_i32_0 = arith.constant 0 : i32
    %c0_i32_1 = arith.constant 0 : i32
    return %c0_i32, %c0_i32_0 : i32, i32
  }
  func.func @transform_4(%arg0: i32) -> (i32, i32) {
    %c0_i32 = arith.constant 0 : i32
    %c0_i32_0 = arith.constant 0 : i32
    %c0_i32_1 = arith.constant 0 : i32
    return %c0_i32, %c0_i32_0 : i32, i32
  }
  func.func @transform_5(%arg0: i32) -> (i32, i32) {
    %c0_i32 = arith.constant 0 : i32
    %c0_i32_0 = arith.constant 0 : i32
    %c0_i32_1 = arith.constant 0 : i32
    return %c0_i32, %c0_i32_0 : i32, i32
  }
  func.func @transform_6(%arg0: i32) -> (i32, i32) {
    %c0_i32 = arith.constant 0 : i32
    %c0_i32_0 = arith.constant 0 : i32
    %c0_i32_1 = arith.constant 0 : i32
    return %c0_i32, %c0_i32_0 : i32, i32
  }
  func.func @transform_7(%arg0: i32) -> (i32, i32) {
    %c0_i32 = arith.constant 0 : i32
    %c0_i32_0 = arith.constant 0 : i32
    %c0_i32_1 = arith.constant 0 : i32
    return %c0_i32, %c0_i32_0 : i32, i32
  }
  func.func @transform_8(%arg0: i32) -> (i32, i32) {
    %c0_i32 = arith.constant 0 : i32
    %c0_i32_0 = arith.constant 0 : i32
    return %arg0, %c0_i32 : i32, i32
  }
}

</mosaic_0001>

<bundles_post_ra>
// kernel: _cnn_forward_impl.1
= control target key start
LH: loop header
LB: loop body
LE: loop exit
PB: predicated region body
PF: predicated region fallthrough
CT: control target
= control target key end

     0   :  { %13 = vsyncpa [#allocation3], 0  ;;  %s13576_s0 = inlined_call_operand.vmem [shape: bf16[64,32], index: 0, kind: input, shape index: {}]   ;;  %s13577_s1 = inlined_call_operand.hbm [shape: bf16[32,1792], index: 1, kind: input, shape index: {}]   ;;  %s13578_s2 = inlined_call_operand.hbm [shape: bf16[896,1536], index: 2, kind: input, shape index: {}]   ;;  %s13579_s3 = inlined_call_operand.hbm [shape: bf16[768,1024], index: 3, kind: input, shape index: {}]   ;;  %s13580_s4 = inlined_call_operand.vmem [shape: bf16[512,64], index: 4, kind: input, shape index: {}]   ;;  %s13581_s5 = inlined_call_operand.hbm [shape: f32[1,64], index: 5, kind: input, shape index: {}]   ;;  %s13582_s6 = inlined_call_operand.hbm [shape: bf16[64,128], index: 6, kind: input, shape index: {}]   ;;  %s13583_s7 = inlined_call_operand.hbm [shape: f32[1,128], index: 7, kind: input, shape index: {}]   ;;  %s13584_s8 = inlined_call_operand.vmem [shape: f32[64,128], index: 8, kind: output, shape index: {}]  }
   0x1   :  { %14 = vsyncpa [#allocation5], 0 }
   0x2   :  { %15 = vsyncpa [#allocation8], 0 }
   0x3   :  { %16 = vsyncpa [#allocation11], 0  ;;  %s12869_s27 = smov 0  }
   0x4 LB: > { %s12809_s28 = smov [#allocation4]   ;;  %s9990_s30 = sadd.s32 4294967295, %s12807_s27   ;;  %s12807_s27 = sphi %s12869_s27, %s22_s27  }
   0x5   : > { %s251_s29 = sshll.u32 %s12809_s28, 4  ;;  %p9992_p0 = scmp.ge.s32.totalorder %s12807_s27, 1  ;;  %s12883_s29 = int_to_ptr.vmem [resolvable:$true] %s251_s29 }
   0x6   : > { %p226_p1 = scmp.lt.s32.totalorder %s12807_s27, 3  ;;  %p12879_p2 = scmp.eq.s32.totalorder %s9990_s30, 0 }
   0x7   : > { %s12810_s11 = smov [#allocation7]   ;;  %s12811_s14 = smov [#allocation2]  }
   0x8   : > { %s13588_s9 = scalar_select %p12879_p2, 1, 0 }
   0x9   : > { %p12885_p3 = pnand %p9992_p0, %p226_p1  ;;  %s281_s12 = sshll.u32 %s12810_s11, 4  ;;  %s12891_s12 = int_to_ptr.vmem [resolvable:$true] %s281_s12 }
   0xa   : > { %s238_s15 = sshll.u32 %s12811_s14, 4  ;;  %s12617_s18 = scalar_lea.hbm %s13578_s2, 86016  ;;  %s12899_s15 = int_to_ptr.vmem [resolvable:$true] %s238_s15 }
   0xb   : > { %s13589_s10 = scalar_select %p12885_p3, 1, 0 }
   0xc   : > { %p11459_p4 = pneg %p12885_p3  ;;  %p12618_p6 = scmp.ne.s32.totalorder %s13578_s2, %s12617_s18 }
   0xd   : > { %p12624_p10 = scmp.lt.u32.totalorder %s12617_s18, %s13578_s2 }
   0xe   : > { %p12895_p5 = pnand %p12879_p2, %p11459_p4 }
  0x10   : > { %p12909_p7 = pneg %p12895_p5 }
  0x12   : > { %p12620_p8 = pnand %p12909_p7, %p12618_p6 }
  0x14   : > { %p12621_p9 = pneg %p12620_p8 }
  0x16   : > { %p12626_p11 = pnand %p12624_p10, %p12621_p9 }
  0x18   : > { %12629 = shalt.err (!%p12626_p11)
}
  0x19   : > { %s12630_s24 = scalar_lea.vmem %s12883_s29, 86016  ;;  %p12638_p1 = scmp.lt.s32.totalorder %s12883_s29, %s12883_s29 }
  0x1a   : > { %p12631_p12 = scmp.ne.s32.totalorder %s12883_s29, %s12630_s24  ;;  %p12639_p4 = scmp.lt.s32.totalorder %s12630_s24, %s12630_s24 }
  0x1c   : > { %p12633_p13 = pnand %p12631_p12, %p12909_p7  ;;  %p12640_p6 = por %p12639_p4, %p12638_p1 }
  0x1e   : > { %p12634_p0 = pneg %p12633_p13 }
  0x20   : > { %p12641_p8 = pnand %p12640_p6, %p12634_p0 }
  0x22   : > { %12644 = shalt.err (!%p12641_p8)
}
  0x23   : > { %s12812_s25 = smov 768   ;;  %s12813_s26 = smov 48  }
  0x24   : > { %11465 = dma.hbm_to_vmem [thread:$0]  (!%p12895_p5), %s13578_s2, 86016, %s12883_s29, [#allocation5], %s12812_s25, %s12812_s25, %s12813_s26  }
  0x25   : > { %s12645_s17 = scalar_lea.hbm %s13581_s5, 16 }
  0x26   : > { %p12646_p9 = scmp.ne.s32.totalorder %s13581_s5, %s12645_s17  ;;  %p12652_p12 = scmp.lt.u32.totalorder %s12645_s17, %s13581_s5 }
  0x28   : > { %p12648_p10 = pnand %p12646_p9, %p12909_p7 }
  0x2a   : > { %p12649_p11 = pneg %p12648_p10 }
  0x2c   : > { %p12654_p13 = pnand %p12652_p12, %p12649_p11 }
  0x2e   : > { %12657 = shalt.err (!%p12654_p13)
}
  0x2f   : > { %s12658_s29 = scalar_lea.vmem %s12891_s12, 16  ;;  %s12665_s23 = scalar_lea.vmem %s12891_s12, 32 }
  0x30   : > { %p12659_p0 = scmp.ne.s32.totalorder %s12891_s12, %s12658_s29  ;;  %p12666_p6 = scmp.lt.s32.totalorder %s12891_s12, %s12891_s12 }
  0x31   : > { %p12667_p8 = scmp.lt.s32.totalorder %s12665_s23, %s12658_s29 }
  0x32   : > { %p12661_p1 = pnand %p12659_p0, %p12909_p7 }
  0x33   : > { %p12668_p9 = por %p12667_p8, %p12666_p6 }
  0x34   : > { %p12662_p4 = pneg %p12661_p1 }
  0x36   : > { %p12669_p10 = pnand %p12668_p9, %p12662_p4 }
  0x38   : > { %12672 = shalt.err (!%p12669_p10)
}
  0x39   : > { %11471 = dma.hbm_to_vmem [thread:$0]  (!%p12895_p5), %s13581_s5, 16, %s12891_s12, [#allocation8]  }
  0x3a   : > { %s12673_s11 = scalar_lea.hbm %s13577_s1, 3584 }
  0x3b   : > { %p12674_p11 = scmp.ne.s32.totalorder %s13577_s1, %s12673_s11  ;;  %p12680_p0 = scmp.lt.u32.totalorder %s12673_s11, %s13577_s1 }
  0x3d   : > { %p12676_p12 = pnand %p12674_p11, %p12909_p7 }
  0x3f   : > { %p12677_p13 = pneg %p12676_p12 }
  0x41   : > { %p12682_p1 = pnand %p12680_p0, %p12677_p13 }
  0x43   : > { %12685 = shalt.err (!%p12682_p1)
}
  0x44   : > { %s12686_s12 = scalar_lea.vmem %s12899_s15, 3584  ;;  %p12694_p9 = scmp.lt.s32.totalorder %s12899_s15, %s12899_s15 }
  0x45   : > { %p12687_p4 = scmp.ne.s32.totalorder %s12899_s15, %s12686_s12  ;;  %p12695_p10 = scmp.lt.s32.totalorder %s12686_s12, %s12686_s12 }
  0x47   : > { %p12689_p6 = pnand %p12687_p4, %p12909_p7  ;;  %p12696_p11 = por %p12695_p10, %p12694_p9 }
  0x49   : > { %p12690_p8 = pneg %p12689_p6 }
  0x4b   : > { %p12697_p12 = pnand %p12696_p11, %p12690_p8 }
  0x4d   : > { %12700 = shalt.err (!%p12697_p12)
}
  0x4e   : > { %s12814_s19 = smov 896   ;;  %s12815_s20 = smov 56  }
  0x4f   : > { %11462 = dma.hbm_to_vmem [thread:$0]  (!%p12895_p5), %s13577_s1, 3584, %s12899_s15, [#allocation3], %s12814_s19, %s12814_s19, %s12815_s20  }
  0x50   : > { %s12816_s23 = smov [#allocation6]   ;;  %s12701_s28 = scalar_lea.hbm %s13579_s3, 49152 }
  0x51   : > { %s264_s24 = sshll.u32 %s12816_s23, 4  ;;  %p12702_p13 = scmp.ne.s32.totalorder %s13579_s3, %s12701_s28  ;;  %s265_s24 = int_to_ptr.vmem [resolvable:$true] %s264_s24 }
  0x52   : > { %p12708_p4 = scmp.lt.u32.totalorder %s12701_s28, %s13579_s3 }
  0x53   : > { %p12704_p0 = pnand %p12702_p13, %p12909_p7 }
  0x55   : > { %p12705_p1 = pneg %p12704_p0 }
  0x57   : > { %p12710_p6 = pnand %p12708_p4, %p12705_p1 }
  0x59   : > { %12713 = shalt.err (!%p12710_p6)
}
  0x5a   : > { %s12714_s15 = scalar_lea.vmem %s265_s24, 49152  ;;  %p12722_p11 = scmp.lt.s32.totalorder %s265_s24, %s265_s24 }
  0x5b   : > { %p12715_p8 = scmp.ne.s32.totalorder %s265_s24, %s12714_s15  ;;  %p12723_p12 = scmp.lt.s32.totalorder %s12714_s15, %s12714_s15 }
  0x5d   : > { %p12717_p9 = pnand %p12715_p8, %p12909_p7  ;;  %p12724_p2 = por %p12723_p12, %p12722_p11 }
  0x5f   : > { %p12718_p10 = pneg %p12717_p9 }
  0x61   : > { %p12725_p3 = pnand %p12724_p2, %p12718_p10 }
  0x63   : > { %12728 = shalt.err (!%p12725_p3)
}
  0x64   : > { %s12817_s18 = smov 512   ;;  %s12818_s12 = smov 32  }
  0x65   : > { %11468 = dma.hbm_to_vmem [thread:$0]  (!%p12895_p5), %s13579_s3, 49152, %s265_s24, [#allocation5], %s12817_s18, %s12817_s18, %s12818_s12  }
  0x66   : > { %s12819_s22 = smov [#allocation9]   ;;  %s12729_s26 = scalar_lea.hbm %s13582_s6, 512 }
  0x67   : > { %s291_s29 = sshll.u32 %s12819_s22, 4  ;;  %p12730_p2 = scmp.ne.s32.totalorder %s13582_s6, %s12729_s26  ;;  %s292_s29 = int_to_ptr.vmem [resolvable:$true] %s291_s29 }
  0x68   : > { %p12736_p0 = scmp.lt.u32.totalorder %s12729_s26, %s13582_s6 }
  0x69   : > { %p12732_p3 = pnand %p12730_p2, %p12909_p7 }
  0x6b   : > { %p12733_p13 = pneg %p12732_p3 }
  0x6d   : > { %p12738_p1 = pnand %p12736_p0, %p12733_p13 }
  0x6f   : > { %12741 = shalt.err (!%p12738_p1)
}
  0x70   : > { %s12742_s24 = scalar_lea.vmem %s292_s29, 512  ;;  %p12750_p9 = scmp.lt.s32.totalorder %s292_s29, %s292_s29 }
  0x71   : > { %p12743_p4 = scmp.ne.s32.totalorder %s292_s29, %s12742_s24  ;;  %p12751_p10 = scmp.lt.s32.totalorder %s12742_s24, %s12742_s24 }
  0x73   : > { %p12745_p6 = pnand %p12743_p4, %p12909_p7  ;;  %p12752_p11 = por %p12751_p10, %p12750_p9 }
  0x75   : > { %p12746_p8 = pneg %p12745_p6 }
  0x77   : > { %p12753_p12 = pnand %p12752_p11, %p12746_p8 }
  0x79   : > { %12756 = shalt.err (!%p12753_p12)
}
  0x7a   : > { %s12820_s17 = smov 64   ;;  %s12821_s15 = smov 4  }
  0x7b   : > { %11474 = dma.hbm_to_vmem [thread:$0]  (!%p12895_p5), %s13582_s6, 512, %s292_s29, [#allocation8], %s12820_s17, %s12820_s17, %s12821_s15  }
  0x7c   : > { %s12822_s19 = smov [#allocation10]   ;;  %s12757_s25 = scalar_lea.hbm %s13583_s7, 16 }
  0x7d   : > { %s305_s20 = sshll.u32 %s12822_s19, 4  ;;  %p12758_p2 = scmp.ne.s32.totalorder %s13583_s7, %s12757_s25  ;;  %s306_s20 = int_to_ptr.vmem [resolvable:$true] %s305_s20 }
  0x7e   : > { %p12764_p0 = scmp.lt.u32.totalorder %s12757_s25, %s13583_s7 }
  0x7f   : > { %p12760_p3 = pnand %p12758_p2, %p12909_p7 }
  0x81   : > { %p12761_p13 = pneg %p12760_p3 }
  0x83   : > { %p12766_p1 = pnand %p12764_p0, %p12761_p13 }
  0x85   : > { %12769 = shalt.err (!%p12766_p1)
}
  0x86   : > { %s12770_s29 = scalar_lea.vmem %s306_s20, 16  ;;  %s12777_s16 = scalar_lea.vmem %s306_s20, 32 }
  0x87   : > { %p12771_p4 = scmp.ne.s32.totalorder %s306_s20, %s12770_s29  ;;  %p12778_p9 = scmp.lt.s32.totalorder %s306_s20, %s306_s20 }
  0x88   : > { %p12779_p10 = scmp.lt.s32.totalorder %s12777_s16, %s12770_s29 }
  0x89   : > { %p12773_p6 = pnand %p12771_p4, %p12909_p7 }
  0x8a   : > { %p12780_p11 = por %p12779_p10, %p12778_p9 }
  0x8b   : > { %p12774_p8 = pneg %p12773_p6 }
  0x8d   : > { %p12781_p12 = pnand %p12780_p11, %p12774_p8 }
  0x8f   : > { %12784 = shalt.err (!%p12781_p12)
}
  0x90   : > { %11477 = dma.hbm_to_vmem [thread:$0]  (!%p12895_p5), %s13583_s7, 16, %s306_s20, [#allocation11]  }
  0x91   : > { %p13592_p2 = scmp.ne.s32.totalorder %s13589_s10, 0 }
  0x92   : > { %p13593_p3 = scmp.ne.s32.totalorder (!%p13592_p2), %s13588_s9, 0 }
  0x93   : > { %327 = sbr.rel (%p13592_p2) target bundleno = 2512 (0x9d0), region = 52 }
  0x9a   : > { %12790 = dma.done.wait (%p13593_p3), [#allocation3], 3584  }
  0x9b   : > { %12792 = vsyncadd (%p13593_p3), [#allocation3], 4294963712 }
  0x9c   : > { %12794 = dma.done.wait (%p13593_p3), [#allocation5], 135168  }
  0x9d   : > { %12796 = vsyncadd (%p13593_p3), [#allocation5], 4294832128 }
  0x9e   : > { %12798 = dma.done.wait (%p13593_p3), [#allocation8], 528  }
  0x9f   : > { %12800 = vsyncadd (%p13593_p3), [#allocation8], 4294966768 }
  0xa0   : > { %12802 = dma.done.wait (%p13593_p3), [#allocation11], 16  }
  0xa1   : > { %12804 = vsyncadd (%p13593_p3), [#allocation11], 4294967280  ;;  %s10007_s10 = sshll.u32 %s9990_s30, 2  ;;  %v12823_v0 = vmov 0   ;;  %v11513_v1 = vld [vmem:[#allocation2 + $0x4] ss:$56 sps:$4 sm:$0xff]  }
  0xa2   : > { %615 = vmatprep.mubr.bf16.mxu0 %v12823_v0  ;;  %668 = vmatprep.mubr.bf16.mxu1 %v12823_v0  ;;  %p382_p5 = scmp.lt.s32.totalorder %s10007_s10, 7  ;;  %v11515_v2 = vld [vmem:[#allocation2 + $0xc] ss:$56 sps:$4 sm:$0xff]   ;;  %v11517_v3 = vld [vmem:[#allocation2] ss:$56 sps:$4 sm:$0xff]   ;;  %vm576_vm0 = vcmask 261120  }
  0xa3   : > { %583 = vmatprep.subr.bf16.mxu0 %v11513_v1  ;;  %v11518_v4 = vld [vmem:[#allocation2 + $0x8] ss:$56 sps:$4 sm:$0xff]   ;;  %636 = vmatprep.subr.bf16.mxu1 %v11515_v2  ;;  %v11519_v5 = vld [vmem:[#allocation2 + $0x74] ss:$56 sps:$4 sm:$0xff]   ;;  %v11524_v8 = vld [vmem:[#allocation2 + $0x78] ss:$56 sps:$4 sm:$0xff]  }
  0xa4   : > { %s13595_s10 = smov (!%p382_p5, %s10007_s10), 7  ;;  %584 = vmatpush1.bf16.msra.mxu0 %v11517_v3  ;;  %637 = vmatpush1.bf16.msra.mxu1 %v11518_v4  ;;  %v11521_v6 = vld [vmem:[#allocation2 + $0x7c] ss:$56 sps:$4 sm:$0xff]   ;;  %v11523_v7 = vld [vmem:[#allocation2 + $0x70] ss:$56 sps:$4 sm:$0xff]   ;;  %vm9774_vm1 = vcmask 523264  }
  0xa5   : > { %s10008_s13 = sshll.u32 %s13595_s10, 2  ;;  %585 = vmatprep.subr.bf16.mxu0 %v11519_v5  ;;  %638 = vmatprep.subr.bf16.mxu1 %v11521_v6  ;;  %v11528_v10 = vld [vmem:[#allocation2 + $0x14] ss:$56 sps:$4 sm:$0xff]   ;;  %v11526_v11 = vld [vmem:[#allocation2 + $0x10] ss:$56 sps:$4 sm:$0xff]   ;;  %s10010_s20 = sshll.u32 %s13595_s10, 3 }
  0xa6   : > { %s385_s21 = scalar_lea.vmem %s13576_s0, %s10008_s13  ;;  %v11532_v12 = vld [vmem:[#allocation2 + $0x84] ss:$56 sps:$4 sm:$0xff]   ;;  %v11533_v13 = vld [vmem:[#allocation2 + $0x18] ss:$56 sps:$4 sm:$0xff]   ;;  %v11536_v19 = vld [vmem:[#allocation2 + $0x88] ss:$56 sps:$4 sm:$0xff]   ;;  %s391_s25 = scalar_lea.vmem %s13584_s8, %s10010_s20 }
  0xa7   : > { %v13059_v9 = vld [vmem:[%s385_s21] sm:$0xff]   ;;  %v11535_v14 = vld [vmem:[#allocation2 + $0x1c] ss:$56 sps:$4 sm:$0xff]   ;;  %v13067_v18 = vld [vmem:[%s385_s21 + $0x8] sm:$0xff]  }
  0xa8   : > { %586 = vmatpush1.bf16.msra.mxu0 %v11523_v7  ;;  %639 = vmatpush1.bf16.msra.mxu1 %v11524_v8  ;;  %v11530_v15 = vld [vmem:[#allocation2 + $0x80] ss:$56 sps:$4 sm:$0xff]   ;;  %v11538_v16 = vld [vmem:[#allocation2 + $0x8c] ss:$56 sps:$4 sm:$0xff]   ;;  %v11550_v24 = vld [vmem:[#allocation2 + $0x9c] ss:$56 sps:$4 sm:$0xff]  }
  0xa9   : > { %689 = vmatprep.subr.bf16.mxu0 %v11528_v10  ;;  %v11541_v17 = vld [vmem:[#allocation2 + $0x24] ss:$56 sps:$4 sm:$0xff]   ;;  %742 = vmatprep.subr.bf16.mxu1 %v11535_v14  ;;  %v11539_v21 = vld [vmem:[#allocation2 + $0x20] ss:$56 sps:$4 sm:$0xff]   ;;  %v11544_v22 = vld [vmem:[#allocation2 + $0x94] ss:$56 sps:$4 sm:$0xff]  }
  0xaa   : > { %v11547_v20 = vld [vmem:[#allocation2 + $0x2c] ss:$56 sps:$4 sm:$0xff]   ;;  %v11545_v23 = vld [vmem:[#allocation2 + $0x28] ss:$56 sps:$4 sm:$0xff]   ;;  %v11548_v27 = vld [vmem:[#allocation2 + $0x98] ss:$56 sps:$4 sm:$0xff]  }
  0xab   : > { %10041 = vmatmul.mubr.msk.bf16.vlgmr.msra.gmra.mrb[0].mxu0 %vm576_vm0, %v13059_v9  ;;  %10043 = vmatmul.mubr.msk.bf16.vlgmr.msra.gmra.mrb[0].mxu1 %vm576_vm0, %v13059_v9  ;;  %v11542_v25 = vld [vmem:[#allocation2 + $0x90] ss:$56 sps:$4 sm:$0xff]   ;;  %v11553_v26 = vld [vmem:[#allocation2 + $0x34] ss:$56 sps:$4 sm:$0xff]   ;;  %v11556_v31 = vld [vmem:[#allocation2 + $0xa4] ss:$56 sps:$4 sm:$0xff]  }
  0xac   : > { %690 = vmatpush1.bf16.msra.mxu0 %v11526_v11  ;;  %625 = vmatprep.mubr.bf16.mxu0 %v12823_v0  ;;  %v11559_v28 = vld [vmem:[#allocation4 + $0x4] ss:$48 sps:$4 sm:$0xff]   ;;  %v11551_v29 = vld [vmem:[#allocation2 + $0x30] ss:$56 sps:$4 sm:$0xff]   ;;  %v11554_v33 = vld [vmem:[#allocation2 + $0xa0] ss:$56 sps:$4 sm:$0xff]  }
  0xad   : > { %678 = vmatprep.mubr.bf16.mxu1 %v12823_v0  ;;  %691 = vmatprep.subr.bf16.mxu0 %v11532_v12  ;;  %v11557_v30 = vld [vmem:[#allocation4] ss:$48 sps:$4 sm:$0xff]   ;;  %v11565_v32 = vld [vmem:[#allocation4 + $0x64] ss:$48 sps:$4 sm:$0xff]   ;;  %v11562_v35 = vld [vmem:[#allocation4 + $0xc] ss:$48 sps:$4 sm:$0xff]  }
  0xae   : > { %743 = vmatpush1.bf16.msra.mxu1 %v11533_v13  ;;  %v11563_v34 = vld [vmem:[#allocation4 + $0x60] ss:$48 sps:$4 sm:$0xff]   ;;  %v11571_v36 = vld [vmem:[#allocation4 + $0xc4] ss:$48 sps:$4 sm:$0xff]   ;;  %v11560_v41 = vld [vmem:[#allocation4 + $0x8] ss:$48 sps:$4 sm:$0xff]  }
  0xaf   : > { %744 = vmatprep.subr.bf16.mxu1 %v11538_v16  ;;  %v11569_v37 = vld [vmem:[#allocation4 + $0xc0] ss:$48 sps:$4 sm:$0xff]   ;;  %v11577_v38 = vld [vmem:[#allocation4 + $0x124] ss:$48 sps:$4 sm:$0xff]   ;;  %v11568_v42 = vld [vmem:[#allocation4 + $0x6c] ss:$48 sps:$4 sm:$0xff]  }
  0xb0   : > { %692 = vmatpush1.bf16.msra.mxu0 %v11530_v15  ;;  %v11575_v39 = vld [vmem:[#allocation4 + $0x120] ss:$48 sps:$4 sm:$0xff]   ;;  %v11583_v40 = vld [vmem:[#allocation4 + $0x184] ss:$48 sps:$4 sm:$0xff]   ;;  %v11566_v45 = vld [vmem:[#allocation4 + $0x68] ss:$48 sps:$4 sm:$0xff]  }
  0xb1   : > { %795 = vmatprep.subr.bf16.mxu0 %v11541_v17  ;;  %v11581_v43 = vld [vmem:[#allocation4 + $0x180] ss:$48 sps:$4 sm:$0xff]   ;;  %v11589_v44 = vld [vmem:[#allocation4 + $0x1e4] ss:$48 sps:$4 sm:$0xff]   ;;  %v11574_v46 = vld [vmem:[#allocation4 + $0xcc] ss:$48 sps:$4 sm:$0xff]  }
  0xb2   : > { %745 = vmatpush1.bf16.msra.mxu1 %v11536_v19  ;;  %v11587_v47 = vld [vmem:[#allocation4 + $0x1e0] ss:$48 sps:$4 sm:$0xff]   ;;  %v11572_v48 = vld [vmem:[#allocation4 + $0xc8] ss:$48 sps:$4 sm:$0xff]   ;;  %v11580_v49 = vld [vmem:[#allocation4 + $0x12c] ss:$48 sps:$4 sm:$0xff]  }
  0xb3   : > { %10042 = vmatmul.mubr.msk.bf16.gmra.mrb[4].mxu0 %vm576_vm0, %v13067_v18  ;;  %10044 = vmatmul.mubr.msk.bf16.gmra.mrb[4].mxu1 %vm576_vm0, %v13067_v18  ;;  %v11578_v50 = vld [vmem:[#allocation4 + $0x128] ss:$48 sps:$4 sm:$0xff]   ;;  %v11586_v51 = vld [vmem:[#allocation4 + $0x18c] ss:$48 sps:$4 sm:$0xff]   ;;  %v11595_v55 = vld [vmem:[#allocation4 + $0x244] ss:$48 sps:$4 sm:$0xff]  }
  0xb4   : > { %721 = vmatprep.mubr.bf16.mxu0 %v12823_v0  ;;  %774 = vmatprep.mubr.bf16.mxu1 %v12823_v0  ;;  %v11584_v52 = vld [vmem:[#allocation4 + $0x188] ss:$48 sps:$4 sm:$0xff]   ;;  %v11592_v53 = vld [vmem:[#allocation4 + $0x1ec] ss:$48 sps:$4 sm:$0xff]   ;;  %v11593_v57 = vld [vmem:[#allocation4 + $0x240] ss:$48 sps:$4 sm:$0xff]  }
  0xb5   : > { %848 = vmatprep.subr.bf16.mxu1 %v11547_v20  ;;  %v11590_v54 = vld [vmem:[#allocation4 + $0x1e8] ss:$48 sps:$4 sm:$0xff]   ;;  %v11598_v56 = vld [vmem:[#allocation4 + $0x24c] ss:$48 sps:$4 sm:$0xff]   ;;  %v11599_v59 = vld [vmem:[#allocation4 + $0x2a0] ss:$48 sps:$4 sm:$0xff]  }
  0xb6   : > { %v11596_v58 = vld [vmem:[#allocation4 + $0x248] ss:$48 sps:$4 sm:$0xff]   ;;  %v11601_v60 = vld [vmem:[#allocation4 + $0x2a4] ss:$48 sps:$4 sm:$0xff]   ;;  %v11604_v62 = vld [vmem:[#allocation4 + $0x2ac] ss:$48 sps:$4 sm:$0xff]  }
  0xb7   : > { %v11602_v61 = vld [vmem:[#allocation4 + $0x2a8] ss:$48 sps:$4 sm:$0xff]   ;;  %v11607_v63 = vld [vmem:[#allocation4 + $0x304] ss:$48 sps:$4 sm:$0xff]   ;;  %v11610_v1 = vld [vmem:[#allocation4 + $0x30c] ss:$48 sps:$4 sm:$0xff]  }
  0xb8   : > { %v11605_v2 = vld [vmem:[#allocation4 + $0x300] ss:$48 sps:$4 sm:$0xff]   ;;  %v11608_v3 = vld [vmem:[#allocation4 + $0x308] ss:$48 sps:$4 sm:$0xff]   ;;  %v11613_v5 = vld [vmem:[#allocation4 + $0x364] ss:$48 sps:$4 sm:$0xff]  }
  0xb9   : > { %v11611_v4 = vld [vmem:[#allocation4 + $0x360] ss:$48 sps:$4 sm:$0xff]   ;;  %v11614_v6 = vld [vmem:[#allocation4 + $0x368] ss:$48 sps:$4 sm:$0xff]   ;;  %v11616_v7 = vld [vmem:[#allocation4 + $0x36c] ss:$48 sps:$4 sm:$0xff]  }
  0xba   : > { %v11619_v8 = vld [vmem:[#allocation4 + $0x3c4] ss:$48 sps:$4 sm:$0xff]   ;;  %v11617_v10 = vld [vmem:[#allocation4 + $0x3c0] ss:$48 sps:$4 sm:$0xff]   ;;  %v11620_v11 = vld [vmem:[#allocation4 + $0x3c8] ss:$48 sps:$4 sm:$0xff]  }
  0xbb   : > { %10045 = vmatmul.mubr.msk.bf16.vlgmr.msra.gmra.mrb[8].mxu0 %vm576_vm0, %v13059_v9  ;;  %10047 = vmatmul.mubr.msk.bf16.vlgmr.msra.gmra.mrb[8].mxu1 %vm576_vm0, %v13059_v9  ;;  %v11625_v12 = vld [vmem:[#allocation4 + $0x424] ss:$48 sps:$4 sm:$0xff]   ;;  %v11628_v13 = vld [vmem:[#allocation4 + $0x42c] ss:$48 sps:$4 sm:$0xff]   ;;  %v11623_v14 = vld [vmem:[#allocation4 + $0x420] ss:$48 sps:$4 sm:$0xff]  }
  0xbc   : > { %796 = vmatpush1.bf16.msra.mxu0 %v11539_v21  ;;  %731 = vmatprep.mubr.bf16.mxu0 %v12823_v0  ;;  %v11626_v15 = vld [vmem:[#allocation4 + $0x428] ss:$48 sps:$4 sm:$0xff]   ;;  %v11631_v16 = vld [vmem:[#allocation4 + $0x484] ss:$48 sps:$4 sm:$0xff]   ;;  %v11634_v17 = vld [vmem:[#allocation4 + $0x48c] ss:$48 sps:$4 sm:$0xff]  }
  0xbd   : > { %784 = vmatprep.mubr.bf16.mxu1 %v12823_v0  ;;  %797 = vmatprep.subr.bf16.mxu0 %v11544_v22  ;;  %v11632_v19 = vld [vmem:[#allocation4 + $0x488] ss:$48 sps:$4 sm:$0xff]   ;;  %v11637_v20 = vld [vmem:[#allocation4 + $0x4e4] ss:$48 sps:$4 sm:$0xff]   ;;  %v11640_v21 = vld [vmem:[#allocation4 + $0x4ec] ss:$48 sps:$4 sm:$0xff]  }
  0xbe   : > { %849 = vmatpush1.bf16.msra.mxu1 %v11545_v23  ;;  %v11635_v22 = vld [vmem:[#allocation4 + $0x4e0] ss:$48 sps:$4 sm:$0xff]   ;;  %v11638_v23 = vld [vmem:[#allocation4 + $0x4e8] ss:$48 sps:$4 sm:$0xff]  }
  0xbf   : > { %850 = vmatprep.subr.bf16.mxu1 %v11550_v24  ;;  %v11643_v24 = vld [vmem:[#allocation4 + $0x544] ss:$48 sps:$4 sm:$0xff]  }
  0xc0   : > { %798 = vmatpush1.bf16.msra.mxu0 %v11542_v25  ;;  %v11646_v25 = vld [vmem:[#allocation4 + $0x54c] ss:$48 sps:$4 sm:$0xff]  }
  0xc1   : > { %901 = vmatprep.subr.bf16.mxu0 %v11553_v26  ;;  %v11641_v26 = vld [vmem:[#allocation4 + $0x540] ss:$48 sps:$4 sm:$0xff]  }
  0xc2   : > { %851 = vmatpush1.bf16.msra.mxu1 %v11548_v27  ;;  %v11644_v27 = vld [vmem:[#allocation4 + $0x548] ss:$48 sps:$4 sm:$0xff]  }
  0xc3   : > { %10046 = vmatmul.mubr.msk.bf16.gmra.mrb[12].mxu0 %vm576_vm0, %v13067_v18  ;;  %10048 = vmatmul.mubr.msk.bf16.gmra.mrb[12].mxu1 %vm576_vm0, %v13067_v18 }
  0xc4   : > { %827 = vmatprep.mubr.bf16.mxu0 %v12823_v0  ;;  %880 = vmatprep.mubr.bf16.mxu1 %v12823_v0 }
  0xc5   : > { %5056 = vmatprep.subr.bf16.mxu1 %v11559_v28  ;;  %v11649_v28 = vld [vmem:[#allocation4 + $0x5a4] ss:$48 sps:$4 sm:$0xff]  }
  0xcb   : > { %10049 = vmatmul.mubr.msk.bf16.vlgmr.msra.gmra.mrb[16].mxu0 %vm576_vm0, %v13059_v9  ;;  %10051 = vmatmul.mubr.msk.bf16.vlgmr.msra.gmra.mrb[16].mxu1 %vm576_vm0, %v13059_v9 }
  0xcc   : > { %837 = vmatprep.mubr.bf16.mxu0 %v12823_v0  ;;  %890 = vmatprep.mubr.bf16.mxu1 %v12823_v0 }
  0xcd   : > { %902 = vmatpush1.bf16.msra.mxu0 %v11551_v29  ;;  %5057 = vmatpush1.bf16.msra.mxu1 %v11557_v30  ;;  %v11652_v29 = vld [vmem:[#allocation4 + $0x5ac] ss:$48 sps:$4 sm:$0xff]   ;;  %v11647_v30 = vld [vmem:[#allocation4 + $0x5a0] ss:$48 sps:$4 sm:$0xff]  }
  0xce   : > { %903 = vmatprep.subr.bf16.mxu0 %v11556_v31  ;;  %5058 = vmatprep.subr.bf16.mxu1 %v11565_v32  ;;  %v11650_v31 = vld [vmem:[#allocation4 + $0x5a8] ss:$48 sps:$4 sm:$0xff]   ;;  %v11655_v32 = vld [vmem:[#allocation4 + $0x604] ss:$48 sps:$4 sm:$0xff]  }
  0xd1   : > { %904 = vmatpush1.bf16.msra.mxu0 %v11554_v33  ;;  %5059 = vmatpush1.bf16.msra.mxu1 %v11563_v34  ;;  %v11658_v33 = vld [vmem:[#allocation4 + $0x60c] ss:$48 sps:$4 sm:$0xff]  }
  0xd2   : > { %5268 = vmatprep.subr.bf16.mxu0 %v11562_v35  ;;  %5060 = vmatprep.subr.bf16.mxu1 %v11571_v36 }
  0xd3   : > { %10050 = vmatmul.mubr.msk.bf16.gmra.mrb[20].mxu0 %vm576_vm0, %v13067_v18  ;;  %10052 = vmatmul.mubr.msk.bf16.gmra.mrb[20].mxu1 %vm576_vm0, %v13067_v18 }
  0xd4   : > { %933 = vmatprep.mubr.bf16.mxu0 %v12823_v0 }
  0xd5   : > { %5061 = vmatpush1.bf16.msra.mxu1 %v11569_v37 }
  0xd6   : > { %5062 = vmatprep.subr.bf16.mxu1 %v11577_v38 }
  0xd9   : > { %5063 = vmatpush1.bf16.msra.mxu1 %v11575_v39 }
  0xda   : > { %5064 = vmatprep.subr.bf16.mxu1 %v11583_v40 }
  0xdb   : > { %10053 = vmatmul.mubr.msk.bf16.vlgmr.msra.gmra.mrb[24].mxu0 %vm576_vm0, %v13059_v9  ;;  %v11622_v9 = vld [vmem:[#allocation4 + $0x3cc] ss:$48 sps:$4 sm:$0xff]  }
  0xdc   : > { %943 = vmatprep.mubr.bf16.mxu0 %v12823_v0  ;;  %5269 = vmatpush1.bf16.msra.mxu0 %v11560_v41 }
  0xdd   : > { %5270 = vmatprep.subr.bf16.mxu0 %v11568_v42  ;;  %5065 = vmatpush1.bf16.msra.mxu1 %v11581_v43 }
  0xde   : > { %5066 = vmatprep.subr.bf16.mxu1 %v11589_v44 }
  0xe0   : > { %5271 = vmatpush1.bf16.msra.mxu0 %v11566_v45 }
  0xe1   : > { %5272 = vmatprep.subr.bf16.mxu0 %v11574_v46  ;;  %5067 = vmatpush1.bf16.msra.mxu1 %v11587_v47 }
  0xe2   : > { %5068 = vmatprep.subr.bf16.mxu1 %v11595_v55 }
  0xe3   : > { %10054 = vmatmul.mubr.msk.bf16.gmra.mrb[28].mxu0 %vm576_vm0, %v13067_v18  ;;  %v11629_v18 = vld [vmem:[#allocation4 + $0x480] ss:$48 sps:$4 sm:$0xff]  }
  0xe4   : > { %5273 = vmatpush1.bf16.msra.mxu0 %v11572_v48 }
  0xe5   : > { %5274 = vmatprep.subr.bf16.mxu0 %v11580_v49  ;;  %5069 = vmatpush1.bf16.msra.mxu1 %v11593_v57 }
  0xe6   : > { %5070 = vmatprep.subr.bf16.mxu1 %v11601_v60 }
  0xe8   : > { %5275 = vmatpush1.bf16.msra.mxu0 %v11578_v50 }
  0xe9   : > { %5276 = vmatprep.subr.bf16.mxu0 %v11586_v51  ;;  %5071 = vmatpush1.bf16.msra.mxu1 %v11599_v59 }
  0xea   : > { %5072 = vmatprep.subr.bf16.mxu1 %v11607_v63 }
  0xec   : > { %5277 = vmatpush1.bf16.msra.mxu0 %v11584_v52 }
  0xed   : > { %5278 = vmatprep.subr.bf16.mxu0 %v11592_v53  ;;  %5073 = vmatpush1.bf16.msra.mxu1 %v11605_v2 }
  0xee   : > { %5074 = vmatprep.subr.bf16.mxu1 %v11613_v5 }
  0xf0   : > { %5279 = vmatpush1.bf16.msra.mxu0 %v11590_v54 }
  0xf1   : > { %5280 = vmatprep.subr.bf16.mxu0 %v11598_v56  ;;  %5075 = vmatpush1.bf16.msra.mxu1 %v11611_v4 }
  0xf2   : > { %5076 = vmatprep.subr.bf16.mxu1 %v11619_v8 }
  0xf4   : > { %5281 = vmatpush1.bf16.msra.mxu0 %v11596_v58 }
  0xf5   : > { %5282 = vmatprep.subr.bf16.mxu0 %v11604_v62  ;;  %5077 = vmatpush1.bf16.msra.mxu1 %v11617_v10 }
  0xf6   : > { %5078 = vmatprep.subr.bf16.mxu1 %v11625_v12 }
  0xf8   : > { %5283 = vmatpush1.bf16.msra.mxu0 %v11602_v61 }
  0xf9   : > { %5284 = vmatprep.subr.bf16.mxu0 %v11610_v1  ;;  %5079 = vmatpush1.bf16.msra.mxu1 %v11623_v14 }
  0xfa   : > { %5080 = vmatprep.subr.bf16.mxu1 %v11631_v16 }
  0xfc   : > { %5285 = vmatpush1.bf16.msra.mxu0 %v11608_v3 }
  0xfd   : > { %5286 = vmatprep.subr.bf16.mxu0 %v11616_v7  ;;  %5081 = vmatpush1.bf16.msra.mxu1 %v11629_v18 }
  0xfe   : > { %5082 = vmatprep.subr.bf16.mxu1 %v11637_v20 }
 0x100   : > { %5287 = vmatpush1.bf16.msra.mxu0 %v11614_v6 }
 0x101   : > { %5288 = vmatprep.subr.bf16.mxu0 %v11622_v9  ;;  %5083 = vmatpush1.bf16.msra.mxu1 %v11635_v22 }
 0x102   : > { %5084 = vmatprep.subr.bf16.mxu1 %v11643_v24 }
 0x104   : > { %5289 = vmatpush1.bf16.msra.mxu0 %v11620_v11 }
 0x105   : > { %5290 = vmatprep.subr.bf16.mxu0 %v11628_v13  ;;  %5085 = vmatpush1.bf16.msra.mxu1 %v11641_v26 }
 0x106   : > { %5086 = vmatprep.subr.bf16.mxu1 %v11649_v28 }
 0x108   : > { %5291 = vmatpush1.bf16.msra.mxu0 %v11626_v15 }
 0x109   : > { %5292 = vmatprep.subr.bf16.mxu0 %v11634_v17  ;;  %5087 = vmatpush1.bf16.msra.mxu1 %v11647_v30 }
 0x10a   : > { %5109 = vmatprep.subr.bf16.mxu1 %v11655_v32 }
 0x10c   : > { %5293 = vmatpush1.bf16.msra.mxu0 %v11632_v19 }
 0x10d   : > { %5294 = vmatprep.subr.bf16.mxu0 %v11640_v21 }
 0x110   : > { %5295 = vmatpush1.bf16.msra.mxu0 %v11638_v23 }
 0x111   : > { %5296 = vmatprep.subr.bf16.mxu0 %v11646_v25 }
 0x114   : > { %5297 = vmatpush1.bf16.msra.mxu0 %v11644_v27 }
 0x115   : > { %5298 = vmatprep.subr.bf16.mxu0 %v11652_v29 }
 0x118   : > { %5299 = vmatpush1.bf16.msra.mxu0 %v11650_v31 }
 0x119   : > { %5321 = vmatprep.subr.bf16.mxu0 %v11658_v33 }
 0x17e   : > { %v617_v34 = vpop.f32.mrb[0].mxu0  ;;  %v670_v35 = vpop.f32.mrb[0].mxu1 }
 0x17f   : > { %v619_v36 = vpop.f32.mrb[1].mxu0  ;;  %v672_v37 = vpop.f32.mrb[1].mxu1 }
 0x180   : > { %v621_v38 = vpop.f32.mrb[2].mxu0  ;;  %v674_v39 = vpop.f32.mrb[2].mxu1 }
 0x181   : > { %v623_v40 = vpop.f32.mrb[3].mxu0  ;;  %v676_v41 = vpop.f32.mrb[3].mxu1 }
 0x186   : > { %v627_v42 = vpop.f32.mrb[4].mxu0  ;;  %v13103_v43 = vpop.f32.mrb[4].mxu1 }
 0x187   : > { %v13105_v44 = vpop.f32.mrb[5].mxu0  ;;  %v13107_v45 = vpop.f32.mrb[5].mxu1 }
 0x188   : > { %v631_v46 = vpop.f32.mrb[6].mxu0  ;;  %v13109_v47 = vpop.f32.mrb[6].mxu1 }
 0x189   : > { %v13111_v48 = vpop.f32.mrb[7].mxu0  ;;  %v13113_v49 = vpop.f32.mrb[7].mxu1 }
 0x18e   : > { %v723_v50 = vpop.f32.mrb[8].mxu0  ;;  %v13115_v51 = vpop.f32.mrb[8].mxu1 }
 0x18f   : > { %v13117_v52 = vpop.f32.mrb[9].mxu0  ;;  %v778_v53 = vpop.f32.mrb[9].mxu1 }
 0x190   : > { %v954_v54 = vmax.f32 %v617_v34, %v778_v53  ;;  %v727_v55 = vpop.f32.mrb[10].mxu0  ;;  %v13119_v56 = vpop.f32.mrb[10].mxu1  ;;  %v11653_v34 = vld [vmem:[#allocation4 + $0x600] ss:$48 sps:$4 sm:$0xff]  }
 0x191   : > { %v13121_v57 = vpop.f32.mrb[11].mxu0  ;;  %v782_v58 = vpop.f32.mrb[11].mxu1 }
 0x192   : > { %v961_v59 = vmax.f32 %v621_v38, %v782_v58  ;;  %v982_v60 = vmax.f32 %v954_v54, 0.0 }
 0x194   : > { %v989_v61 = vmax.f32 %v961_v59, 0.0 }
 0x196   : > { %v13123_v62 = vpack.c.bf16 %v989_v61, %v982_v60  ;;  %v13125_v63 = vpop.f32.mrb[12].mxu0  ;;  %v13127_v1 = vpop.f32.mrb[12].mxu1  ;;  %v11659_v61 = vld [vmem:[#allocation4 + $0x660] ss:$48 sps:$4 sm:$0xff]  }
 0x197   : > { %v13129_v2 = vpop.f32.mrb[13].mxu0  ;;  %v788_v3 = vpop.f32.mrb[13].mxu1 }
 0x198   : > { %v968_v4 = vmax.f32 %v627_v42, %v788_v3  ;;  %v13131_v5 = vpop.f32.mrb[14].mxu0  ;;  %v13133_v6 = vpop.f32.mrb[14].mxu1 }
 0x199   : > { %v13135_v7 = vpop.f32.mrb[15].mxu0  ;;  %v792_v8 = vpop.f32.mrb[15].mxu1 }
 0x19a   : > { %v975_v9 = vmax.f32 %v631_v46, %v792_v8  ;;  %v996_v10 = vmax.f32 %v968_v4, 0.0  ;;  %v11664_v46 = vld [vmem:[#allocation4 + $0x66c] ss:$48 sps:$4 sm:$0xff]  }
 0x19c   : > { %v1003_v11 = vmax.f32 %v975_v9, 0.0 }
 0x19e   : > { %v13137_v12 = vpack.c.bf16 %v1003_v11, %v996_v10  ;;  %v829_v13 = vpop.f32.mrb[16].mxu0  ;;  %v882_v14 = vpop.f32.mrb[16].mxu1  ;;  %v11667_v10 = vld [vmem:[#allocation4 + $0x6c4] ss:$48 sps:$4 sm:$0xff]  }
 0x19f   : > { %v955_v15 = vmax.f32 %v619_v36, %v829_v13  ;;  %v957_v16 = vmax.f32 %v672_v37, %v882_v14  ;;  %v831_v17 = vpop.f32.mrb[17].mxu0  ;;  %v884_v18 = vpop.f32.mrb[17].mxu1  ;;  %v11656_v36 = vld [vmem:[#allocation4 + $0x608] ss:$48 sps:$4 sm:$0xff]  }
 0x1a0   : > { %v956_v19 = vmax.f32 %v670_v35, %v831_v17  ;;  %v958_v20 = vmax.f32 %v723_v50, %v884_v18  ;;  %v833_v21 = vpop.f32.mrb[18].mxu0  ;;  %v886_v22 = vpop.f32.mrb[18].mxu1  ;;  %v11661_v35 = vld [vmem:[#allocation4 + $0x664] ss:$48 sps:$4 sm:$0xff]  }
 0x1a1   : > { %v962_v23 = vmax.f32 %v623_v40, %v833_v21  ;;  %v964_v24 = vmax.f32 %v676_v41, %v886_v22  ;;  %v835_v25 = vpop.f32.mrb[19].mxu0  ;;  %v888_v26 = vpop.f32.mrb[19].mxu1  ;;  %v983_v27 = vmax.f32 %v955_v15, 0.0  ;;  %v985_v30 = vmax.f32 %v957_v16, 0.0  ;;  %v11670_v15 = vld [vmem:[#allocation4 + $0x6cc] ss:$48 sps:$4 sm:$0xff]  }
 0x1a2   : > { %v963_v28 = vmax.f32 %v674_v39, %v835_v25  ;;  %v965_v29 = vmax.f32 %v727_v55, %v888_v26  ;;  %v984_v31 = vmax.f32 %v956_v19, 0.0  ;;  %v986_v37 = vmax.f32 %v958_v20, 0.0  ;;  %v11665_v20 = vld [vmem:[#allocation4 + $0x6c0] ss:$48 sps:$4 sm:$0xff]  }
 0x1a3   : > { %v990_v32 = vmax.f32 %v962_v23, 0.0  ;;  %v992_v33 = vmax.f32 %v964_v24, 0.0  ;;  %v11668_v23 = vld [vmem:[#allocation4 + $0x6c8] ss:$48 sps:$4 sm:$0xff]  }
 0x1a4   : > { %v991_v38 = vmax.f32 %v963_v28, 0.0  ;;  %v993_v42 = vmax.f32 %v965_v29, 0.0 }
 0x1a5   : > { %v13139_v50 = vpack.c.bf16 %v990_v32, %v983_v27  ;;  %v13141_v40 = vpack.c.bf16 %v992_v33, %v985_v30  ;;  %v11671_v33 = vld [vmem:[#allocation4 + $0x720] ss:$48 sps:$4 sm:$0xff]  }
 0x1a6   : > { %v13143_v41 = vpack.c.bf16 %v991_v38, %v984_v31  ;;  %v13145_v53 = vpack.c.bf16 %v993_v42, %v986_v37  ;;  %v839_v39 = vpop.f32.mrb[20].mxu0  ;;  %v892_v54 = vpop.f32.mrb[20].mxu1  ;;  %v11682_v38 = vld [vmem:[#allocation4 + $0x78c] ss:$48 sps:$4 sm:$0xff]  }
 0x1a7   : > { %v969_v55 = vmax.f32 %v13105_v44, %v839_v39  ;;  %v971_v58 = vmax.f32 %v13107_v45, %v892_v54  ;;  %v841_v59 = vpop.f32.mrb[21].mxu0  ;;  %v894_v60 = vpop.f32.mrb[21].mxu1  ;;  %5088 = vmatprep.mubr.bf16.mxu1 %v13139_v50  ;;  %5300 = vmatprep.mubr.bf16.mxu0 %v13139_v50  ;;  %v11662_v44 = vld [vmem:[#allocation4 + $0x668] ss:$48 sps:$4 sm:$0xff]  }
 0x1a8   : > { %v970_v3 = vmax.f32 %v13103_v43, %v841_v59  ;;  %v972_v4 = vmax.f32 %v13125_v63, %v894_v60  ;;  %v843_v8 = vpop.f32.mrb[22].mxu0  ;;  %v896_v9 = vpop.f32.mrb[22].mxu1  ;;  %5089 = vmatmul.mubr.bf16.vlgmr.msra.gmra.mrb[24].mxu1 %v13123_v62  ;;  %5301 = vmatmul.mubr.bf16.vlgmr.msra.gmra.mrb[32].mxu0 %v13123_v62  ;;  %v11680_v39 = vld [vmem:[#allocation4 + $0x788] ss:$48 sps:$4 sm:$0xff]  }
 0x1a9   : > { %v976_v45 = vmax.f32 %v13111_v48, %v843_v8  ;;  %v978_v11 = vmax.f32 %v13113_v49, %v896_v9  ;;  %5110 = vmatpush1.bf16.msra.mxu1 %v11653_v34  ;;  %5322 = vmatpush1.bf16.msra.mxu0 %v11656_v36  ;;  %v845_v13 = vpop.f32.mrb[23].mxu0  ;;  %v898_v14 = vpop.f32.mrb[23].mxu1  ;;  %v997_v16 = vmax.f32 %v969_v55, 0.0  ;;  %v999_v17 = vmax.f32 %v971_v58, 0.0  ;;  %v11674_v34 = vld [vmem:[#allocation4 + $0x728] ss:$48 sps:$4 sm:$0xff]  }
 0x1aa   : > { %v977_v43 = vmax.f32 %v13109_v47, %v845_v13  ;;  %v979_v63 = vmax.f32 %v13131_v5, %v898_v14  ;;  %5111 = vmatprep.subr.bf16.mxu1 %v11661_v35  ;;  %5323 = vmatprep.subr.bf16.mxu0 %v11664_v46  ;;  %v998_v21 = vmax.f32 %v970_v3, 0.0  ;;  %v1000_v48 = vmax.f32 %v972_v4, 0.0  ;;  %v11673_v47 = vld [vmem:[#allocation4 + $0x724] ss:$48 sps:$4 sm:$0xff]   ;;  %v11676_v5 = vld [vmem:[#allocation4 + $0x72c] ss:$48 sps:$4 sm:$0xff]  }
 0x1ab   : > { %v1004_v18 = vmax.f32 %v976_v45, 0.0  ;;  %v1006_v19 = vmax.f32 %v978_v11, 0.0  ;;  %v11677_v46 = vld [vmem:[#allocation4 + $0x780] ss:$48 sps:$4 sm:$0xff]   ;;  %v11688_v58 = vld [vmem:[#allocation4 + $0x7ec] ss:$48 sps:$4 sm:$0xff]  }
 0x1ac   : > { %v1005_v22 = vmax.f32 %v977_v43, 0.0  ;;  %v1007_v49 = vmax.f32 %v979_v63, 0.0  ;;  %v11683_v4 = vld [vmem:[#allocation4 + $0x7e0] ss:$48 sps:$4 sm:$0xff]   ;;  %v11686_v8 = vld [vmem:[#allocation4 + $0x7e8] ss:$48 sps:$4 sm:$0xff]  }
 0x1ad   : > { %v13159_v24 = vpack.c.bf16 %v1004_v18, %v997_v16  ;;  %v13161_v25 = vpack.c.bf16 %v1006_v19, %v999_v17  ;;  %5112 = vmatpush1.bf16.msra.mxu1 %v11659_v61  ;;  %5324 = vmatpush1.bf16.msra.mxu0 %v11662_v44  ;;  %v11694_v45 = vld [vmem:[#allocation4 + $0x84c] ss:$48 sps:$4 sm:$0xff]   ;;  %v11689_v63 = vld [vmem:[#allocation4 + $0x840] ss:$48 sps:$4 sm:$0xff]   ;;  %v11692_v16 = vld [vmem:[#allocation4 + $0x848] ss:$48 sps:$4 sm:$0xff]  }
 0x1ae   : > { %v13163_v26 = vpack.c.bf16 %v1005_v22, %v998_v21  ;;  %v13165_v27 = vpack.c.bf16 %v1007_v49, %v1000_v48  ;;  %v935_v28 = vpop.f32.mrb[24].mxu0  ;;  %5113 = vmatprep.subr.bf16.mxu1 %v11667_v10  ;;  %5325 = vmatprep.subr.bf16.mxu0 %v11670_v15  ;;  %v11691_v10 = vld [vmem:[#allocation4 + $0x844] ss:$48 sps:$4 sm:$0xff]   ;;  %v11700_v18 = vld [vmem:[#allocation4 + $0x8ac] ss:$48 sps:$4 sm:$0xff]  }
 0x1af   : > { %v959_v29 = vmax.f32 %v13117_v52, %v935_v28  ;;  %v937_v30 = vpop.f32.mrb[25].mxu0  ;;  %5098 = vmatprep.mubr.bf16.mxu1 %v13159_v24  ;;  %5310 = vmatprep.mubr.bf16.mxu0 %v13159_v24  ;;  %v11679_v52 = vld [vmem:[#allocation4 + $0x784] ss:$48 sps:$4 sm:$0xff]   ;;  %v11698_v21 = vld [vmem:[#allocation4 + $0x8a8] ss:$48 sps:$4 sm:$0xff]  }
 0x1b0   : > { %v960_v31 = vmax.f32 %v13115_v51, %v937_v30  ;;  %v939_v32 = vpop.f32.mrb[26].mxu0  ;;  %5099 = vmatmul.mubr.bf16.gmra.mrb[28].mxu1 %v13137_v12  ;;  %5311 = vmatmul.mubr.bf16.gmra.mrb[36].mxu0 %v13137_v12  ;;  %v11697_v17 = vld [vmem:[#allocation4 + $0x8a4] ss:$48 sps:$4 sm:$0xff]   ;;  %v11706_v22 = vld [vmem:[#allocation4 + $0x90c] ss:$48 sps:$4 sm:$0xff]  }
 0x1b1   : > { %v966_v36 = vmax.f32 %v13121_v57, %v939_v32  ;;  %5114 = vmatpush1.bf16.msra.mxu1 %v11665_v20  ;;  %5326 = vmatpush1.bf16.msra.mxu0 %v11668_v23  ;;  %v941_v37 = vpop.f32.mrb[27].mxu0  ;;  %v987_v51 = vmax.f32 %v959_v29, 0.0  ;;  %v11685_v57 = vld [vmem:[#allocation4 + $0x7e4] ss:$48 sps:$4 sm:$0xff]   ;;  %v11695_v20 = vld [vmem:[#allocation4 + $0x8a0] ss:$48 sps:$4 sm:$0xff]  }
 0x1b2   : > { %v967_v42 = vmax.f32 %v13119_v56, %v941_v37  ;;  %5141 = vmatprep.mubr.bf16.mxu1 %v13141_v40  ;;  %5353 = vmatprep.mubr.bf16.mxu0 %v13141_v40  ;;  %v988_v54 = vmax.f32 %v960_v31, 0.0  ;;  %v11703_v48 = vld [vmem:[#allocation4 + $0x904] ss:$48 sps:$4 sm:$0xff]   ;;  %v11704_v49 = vld [vmem:[#allocation4 + $0x908] ss:$48 sps:$4 sm:$0xff]  }
 0x1b3   : > { %v994_v35 = vmax.f32 %v966_v36, 0.0  ;;  %5115 = vmatprep.subr.bf16.mxu1 %v11673_v47  ;;  %5327 = vmatprep.subr.bf16.mxu0 %v11676_v5  ;;  %v11709_v23 = vld [vmem:[#allocation4 + $0x964] ss:$48 sps:$4 sm:$0xff]   ;;  %v11712_v47 = vld [vmem:[#allocation4 + $0x96c] ss:$48 sps:$4 sm:$0xff]  }
 0x1b4   : > { %v995_v55 = vmax.f32 %v967_v42, 0.0  ;;  %v11707_v5 = vld [vmem:[#allocation4 + $0x960] ss:$48 sps:$4 sm:$0xff]   ;;  %v11710_v28 = vld [vmem:[#allocation4 + $0x968] ss:$48 sps:$4 sm:$0xff]  }
 0x1b5   : > { %v13177_v59 = vpack.c.bf16 %v994_v35, %v987_v51  ;;  %5116 = vmatpush1.bf16.msra.mxu1 %v11671_v33  ;;  %5328 = vmatpush1.bf16.msra.mxu0 %v11674_v34  ;;  %v11715_v29 = vld [vmem:[#allocation4 + $0x9c4] ss:$48 sps:$4 sm:$0xff]   ;;  %v11718_v30 = vld [vmem:[#allocation4 + $0x9cc] ss:$48 sps:$4 sm:$0xff]   ;;  %v11713_v31 = vld [vmem:[#allocation4 + $0x9c0] ss:$48 sps:$4 sm:$0xff]  }
 0x1b6   : > { %v13179_v60 = vpack.c.bf16 %v995_v55, %v988_v54  ;;  %v945_v56 = vpop.f32.mrb[28].mxu0  ;;  %5117 = vmatprep.subr.bf16.mxu1 %v11679_v52  ;;  %5329 = vmatprep.subr.bf16.mxu0 %v11682_v38  ;;  %v11716_v32 = vld [vmem:[#allocation4 + $0x9c8] ss:$48 sps:$4 sm:$0xff]   ;;  %v11721_v33 = vld [vmem:[#allocation4 + $0xa24] ss:$48 sps:$4 sm:$0xff]  }
 0x1b7   : > { %v973_v61 = vmax.f32 %v13129_v2, %v945_v56  ;;  %v947_v3 = vpop.f32.mrb[29].mxu0  ;;  %v11724_v34 = vld [vmem:[#allocation4 + $0xa2c] ss:$48 sps:$4 sm:$0xff]   ;;  %v11719_v36 = vld [vmem:[#allocation4 + $0xa20] ss:$48 sps:$4 sm:$0xff]  }
 0x1b8   : > { %v974_v9 = vmax.f32 %v13127_v1, %v947_v3  ;;  %v949_v44 = vpop.f32.mrb[30].mxu0  ;;  %v11722_v37 = vld [vmem:[#allocation4 + $0xa28] ss:$48 sps:$4 sm:$0xff]   ;;  %v11727_v52 = vld [vmem:[#allocation4 + $0xa84] ss:$48 sps:$4 sm:$0xff]  }
 0x1b9   : > { %v980_v11 = vmax.f32 %v13135_v7, %v949_v44  ;;  %5118 = vmatpush1.bf16.msra.mxu1 %v11677_v46  ;;  %5330 = vmatpush1.bf16.msra.mxu0 %v11680_v39  ;;  %v951_v13 = vpop.f32.mrb[31].mxu0  ;;  %v1001_v43 = vmax.f32 %v973_v61, 0.0  ;;  %v11730_v38 = vld [vmem:[#allocation4 + $0xa8c] ss:$48 sps:$4 sm:$0xff]   ;;  %v11725_v42 = vld [vmem:[#allocation4 + $0xa80] ss:$48 sps:$4 sm:$0xff]  }
 0x1ba   : > { %v1002_v14 = vmax.f32 %v974_v9, 0.0  ;;  %5119 = vmatprep.subr.bf16.mxu1 %v11685_v57  ;;  %5331 = vmatprep.subr.bf16.mxu0 %v11688_v58  ;;  %v981_v15 = vmax.f32 %v13133_v6, %v951_v13  ;;  %v11701_v6 = vld [vmem:[#allocation4 + $0x900] ss:$48 sps:$4 sm:$0xff]   ;;  %v11728_v51 = vld [vmem:[#allocation4 + $0xa88] ss:$48 sps:$4 sm:$0xff]  }
 0x1bb   : > { %v1008_v2 = vmax.f32 %v980_v11, 0.0  ;;  %v11733_v35 = vld [vmem:[#allocation4 + $0xae4] ss:$48 sps:$4 sm:$0xff]   ;;  %v11736_v46 = vld [vmem:[#allocation4 + $0xaec] ss:$48 sps:$4 sm:$0xff]  }
 0x1bc   : > { %v1009_v1 = vmax.f32 %v981_v15, 0.0  ;;  %v11731_v39 = vld [vmem:[#allocation4 + $0xae0] ss:$48 sps:$4 sm:$0xff]   ;;  %v11734_v54 = vld [vmem:[#allocation4 + $0xae8] ss:$48 sps:$4 sm:$0xff]  }
 0x1bd   : > { %v13185_v19 = vpack.c.bf16 %v1008_v2, %v1001_v43  ;;  %5120 = vmatpush1.bf16.msra.mxu1 %v11683_v4  ;;  %5332 = vmatpush1.bf16.msra.mxu0 %v11686_v8  ;;  %v11739_v55 = vld [vmem:[#allocation4 + $0xb44] ss:$48 sps:$4 sm:$0xff]   ;;  %v11742_v57 = vld [vmem:[#allocation4 + $0xb4c] ss:$48 sps:$4 sm:$0xff]   ;;  %v11737_v58 = vld [vmem:[#allocation4 + $0xb40] ss:$48 sps:$4 sm:$0xff]  }
 0x1be   : > { %5121 = vmatprep.subr.bf16.mxu1 %v11691_v10  ;;  %5333 = vmatprep.subr.bf16.mxu0 %v11694_v45  ;;  %v13187_v7 = vpack.c.bf16 %v1009_v1, %v1002_v14  ;;  %v11740_v56 = vld [vmem:[#allocation4 + $0xb48] ss:$48 sps:$4 sm:$0xff]   ;;  %v11745_v61 = vld [vmem:[#allocation4 + $0xba4] ss:$48 sps:$4 sm:$0xff]   ;;  %v11748_v3 = vld [vmem:[#allocation4 + $0xbac] ss:$48 sps:$4 sm:$0xff]  }
 0x1bf   : > { %v11743_v4 = vld [vmem:[#allocation4 + $0xba0] ss:$48 sps:$4 sm:$0xff]   ;;  %v11746_v8 = vld [vmem:[#allocation4 + $0xba8] ss:$48 sps:$4 sm:$0xff]   ;;  %v11751_v9 = vld [vmem:[#allocation4 + $0xc04] ss:$48 sps:$4 sm:$0xff]  }
 0x1c0   : > { %v11754_v44 = vld [vmem:[#allocation4 + $0xc0c] ss:$48 sps:$4 sm:$0xff]   ;;  %v11749_v10 = vld [vmem:[#allocation4 + $0xc00] ss:$48 sps:$4 sm:$0xff]   ;;  %v11752_v45 = vld [vmem:[#allocation4 + $0xc08] ss:$48 sps:$4 sm:$0xff]  }
 0x1c1   : > { %5122 = vmatpush1.bf16.msra.mxu1 %v11689_v63  ;;  %5334 = vmatpush1.bf16.msra.mxu0 %v11692_v16  ;;  %v11755_v11 = vld [vmem:[#allocation4 + $0xc60] ss:$48 sps:$4 sm:$0xff]   ;;  %v11757_v13 = vld [vmem:[#allocation4 + $0xc64] ss:$48 sps:$4 sm:$0xff]   ;;  %v11760_v14 = vld [vmem:[#allocation4 + $0xc6c] ss:$48 sps:$4 sm:$0xff]  }
 0x1c2   : > { %5123 = vmatprep.subr.bf16.mxu1 %v11697_v17  ;;  %5335 = vmatprep.subr.bf16.mxu0 %v11700_v18  ;;  %v11758_v15 = vld [vmem:[#allocation4 + $0xc68] ss:$48 sps:$4 sm:$0xff]   ;;  %v11763_v43 = vld [vmem:[#allocation4 + $0xcc4] ss:$48 sps:$4 sm:$0xff]   ;;  %v11761_v2 = vld [vmem:[#allocation4 + $0xcc0] ss:$48 sps:$4 sm:$0xff]  }
 0x1c3   : > { %v11766_v63 = vld [vmem:[#allocation4 + $0xccc] ss:$48 sps:$4 sm:$0xff]   ;;  %v11764_v16 = vld [vmem:[#allocation4 + $0xcc8] ss:$48 sps:$4 sm:$0xff]   ;;  %v11767_v17 = vld [vmem:[#allocation4 + $0xd20] ss:$48 sps:$4 sm:$0xff]  }
 0x1c4   : > { %v11769_v18 = vld [vmem:[#allocation4 + $0xd24] ss:$48 sps:$4 sm:$0xff]   ;;  %v11772_v1 = vld [vmem:[#allocation4 + $0xd2c] ss:$48 sps:$4 sm:$0xff]  }
 0x1c5   : > { %5124 = vmatpush1.bf16.msra.mxu1 %v11695_v20  ;;  %5336 = vmatpush1.bf16.msra.mxu0 %v11698_v21  ;;  %v11770_v20 = vld [vmem:[#allocation4 + $0xd28] ss:$48 sps:$4 sm:$0xff]   ;;  %v11775_v21 = vld [vmem:[#allocation4 + $0xd84] ss:$48 sps:$4 sm:$0xff]  }
 0x1c6   : > { %5125 = vmatprep.subr.bf16.mxu1 %v11703_v48  ;;  %5337 = vmatprep.subr.bf16.mxu0 %v11706_v22  ;;  %v11773_v48 = vld [vmem:[#allocation4 + $0xd80] ss:$48 sps:$4 sm:$0xff]   ;;  %v11778_v22 = vld [vmem:[#allocation4 + $0xd8c] ss:$48 sps:$4 sm:$0xff]  }
 0x1c9   : > { %5126 = vmatpush1.bf16.msra.mxu1 %v11701_v6  ;;  %5338 = vmatpush1.bf16.msra.mxu0 %v11704_v49  ;;  %v11776_v6 = vld [vmem:[#allocation4 + $0xd88] ss:$48 sps:$4 sm:$0xff]   ;;  %v11781_v49 = vld [vmem:[#allocation4 + $0xde4] ss:$48 sps:$4 sm:$0xff]  }
 0x1ca   : > { %5127 = vmatprep.subr.bf16.mxu1 %v11709_v23  ;;  %5339 = vmatprep.subr.bf16.mxu0 %v11712_v47  ;;  %v11779_v23 = vld [vmem:[#allocation4 + $0xde0] ss:$48 sps:$4 sm:$0xff]   ;;  %v11784_v47 = vld [vmem:[#allocation4 + $0xdec] ss:$48 sps:$4 sm:$0xff]  }
 0x1cd   : > { %5128 = vmatpush1.bf16.msra.mxu1 %v11707_v5  ;;  %5340 = vmatpush1.bf16.msra.mxu0 %v11710_v28  ;;  %v11782_v5 = vld [vmem:[#allocation4 + $0xde8] ss:$48 sps:$4 sm:$0xff]   ;;  %v11787_v28 = vld [vmem:[#allocation4 + $0xe44] ss:$48 sps:$4 sm:$0xff]  }
 0x1ce   : > { %5129 = vmatprep.subr.bf16.mxu1 %v11715_v29  ;;  %5341 = vmatprep.subr.bf16.mxu0 %v11718_v30  ;;  %v11785_v29 = vld [vmem:[#allocation4 + $0xe40] ss:$48 sps:$4 sm:$0xff]   ;;  %v11790_v30 = vld [vmem:[#allocation4 + $0xe4c] ss:$48 sps:$4 sm:$0xff]  }
 0x1d1   : > { %5130 = vmatpush1.bf16.msra.mxu1 %v11713_v31  ;;  %5342 = vmatpush1.bf16.msra.mxu0 %v11716_v32  ;;  %v11788_v31 = vld [vmem:[#allocation4 + $0xe48] ss:$48 sps:$4 sm:$0xff]   ;;  %v11793_v32 = vld [vmem:[#allocation4 + $0xea4] ss:$48 sps:$4 sm:$0xff]  }
 0x1d2   : > { %5131 = vmatprep.subr.bf16.mxu1 %v11721_v33  ;;  %5343 = vmatprep.subr.bf16.mxu0 %v11724_v34  ;;  %v11791_v33 = vld [vmem:[#allocation4 + $0xea0] ss:$48 sps:$4 sm:$0xff]   ;;  %v11796_v34 = vld [vmem:[#allocation4 + $0xeac] ss:$48 sps:$4 sm:$0xff]  }
 0x1d5   : > { %5132 = vmatpush1.bf16.msra.mxu1 %v11719_v36  ;;  %5344 = vmatpush1.bf16.msra.mxu0 %v11722_v37  ;;  %v11794_v36 = vld [vmem:[#allocation4 + $0xea8] ss:$48 sps:$4 sm:$0xff]   ;;  %v11799_v37 = vld [vmem:[#allocation4 + $0xf04] ss:$48 sps:$4 sm:$0xff]  }
 0x1d6   : > { %5133 = vmatprep.subr.bf16.mxu1 %v11727_v52  ;;  %5345 = vmatprep.subr.bf16.mxu0 %v11730_v38  ;;  %v11797_v52 = vld [vmem:[#allocation4 + $0xf00] ss:$48 sps:$4 sm:$0xff]   ;;  %v11802_v38 = vld [vmem:[#allocation4 + $0xf0c] ss:$48 sps:$4 sm:$0xff]  }
 0x1d9   : > { %5134 = vmatpush1.bf16.msra.mxu1 %v11725_v42  ;;  %5346 = vmatpush1.bf16.msra.mxu0 %v11728_v51  ;;  %v11800_v42 = vld [vmem:[#allocation4 + $0xf08] ss:$48 sps:$4 sm:$0xff]   ;;  %v11805_v51 = vld [vmem:[#allocation4 + $0xf64] ss:$48 sps:$4 sm:$0xff]  }
 0x1da   : > { %5135 = vmatprep.subr.bf16.mxu1 %v11733_v35  ;;  %5347 = vmatprep.subr.bf16.mxu0 %v11736_v46  ;;  %v11808_v35 = vld [vmem:[#allocation4 + $0xf6c] ss:$48 sps:$4 sm:$0xff]   ;;  %v11803_v46 = vld [vmem:[#allocation4 + $0xf60] ss:$48 sps:$4 sm:$0xff]  }
 0x1dd   : > { %5136 = vmatpush1.bf16.msra.mxu1 %v11731_v39  ;;  %5348 = vmatpush1.bf16.msra.mxu0 %v11734_v54  ;;  %v11806_v39 = vld [vmem:[#allocation4 + $0xf68] ss:$48 sps:$4 sm:$0xff]   ;;  %v11811_v54 = vld [vmem:[#allocation4 + $0xfc4] ss:$48 sps:$4 sm:$0xff]  }
 0x1de   : > { %5137 = vmatprep.subr.bf16.mxu1 %v11739_v55  ;;  %5349 = vmatprep.subr.bf16.mxu0 %v11742_v57  ;;  %v11814_v55 = vld [vmem:[#allocation4 + $0xfcc] ss:$48 sps:$4 sm:$0xff]   ;;  %v11809_v57 = vld [vmem:[#allocation4 + $0xfc0] ss:$48 sps:$4 sm:$0xff]  }
 0x1e1   : > { %5138 = vmatpush1.bf16.msra.mxu1 %v11737_v58  ;;  %5350 = vmatpush1.bf16.msra.mxu0 %v11740_v56  ;;  %v11812_v58 = vld [vmem:[#allocation4 + $0xfc8] ss:$48 sps:$4 sm:$0xff]   ;;  %v11817_v56 = vld [vmem:[#allocation4 + $0x1024] ss:$48 sps:$4 sm:$0xff]  }
 0x1e2   : > { %5139 = vmatprep.subr.bf16.mxu1 %v11745_v61  ;;  %5351 = vmatprep.subr.bf16.mxu0 %v11748_v3  ;;  %v11820_v61 = vld [vmem:[#allocation4 + $0x102c] ss:$48 sps:$4 sm:$0xff]   ;;  %v11815_v3 = vld [vmem:[#allocation4 + $0x1020] ss:$48 sps:$4 sm:$0xff]  }
 0x1e5   : > { %5140 = vmatpush1.bf16.msra.mxu1 %v11743_v4  ;;  %5352 = vmatpush1.bf16.msra.mxu0 %v11746_v8  ;;  %v11818_v4 = vld [vmem:[#allocation4 + $0x1028] ss:$48 sps:$4 sm:$0xff]   ;;  %v11823_v8 = vld [vmem:[#allocation4 + $0x1084] ss:$48 sps:$4 sm:$0xff]  }
 0x1e6   : > { %5162 = vmatprep.subr.bf16.mxu1 %v11751_v9  ;;  %5374 = vmatprep.subr.bf16.mxu0 %v11754_v44  ;;  %v11826_v9 = vld [vmem:[#allocation4 + $0x108c] ss:$48 sps:$4 sm:$0xff]   ;;  %v11821_v44 = vld [vmem:[#allocation4 + $0x1080] ss:$48 sps:$4 sm:$0xff]  }
 0x1e8   : > { %5142 = vmatmul.mubr.bf16.vlgmr.msra.gmra.mrb[24].mxu1 %v13143_v41  ;;  %5354 = vmatmul.mubr.bf16.vlgmr.msra.gmra.mrb[32].mxu0 %v13143_v41 }
 0x1e9   : > { %5151 = vmatprep.mubr.bf16.mxu1 %v13161_v25  ;;  %5163 = vmatpush1.bf16.msra.mxu1 %v11749_v10  ;;  %v11824_v10 = vld [vmem:[#allocation4 + $0x1088] ss:$48 sps:$4 sm:$0xff]  }
 0x1ea   : > { %5363 = vmatprep.mubr.bf16.mxu0 %v13161_v25  ;;  %5375 = vmatpush1.bf16.msra.mxu0 %v11752_v45  ;;  %v11829_v45 = vld [vmem:[#allocation4 + $0x10e4] ss:$48 sps:$4 sm:$0xff]  }
 0x1eb   : > { %5164 = vmatprep.subr.bf16.mxu1 %v11757_v13  ;;  %5376 = vmatprep.subr.bf16.mxu0 %v11760_v14  ;;  %v11827_v13 = vld [vmem:[#allocation4 + $0x10e0] ss:$48 sps:$4 sm:$0xff]   ;;  %v11830_v14 = vld [vmem:[#allocation4 + $0x10e8] ss:$48 sps:$4 sm:$0xff]  }
 0x1ed   : > { %5165 = vmatpush1.bf16.msra.mxu1 %v11755_v11  ;;  %v11832_v11 = vld [vmem:[#allocation4 + $0x10ec] ss:$48 sps:$4 sm:$0xff]  }
 0x1ee   : > { %5377 = vmatpush1.bf16.msra.mxu0 %v11758_v15  ;;  %5166 = vmatprep.subr.bf16.mxu1 %v11763_v43  ;;  %v11835_v15 = vld [vmem:[#allocation4 + $0x1144] ss:$48 sps:$4 sm:$0xff]   ;;  %v11838_v43 = vld [vmem:[#allocation4 + $0x114c] ss:$48 sps:$4 sm:$0xff]  }
 0x1ef   : > { %5378 = vmatprep.subr.bf16.mxu0 %v11766_v63  ;;  %v11836_v63 = vld [vmem:[#allocation4 + $0x1148] ss:$48 sps:$4 sm:$0xff]  }
 0x1f0   : > { %5152 = vmatmul.mubr.bf16.gmra.mrb[28].mxu1 %v13163_v26  ;;  %5364 = vmatmul.mubr.bf16.gmra.mrb[36].mxu0 %v13163_v26 }
 0x1f1   : > { %5167 = vmatpush1.bf16.msra.mxu1 %v11761_v2  ;;  %5194 = vmatprep.mubr.bf16.mxu1 %v13177_v59  ;;  %v11833_v2 = vld [vmem:[#allocation4 + $0x1140] ss:$48 sps:$4 sm:$0xff]  }
 0x1f2   : > { %5379 = vmatpush1.bf16.msra.mxu0 %v11764_v16  ;;  %5406 = vmatprep.mubr.bf16.mxu0 %v13177_v59  ;;  %v11841_v16 = vld [vmem:[#allocation4 + $0x11a4] ss:$48 sps:$4 sm:$0xff]  }
 0x1f3   : > { %5168 = vmatprep.subr.bf16.mxu1 %v11769_v18  ;;  %5380 = vmatprep.subr.bf16.mxu0 %v11772_v1  ;;  %v11839_v18 = vld [vmem:[#allocation4 + $0x11a0] ss:$48 sps:$4 sm:$0xff]   ;;  %v11842_v1 = vld [vmem:[#allocation4 + $0x11a8] ss:$48 sps:$4 sm:$0xff]  }
 0x1f5   : > { %5169 = vmatpush1.bf16.msra.mxu1 %v11767_v17  ;;  %v11844_v17 = vld [vmem:[#allocation4 + $0x11ac] ss:$48 sps:$4 sm:$0xff]  }
 0x1f6   : > { %5381 = vmatpush1.bf16.msra.mxu0 %v11770_v20  ;;  %5170 = vmatprep.subr.bf16.mxu1 %v11775_v21  ;;  %v11847_v20 = vld [vmem:[#allocation4 + $0x1204] ss:$48 sps:$4 sm:$0xff]   ;;  %v11850_v21 = vld [vmem:[#allocation4 + $0x120c] ss:$48 sps:$4 sm:$0xff]  }
 0x1f7   : > { %5382 = vmatprep.subr.bf16.mxu0 %v11778_v22  ;;  %v11848_v22 = vld [vmem:[#allocation4 + $0x1208] ss:$48 sps:$4 sm:$0xff]  }
 0x1f9   : > { %5171 = vmatpush1.bf16.msra.mxu1 %v11773_v48  ;;  %v11845_v48 = vld [vmem:[#allocation4 + $0x1200] ss:$48 sps:$4 sm:$0xff]  }
 0x1fa   : > { %5383 = vmatpush1.bf16.msra.mxu0 %v11776_v6  ;;  %5172 = vmatprep.subr.bf16.mxu1 %v11781_v49  ;;  %v11853_v6 = vld [vmem:[#allocation4 + $0x1264] ss:$48 sps:$4 sm:$0xff]   ;;  %v11856_v49 = vld [vmem:[#allocation4 + $0x126c] ss:$48 sps:$4 sm:$0xff]  }
 0x1fb   : > { %5384 = vmatprep.subr.bf16.mxu0 %v11784_v47  ;;  %v11854_v47 = vld [vmem:[#allocation4 + $0x1268] ss:$48 sps:$4 sm:$0xff]  }
 0x1fd   : > { %5173 = vmatpush1.bf16.msra.mxu1 %v11779_v23  ;;  %v11851_v23 = vld [vmem:[#allocation4 + $0x1260] ss:$48 sps:$4 sm:$0xff]  }
 0x1fe   : > { %5385 = vmatpush1.bf16.msra.mxu0 %v11782_v5  ;;  %5174 = vmatprep.subr.bf16.mxu1 %v11787_v28  ;;  %v11859_v5 = vld [vmem:[#allocation4 + $0x12c4] ss:$48 sps:$4 sm:$0xff]   ;;  %v11862_v28 = vld [vmem:[#allocation4 + $0x12cc] ss:$48 sps:$4 sm:$0xff]  }
 0x1ff   : > { %5386 = vmatprep.subr.bf16.mxu0 %v11790_v30  ;;  %v11860_v30 = vld [vmem:[#allocation4 + $0x12c8] ss:$48 sps:$4 sm:$0xff]  }
 0x201   : > { %5175 = vmatpush1.bf16.msra.mxu1 %v11785_v29  ;;  %v11857_v29 = vld [vmem:[#allocation4 + $0x12c0] ss:$48 sps:$4 sm:$0xff]  }
 0x202   : > { %5387 = vmatpush1.bf16.msra.mxu0 %v11788_v31  ;;  %5176 = vmatprep.subr.bf16.mxu1 %v11793_v32  ;;  %v11865_v31 = vld [vmem:[#allocation4 + $0x1324] ss:$48 sps:$4 sm:$0xff]   ;;  %v11868_v32 = vld [vmem:[#allocation4 + $0x132c] ss:$48 sps:$4 sm:$0xff]  }
 0x203   : > { %5388 = vmatprep.subr.bf16.mxu0 %v11796_v34  ;;  %v11866_v34 = vld [vmem:[#allocation4 + $0x1328] ss:$48 sps:$4 sm:$0xff]  }
 0x205   : > { %5177 = vmatpush1.bf16.msra.mxu1 %v11791_v33  ;;  %v11863_v33 = vld [vmem:[#allocation4 + $0x1320] ss:$48 sps:$4 sm:$0xff]  }
 0x206   : > { %5389 = vmatpush1.bf16.msra.mxu0 %v11794_v36  ;;  %5178 = vmatprep.subr.bf16.mxu1 %v11799_v37  ;;  %v11871_v36 = vld [vmem:[#allocation4 + $0x1384] ss:$48 sps:$4 sm:$0xff]   ;;  %v11874_v37 = vld [vmem:[#allocation4 + $0x138c] ss:$48 sps:$4 sm:$0xff]  }
 0x207   : > { %5390 = vmatprep.subr.bf16.mxu0 %v11802_v38  ;;  %v11872_v38 = vld [vmem:[#allocation4 + $0x1388] ss:$48 sps:$4 sm:$0xff]  }
 0x209   : > { %5179 = vmatpush1.bf16.msra.mxu1 %v11797_v52  ;;  %v11869_v52 = vld [vmem:[#allocation4 + $0x1380] ss:$48 sps:$4 sm:$0xff]  }
 0x20a   : > { %5391 = vmatpush1.bf16.msra.mxu0 %v11800_v42  ;;  %5180 = vmatprep.subr.bf16.mxu1 %v11805_v51  ;;  %v11877_v42 = vld [vmem:[#allocation4 + $0x13e4] ss:$48 sps:$4 sm:$0xff]   ;;  %v11880_v51 = vld [vmem:[#allocation4 + $0x13ec] ss:$48 sps:$4 sm:$0xff]  }
 0x20b   : > { %5392 = vmatprep.subr.bf16.mxu0 %v11808_v35  ;;  %v11875_v35 = vld [vmem:[#allocation4 + $0x13e0] ss:$48 sps:$4 sm:$0xff]  }
 0x20d   : > { %5181 = vmatpush1.bf16.msra.mxu1 %v11803_v46  ;;  %v11878_v46 = vld [vmem:[#allocation4 + $0x13e8] ss:$48 sps:$4 sm:$0xff]  }
 0x20e   : > { %5393 = vmatpush1.bf16.msra.mxu0 %v11806_v39  ;;  %5182 = vmatprep.subr.bf16.mxu1 %v11811_v54  ;;  %v11883_v39 = vld [vmem:[#allocation4 + $0x1444] ss:$48 sps:$4 sm:$0xff]   ;;  %v11886_v54 = vld [vmem:[#allocation4 + $0x144c] ss:$48 sps:$4 sm:$0xff]  }
 0x20f   : > { %5394 = vmatprep.subr.bf16.mxu0 %v11814_v55  ;;  %v11881_v55 = vld [vmem:[#allocation4 + $0x1440] ss:$48 sps:$4 sm:$0xff]  }
 0x211   : > { %5183 = vmatpush1.bf16.msra.mxu1 %v11809_v57  ;;  %v11884_v57 = vld [vmem:[#allocation4 + $0x1448] ss:$48 sps:$4 sm:$0xff]  }
 0x212   : > { %5395 = vmatpush1.bf16.msra.mxu0 %v11812_v58  ;;  %5184 = vmatprep.subr.bf16.mxu1 %v11817_v56  ;;  %v11889_v58 = vld [vmem:[#allocation4 + $0x14a4] ss:$48 sps:$4 sm:$0xff]   ;;  %v11892_v56 = vld [vmem:[#allocation4 + $0x14ac] ss:$48 sps:$4 sm:$0xff]  }
 0x213   : > { %5396 = vmatprep.subr.bf16.mxu0 %v11820_v61  ;;  %v11887_v61 = vld [vmem:[#allocation4 + $0x14a0] ss:$48 sps:$4 sm:$0xff]  }
 0x215   : > { %5185 = vmatpush1.bf16.msra.mxu1 %v11815_v3  ;;  %v11890_v3 = vld [vmem:[#allocation4 + $0x14a8] ss:$48 sps:$4 sm:$0xff]  }
 0x216   : > { %5397 = vmatpush1.bf16.msra.mxu0 %v11818_v4  ;;  %5186 = vmatprep.subr.bf16.mxu1 %v11823_v8  ;;  %v11895_v4 = vld [vmem:[#allocation4 + $0x14] ss:$48 sps:$4 sm:$0xff]   ;;  %v11898_v8 = vld [vmem:[#allocation4 + $0x1c] ss:$48 sps:$4 sm:$0xff]  }
 0x217   : > { %5398 = vmatprep.subr.bf16.mxu0 %v11826_v9  ;;  %v11893_v9 = vld [vmem:[#allocation4 + $0x10] ss:$48 sps:$4 sm:$0xff]  }
 0x219   : > { %5187 = vmatpush1.bf16.msra.mxu1 %v11821_v44  ;;  %v11896_v44 = vld [vmem:[#allocation4 + $0x18] ss:$48 sps:$4 sm:$0xff]  }
 0x21a   : > { %5399 = vmatpush1.bf16.msra.mxu0 %v11824_v10  ;;  %5188 = vmatprep.subr.bf16.mxu1 %v11829_v45  ;;  %v11901_v10 = vld [vmem:[#allocation4 + $0x74] ss:$48 sps:$4 sm:$0xff]   ;;  %v11904_v45 = vld [vmem:[#allocation4 + $0x7c] ss:$48 sps:$4 sm:$0xff]  }
 0x21b   : > { %5400 = vmatprep.subr.bf16.mxu0 %v11832_v11  ;;  %v11899_v11 = vld [vmem:[#allocation4 + $0x70] ss:$48 sps:$4 sm:$0xff]  }
 0x21d   : > { %5189 = vmatpush1.bf16.msra.mxu1 %v11827_v13  ;;  %v11902_v13 = vld [vmem:[#allocation4 + $0x78] ss:$48 sps:$4 sm:$0xff]  }
 0x21e   : > { %5401 = vmatpush1.bf16.msra.mxu0 %v11830_v14  ;;  %5190 = vmatprep.subr.bf16.mxu1 %v11835_v15  ;;  %v11907_v14 = vld [vmem:[#allocation4 + $0xd4] ss:$48 sps:$4 sm:$0xff]   ;;  %v11910_v15 = vld [vmem:[#allocation4 + $0xdc] ss:$48 sps:$4 sm:$0xff]  }
 0x21f   : > { %5402 = vmatprep.subr.bf16.mxu0 %v11838_v43  ;;  %v11905_v43 = vld [vmem:[#allocation4 + $0xd0] ss:$48 sps:$4 sm:$0xff]  }
 0x221   : > { %5191 = vmatpush1.bf16.msra.mxu1 %v11833_v2  ;;  %v11908_v2 = vld [vmem:[#allocation4 + $0xd8] ss:$48 sps:$4 sm:$0xff]  }
 0x222   : > { %5403 = vmatpush1.bf16.msra.mxu0 %v11836_v63  ;;  %5192 = vmatprep.subr.bf16.mxu1 %v11841_v16  ;;  %v11913_v63 = vld [vmem:[#allocation4 + $0x134] ss:$48 sps:$4 sm:$0xff]   ;;  %v11916_v16 = vld [vmem:[#allocation4 + $0x13c] ss:$48 sps:$4 sm:$0xff]  }
 0x223   : > { %5404 = vmatprep.subr.bf16.mxu0 %v11844_v17  ;;  %v11911_v17 = vld [vmem:[#allocation4 + $0x130] ss:$48 sps:$4 sm:$0xff]  }
 0x225   : > { %5193 = vmatpush1.bf16.msra.mxu1 %v11839_v18  ;;  %v11914_v18 = vld [vmem:[#allocation4 + $0x138] ss:$48 sps:$4 sm:$0xff]  }
 0x226   : > { %5405 = vmatpush1.bf16.msra.mxu0 %v11842_v1  ;;  %5215 = vmatprep.subr.bf16.mxu1 %v11847_v20  ;;  %v11919_v1 = vld [vmem:[#allocation4 + $0x194] ss:$48 sps:$4 sm:$0xff]   ;;  %v11922_v20 = vld [vmem:[#allocation4 + $0x19c] ss:$48 sps:$4 sm:$0xff]  }
 0x227   : > { %5427 = vmatprep.subr.bf16.mxu0 %v11850_v21  ;;  %v11917_v21 = vld [vmem:[#allocation4 + $0x190] ss:$48 sps:$4 sm:$0xff]  }
 0x228   : > { %5195 = vmatmul.mubr.bf16.vlgmr.msra.gmra.mrb[24].mxu1 %v13145_v53 }
 0x229   : > { %5407 = vmatmul.mubr.bf16.vlgmr.msra.gmra.mrb[32].mxu0 %v13145_v53  ;;  %5204 = vmatprep.mubr.bf16.mxu1 %v13185_v19 }
 0x22a   : > { %5216 = vmatpush1.bf16.msra.mxu1 %v11845_v48  ;;  %5416 = vmatprep.mubr.bf16.mxu0 %v13185_v19  ;;  %v11920_v48 = vld [vmem:[#allocation4 + $0x198] ss:$48 sps:$4 sm:$0xff]  }
 0x22b   : > { %5428 = vmatpush1.bf16.msra.mxu0 %v11848_v22  ;;  %5217 = vmatprep.subr.bf16.mxu1 %v11853_v6  ;;  %v11925_v22 = vld [vmem:[#allocation4 + $0x1f4] ss:$48 sps:$4 sm:$0xff]   ;;  %v11928_v6 = vld [vmem:[#allocation4 + $0x1fc] ss:$48 sps:$4 sm:$0xff]  }
 0x22c   : > { %5429 = vmatprep.subr.bf16.mxu0 %v11856_v49  ;;  %v11923_v49 = vld [vmem:[#allocation4 + $0x1f0] ss:$48 sps:$4 sm:$0xff]  }
 0x22e   : > { %5218 = vmatpush1.bf16.msra.mxu1 %v11851_v23  ;;  %v11926_v23 = vld [vmem:[#allocation4 + $0x1f8] ss:$48 sps:$4 sm:$0xff]  }
 0x22f   : > { %5430 = vmatpush1.bf16.msra.mxu0 %v11854_v47  ;;  %5219 = vmatprep.subr.bf16.mxu1 %v11859_v5  ;;  %v11931_v47 = vld [vmem:[#allocation4 + $0x254] ss:$48 sps:$4 sm:$0xff]   ;;  %v11934_v5 = vld [vmem:[#allocation4 + $0x25c] ss:$48 sps:$4 sm:$0xff]  }
 0x230   : > { %5205 = vmatmul.mubr.bf16.gmra.mrb[28].mxu1 %v13165_v27  ;;  %5431 = vmatprep.subr.bf16.mxu0 %v11862_v28  ;;  %v11929_v28 = vld [vmem:[#allocation4 + $0x250] ss:$48 sps:$4 sm:$0xff]  }
 0x231   : > { %5417 = vmatmul.mubr.bf16.gmra.mrb[36].mxu0 %v13165_v27  ;;  %5247 = vmatprep.mubr.bf16.mxu1 %v12823_v0 }
 0x232   : > { %5220 = vmatpush1.bf16.msra.mxu1 %v11857_v29  ;;  %5459 = vmatprep.mubr.bf16.mxu0 %v12823_v0  ;;  %v11932_v29 = vld [vmem:[#allocation4 + $0x258] ss:$48 sps:$4 sm:$0xff]  }
 0x233   : > { %5432 = vmatpush1.bf16.msra.mxu0 %v11860_v30  ;;  %5221 = vmatprep.subr.bf16.mxu1 %v11865_v31  ;;  %v11937_v30 = vld [vmem:[#allocation4 + $0x2b4] ss:$48 sps:$4 sm:$0xff]   ;;  %v11940_v31 = vld [vmem:[#allocation4 + $0x2bc] ss:$48 sps:$4 sm:$0xff]  }
 0x234   : > { %5433 = vmatprep.subr.bf16.mxu0 %v11868_v32  ;;  %v11935_v32 = vld [vmem:[#allocation4 + $0x2b0] ss:$48 sps:$4 sm:$0xff]  }
 0x236   : > { %5222 = vmatpush1.bf16.msra.mxu1 %v11863_v33  ;;  %v11938_v33 = vld [vmem:[#allocation4 + $0x2b8] ss:$48 sps:$4 sm:$0xff]  }
 0x237   : > { %5434 = vmatpush1.bf16.msra.mxu0 %v11866_v34  ;;  %5223 = vmatprep.subr.bf16.mxu1 %v11871_v36  ;;  %v11943_v34 = vld [vmem:[#allocation4 + $0x314] ss:$48 sps:$4 sm:$0xff]   ;;  %v11946_v36 = vld [vmem:[#allocation4 + $0x31c] ss:$48 sps:$4 sm:$0xff]  }
 0x238   : > { %5435 = vmatprep.subr.bf16.mxu0 %v11874_v37  ;;  %v11941_v37 = vld [vmem:[#allocation4 + $0x310] ss:$48 sps:$4 sm:$0xff]  }
 0x23a   : > { %5224 = vmatpush1.bf16.msra.mxu1 %v11869_v52  ;;  %v11944_v52 = vld [vmem:[#allocation4 + $0x318] ss:$48 sps:$4 sm:$0xff]  }
 0x23b   : > { %5436 = vmatpush1.bf16.msra.mxu0 %v11872_v38  ;;  %5225 = vmatprep.subr.bf16.mxu1 %v11877_v42  ;;  %v11949_v38 = vld [vmem:[#allocation4 + $0x374] ss:$48 sps:$4 sm:$0xff]   ;;  %v11952_v42 = vld [vmem:[#allocation4 + $0x37c] ss:$48 sps:$4 sm:$0xff]  }
 0x23c   : > { %5437 = vmatprep.subr.bf16.mxu0 %v11880_v51  ;;  %v11947_v51 = vld [vmem:[#allocation4 + $0x370] ss:$48 sps:$4 sm:$0xff]  }
 0x23e   : > { %5226 = vmatpush1.bf16.msra.mxu1 %v11875_v35  ;;  %v11950_v35 = vld [vmem:[#allocation4 + $0x378] ss:$48 sps:$4 sm:$0xff]  }
 0x23f   : > { %5438 = vmatpush1.bf16.msra.mxu0 %v11878_v46  ;;  %5227 = vmatprep.subr.bf16.mxu1 %v11883_v39  ;;  %v11955_v46 = vld [vmem:[#allocation4 + $0x3d4] ss:$48 sps:$4 sm:$0xff]   ;;  %v11958_v39 = vld [vmem:[#allocation4 + $0x3dc] ss:$48 sps:$4 sm:$0xff]  }
 0x240   : > { %5439 = vmatprep.subr.bf16.mxu0 %v11886_v54  ;;  %v11953_v54 = vld [vmem:[#allocation4 + $0x3d0] ss:$48 sps:$4 sm:$0xff]  }
 0x242   : > { %5228 = vmatpush1.bf16.msra.mxu1 %v11881_v55  ;;  %v11956_v55 = vld [vmem:[#allocation4 + $0x3d8] ss:$48 sps:$4 sm:$0xff]  }
 0x243   : > { %5440 = vmatpush1.bf16.msra.mxu0 %v11884_v57  ;;  %5229 = vmatprep.subr.bf16.mxu1 %v11889_v58  ;;  %v11961_v57 = vld [vmem:[#allocation4 + $0x434] ss:$48 sps:$4 sm:$0xff]   ;;  %v11964_v58 = vld [vmem:[#allocation4 + $0x43c] ss:$48 sps:$4 sm:$0xff]  }
 0x244   : > { %5441 = vmatprep.subr.bf16.mxu0 %v11892_v56  ;;  %v11959_v56 = vld [vmem:[#allocation4 + $0x430] ss:$48 sps:$4 sm:$0xff]  }
 0x246   : > { %5230 = vmatpush1.bf16.msra.mxu1 %v11887_v61  ;;  %v11962_v61 = vld [vmem:[#allocation4 + $0x438] ss:$48 sps:$4 sm:$0xff]  }
 0x247   : > { %5442 = vmatpush1.bf16.msra.mxu0 %v11890_v3  ;;  %5480 = vmatprep.subr.bf16.mxu1 %v11895_v4  ;;  %v11967_v3 = vld [vmem:[#allocation4 + $0x494] ss:$48 sps:$4 sm:$0xff]   ;;  %v11970_v4 = vld [vmem:[#allocation4 + $0x49c] ss:$48 sps:$4 sm:$0xff]  }
 0x248   : > { %5692 = vmatprep.subr.bf16.mxu0 %v11898_v8  ;;  %v11965_v8 = vld [vmem:[#allocation4 + $0x490] ss:$48 sps:$4 sm:$0xff]  }
 0x249   : > { %5248 = vmatmul.mubr.bf16.vlgmr.msra.gmra.mrb[24].mxu1 %v13179_v60 }
 0x24a   : > { %5460 = vmatmul.mubr.bf16.vlgmr.msra.gmra.mrb[32].mxu0 %v13179_v60  ;;  %5481 = vmatpush1.bf16.msra.mxu1 %v11893_v9  ;;  %v11968_v9 = vld [vmem:[#allocation4 + $0x498] ss:$48 sps:$4 sm:$0xff]  }
 0x24b   : > { %5693 = vmatpush1.bf16.msra.mxu0 %v11896_v44  ;;  %5482 = vmatprep.subr.bf16.mxu1 %v11901_v10  ;;  %v11973_v44 = vld [vmem:[#allocation4 + $0x4f4] ss:$48 sps:$4 sm:$0xff]   ;;  %v11976_v10 = vld [vmem:[#allocation4 + $0x4fc] ss:$48 sps:$4 sm:$0xff]  }
 0x24c   : > { %5694 = vmatprep.subr.bf16.mxu0 %v11904_v45  ;;  %5257 = vmatprep.mubr.bf16.mxu1 %v12823_v0  ;;  %v11971_v45 = vld [vmem:[#allocation4 + $0x4f0] ss:$48 sps:$4 sm:$0xff]  }
 0x24d   : > { %5469 = vmatprep.mubr.bf16.mxu0 %v12823_v0 }
 0x24e   : > { %5483 = vmatpush1.bf16.msra.mxu1 %v11899_v11  ;;  %v11974_v11 = vld [vmem:[#allocation4 + $0x4f8] ss:$48 sps:$4 sm:$0xff]  }
 0x24f   : > { %5695 = vmatpush1.bf16.msra.mxu0 %v11902_v13  ;;  %5484 = vmatprep.subr.bf16.mxu1 %v11907_v14  ;;  %v11979_v13 = vld [vmem:[#allocation4 + $0x554] ss:$48 sps:$4 sm:$0xff]   ;;  %v11982_v14 = vld [vmem:[#allocation4 + $0x55c] ss:$48 sps:$4 sm:$0xff]  }
 0x250   : > { %5696 = vmatprep.subr.bf16.mxu0 %v11910_v15  ;;  %v11977_v15 = vld [vmem:[#allocation4 + $0x550] ss:$48 sps:$4 sm:$0xff]  }
 0x251   : > { %5258 = vmatmul.mubr.bf16.gmra.mrb[28].mxu1 %v13187_v7 }
 0x252   : > { %5470 = vmatmul.mubr.bf16.gmra.mrb[36].mxu0 %v13187_v7  ;;  %5485 = vmatpush1.bf16.msra.mxu1 %v11905_v43  ;;  %v11980_v43 = vld [vmem:[#allocation4 + $0x558] ss:$48 sps:$4 sm:$0xff]  }
 0x253   : > { %5512 = vmatprep.mubr.bf16.mxu1 %v13139_v50  ;;  %5697 = vmatpush1.bf16.msra.mxu0 %v11908_v2  ;;  %v11985_v2 = vld [vmem:[#allocation4 + $0x5b4] ss:$48 sps:$4 sm:$0xff]  }
 0x254   : > { %5724 = vmatprep.mubr.bf16.mxu0 %v13139_v50  ;;  %5486 = vmatprep.subr.bf16.mxu1 %v11913_v63  ;;  %v11988_v63 = vld [vmem:[#allocation4 + $0x5bc] ss:$48 sps:$4 sm:$0xff]  }
 0x255   : > { %5698 = vmatprep.subr.bf16.mxu0 %v11916_v16  ;;  %v11983_v16 = vld [vmem:[#allocation4 + $0x5b0] ss:$48 sps:$4 sm:$0xff]  }
 0x256   : > { %5487 = vmatpush1.bf16.msra.mxu1 %v11911_v17  ;;  %v11986_v17 = vld [vmem:[#allocation4 + $0x5b8] ss:$48 sps:$4 sm:$0xff]  }
 0x257   : > { %5699 = vmatpush1.bf16.msra.mxu0 %v11914_v18  ;;  %5488 = vmatprep.subr.bf16.mxu1 %v11919_v1  ;;  %v11991_v18 = vld [vmem:[#allocation4 + $0x614] ss:$48 sps:$4 sm:$0xff]   ;;  %v11994_v1 = vld [vmem:[#allocation4 + $0x61c] ss:$48 sps:$4 sm:$0xff]  }
 0x258   : > { %5700 = vmatprep.subr.bf16.mxu0 %v11922_v20  ;;  %v11989_v20 = vld [vmem:[#allocation4 + $0x610] ss:$48 sps:$4 sm:$0xff]  }
 0x25a   : > { %5489 = vmatpush1.bf16.msra.mxu1 %v11917_v21  ;;  %v11992_v21 = vld [vmem:[#allocation4 + $0x618] ss:$48 sps:$4 sm:$0xff]  }
 0x25b   : > { %5701 = vmatpush1.bf16.msra.mxu0 %v11920_v48  ;;  %5490 = vmatprep.subr.bf16.mxu1 %v11925_v22  ;;  %v11997_v48 = vld [vmem:[#allocation4 + $0x674] ss:$48 sps:$4 sm:$0xff]   ;;  %v12000_v22 = vld [vmem:[#allocation4 + $0x67c] ss:$48 sps:$4 sm:$0xff]  }
 0x25c   : > { %5702 = vmatprep.subr.bf16.mxu0 %v11928_v6  ;;  %v11995_v6 = vld [vmem:[#allocation4 + $0x670] ss:$48 sps:$4 sm:$0xff]  }
 0x25e   : > { %5491 = vmatpush1.bf16.msra.mxu1 %v11923_v49  ;;  %v11998_v49 = vld [vmem:[#allocation4 + $0x678] ss:$48 sps:$4 sm:$0xff]  }
 0x25f   : > { %5703 = vmatpush1.bf16.msra.mxu0 %v11926_v23  ;;  %5492 = vmatprep.subr.bf16.mxu1 %v11931_v47  ;;  %v12003_v23 = vld [vmem:[#allocation4 + $0x6d4] ss:$48 sps:$4 sm:$0xff]   ;;  %v12006_v47 = vld [vmem:[#allocation4 + $0x6dc] ss:$48 sps:$4 sm:$0xff]  }
 0x260   : > { %5704 = vmatprep.subr.bf16.mxu0 %v11934_v5  ;;  %v12001_v5 = vld [vmem:[#allocation4 + $0x6d0] ss:$48 sps:$4 sm:$0xff]  }
 0x262   : > { %5493 = vmatpush1.bf16.msra.mxu1 %v11929_v28  ;;  %v12004_v28 = vld [vmem:[#allocation4 + $0x6d8] ss:$48 sps:$4 sm:$0xff]  }
 0x263   : > { %5705 = vmatpush1.bf16.msra.mxu0 %v11932_v29  ;;  %5494 = vmatprep.subr.bf16.mxu1 %v11937_v30  ;;  %v12009_v29 = vld [vmem:[#allocation4 + $0x734] ss:$48 sps:$4 sm:$0xff]   ;;  %v12012_v30 = vld [vmem:[#allocation4 + $0x73c] ss:$48 sps:$4 sm:$0xff]  }
 0x264   : > { %5706 = vmatprep.subr.bf16.mxu0 %v11940_v31  ;;  %v12007_v31 = vld [vmem:[#allocation4 + $0x730] ss:$48 sps:$4 sm:$0xff]  }
 0x266   : > { %5495 = vmatpush1.bf16.msra.mxu1 %v11935_v32  ;;  %v12010_v32 = vld [vmem:[#allocation4 + $0x738] ss:$48 sps:$4 sm:$0xff]  }
 0x267   : > { %5707 = vmatpush1.bf16.msra.mxu0 %v11938_v33  ;;  %5496 = vmatprep.subr.bf16.mxu1 %v11943_v34  ;;  %v12015_v33 = vld [vmem:[#allocation4 + $0x794] ss:$48 sps:$4 sm:$0xff]   ;;  %v12018_v34 = vld [vmem:[#allocation4 + $0x79c] ss:$48 sps:$4 sm:$0xff]  }
 0x268   : > { %5708 = vmatprep.subr.bf16.mxu0 %v11946_v36  ;;  %v12013_v36 = vld [vmem:[#allocation4 + $0x790] ss:$48 sps:$4 sm:$0xff]  }
 0x26a   : > { %5497 = vmatpush1.bf16.msra.mxu1 %v11941_v37  ;;  %v12016_v37 = vld [vmem:[#allocation4 + $0x798] ss:$48 sps:$4 sm:$0xff]  }
 0x26b   : > { %5709 = vmatpush1.bf16.msra.mxu0 %v11944_v52  ;;  %5498 = vmatprep.subr.bf16.mxu1 %v11949_v38  ;;  %v12021_v52 = vld [vmem:[#allocation4 + $0x7f4] ss:$48 sps:$4 sm:$0xff]   ;;  %v12024_v38 = vld [vmem:[#allocation4 + $0x7fc] ss:$48 sps:$4 sm:$0xff]  }
 0x26c   : > { %5710 = vmatprep.subr.bf16.mxu0 %v11952_v42  ;;  %v12019_v42 = vld [vmem:[#allocation4 + $0x7f0] ss:$48 sps:$4 sm:$0xff]  }
 0x26e   : > { %5499 = vmatpush1.bf16.msra.mxu1 %v11947_v51  ;;  %v12022_v51 = vld [vmem:[#allocation4 + $0x7f8] ss:$48 sps:$4 sm:$0xff]  }
 0x26f   : > { %5711 = vmatpush1.bf16.msra.mxu0 %v11950_v35  ;;  %5500 = vmatprep.subr.bf16.mxu1 %v11955_v46  ;;  %v12027_v35 = vld [vmem:[#allocation4 + $0x854] ss:$48 sps:$4 sm:$0xff]   ;;  %v12030_v46 = vld [vmem:[#allocation4 + $0x85c] ss:$48 sps:$4 sm:$0xff]  }
 0x270   : > { %5712 = vmatprep.subr.bf16.mxu0 %v11958_v39  ;;  %v12025_v39 = vld [vmem:[#allocation4 + $0x850] ss:$48 sps:$4 sm:$0xff]  }
 0x272   : > { %5501 = vmatpush1.bf16.msra.mxu1 %v11953_v54  ;;  %v12028_v54 = vld [vmem:[#allocation4 + $0x858] ss:$48 sps:$4 sm:$0xff]  }
 0x273   : > { %5713 = vmatpush1.bf16.msra.mxu0 %v11956_v55  ;;  %5502 = vmatprep.subr.bf16.mxu1 %v11961_v57  ;;  %v12033_v55 = vld [vmem:[#allocation4 + $0x8b4] ss:$48 sps:$4 sm:$0xff]   ;;  %v12036_v57 = vld [vmem:[#allocation4 + $0x8bc] ss:$48 sps:$4 sm:$0xff]  }
 0x274   : > { %5714 = vmatprep.subr.bf16.mxu0 %v11964_v58  ;;  %v12031_v58 = vld [vmem:[#allocation4 + $0x8b0] ss:$48 sps:$4 sm:$0xff]  }
 0x276   : > { %5503 = vmatpush1.bf16.msra.mxu1 %v11959_v56  ;;  %v12034_v56 = vld [vmem:[#allocation4 + $0x8b8] ss:$48 sps:$4 sm:$0xff]  }
 0x277   : > { %5715 = vmatpush1.bf16.msra.mxu0 %v11962_v61  ;;  %5504 = vmatprep.subr.bf16.mxu1 %v11967_v3  ;;  %v12039_v61 = vld [vmem:[#allocation4 + $0x914] ss:$48 sps:$4 sm:$0xff]   ;;  %v12042_v3 = vld [vmem:[#allocation4 + $0x91c] ss:$48 sps:$4 sm:$0xff]  }
 0x278   : > { %5716 = vmatprep.subr.bf16.mxu0 %v11970_v4  ;;  %v12037_v4 = vld [vmem:[#allocation4 + $0x910] ss:$48 sps:$4 sm:$0xff]  }
 0x27a   : > { %5505 = vmatpush1.bf16.msra.mxu1 %v11965_v8  ;;  %v12040_v8 = vld [vmem:[#allocation4 + $0x918] ss:$48 sps:$4 sm:$0xff]  }
 0x27b   : > { %5717 = vmatpush1.bf16.msra.mxu0 %v11968_v9  ;;  %5506 = vmatprep.subr.bf16.mxu1 %v11973_v44  ;;  %v12045_v9 = vld [vmem:[#allocation4 + $0x974] ss:$48 sps:$4 sm:$0xff]   ;;  %v12048_v44 = vld [vmem:[#allocation4 + $0x97c] ss:$48 sps:$4 sm:$0xff]  }
 0x27c   : > { %5718 = vmatprep.subr.bf16.mxu0 %v11976_v10  ;;  %v12043_v10 = vld [vmem:[#allocation4 + $0x970] ss:$48 sps:$4 sm:$0xff]  }
 0x27e   : > { %5507 = vmatpush1.bf16.msra.mxu1 %v11971_v45  ;;  %v12046_v45 = vld [vmem:[#allocation4 + $0x978] ss:$48 sps:$4 sm:$0xff]  }
 0x27f   : > { %5719 = vmatpush1.bf16.msra.mxu0 %v11974_v11  ;;  %5508 = vmatprep.subr.bf16.mxu1 %v11979_v13  ;;  %v12051_v11 = vld [vmem:[#allocation4 + $0x9d4] ss:$48 sps:$4 sm:$0xff]   ;;  %v12054_v13 = vld [vmem:[#allocation4 + $0x9dc] ss:$48 sps:$4 sm:$0xff]  }
 0x280   : > { %5720 = vmatprep.subr.bf16.mxu0 %v11982_v14  ;;  %v12049_v14 = vld [vmem:[#allocation4 + $0x9d0] ss:$48 sps:$4 sm:$0xff]  }
 0x282   : > { %5509 = vmatpush1.bf16.msra.mxu1 %v11977_v15  ;;  %v12052_v15 = vld [vmem:[#allocation4 + $0x9d8] ss:$48 sps:$4 sm:$0xff]  }
 0x283   : > { %5721 = vmatpush1.bf16.msra.mxu0 %v11980_v43  ;;  %5510 = vmatprep.subr.bf16.mxu1 %v11985_v2  ;;  %v12057_v43 = vld [vmem:[#allocation4 + $0xa34] ss:$48 sps:$4 sm:$0xff]   ;;  %v12060_v2 = vld [vmem:[#allocation4 + $0xa3c] ss:$48 sps:$4 sm:$0xff]  }
 0x284   : > { %5722 = vmatprep.subr.bf16.mxu0 %v11988_v63  ;;  %v12055_v63 = vld [vmem:[#allocation4 + $0xa30] ss:$48 sps:$4 sm:$0xff]  }
 0x286   : > { %5511 = vmatpush1.bf16.msra.mxu1 %v11983_v16  ;;  %v12058_v16 = vld [vmem:[#allocation4 + $0xa38] ss:$48 sps:$4 sm:$0xff]  }
 0x287   : > { %5723 = vmatpush1.bf16.msra.mxu0 %v11986_v17  ;;  %5533 = vmatprep.subr.bf16.mxu1 %v11991_v18  ;;  %v12063_v17 = vld [vmem:[#allocation4 + $0xa94] ss:$48 sps:$4 sm:$0xff]   ;;  %v12066_v18 = vld [vmem:[#allocation4 + $0xa9c] ss:$48 sps:$4 sm:$0xff]  }
 0x288   : > { %5745 = vmatprep.subr.bf16.mxu0 %v11994_v1  ;;  %v12061_v1 = vld [vmem:[#allocation4 + $0xa90] ss:$48 sps:$4 sm:$0xff]  }
 0x289   : > { %5513 = vmatmul.mubr.bf16.vlgmr.msra.gmra.mrb[32].mxu1 %v13123_v62 }
 0x28a   : > { %5725 = vmatmul.mubr.bf16.vlgmr.msra.gmra.mrb[40].mxu0 %v13123_v62  ;;  %5522 = vmatprep.mubr.bf16.mxu1 %v13159_v24 }
 0x28b   : > { %5534 = vmatpush1.bf16.msra.mxu1 %v11989_v20  ;;  %5734 = vmatprep.mubr.bf16.mxu0 %v13159_v24  ;;  %v12064_v20 = vld [vmem:[#allocation4 + $0xa98] ss:$48 sps:$4 sm:$0xff]  }
 0x28c   : > { %5746 = vmatpush1.bf16.msra.mxu0 %v11992_v21  ;;  %5535 = vmatprep.subr.bf16.mxu1 %v11997_v48  ;;  %v12069_v21 = vld [vmem:[#allocation4 + $0xaf4] ss:$48 sps:$4 sm:$0xff]   ;;  %v12072_v48 = vld [vmem:[#allocation4 + $0xafc] ss:$48 sps:$4 sm:$0xff]  }
 0x28d   : > { %5747 = vmatprep.subr.bf16.mxu0 %v12000_v22  ;;  %v12067_v22 = vld [vmem:[#allocation4 + $0xaf0] ss:$48 sps:$4 sm:$0xff]  }
 0x28f   : > { %5536 = vmatpush1.bf16.msra.mxu1 %v11995_v6  ;;  %v12070_v6 = vld [vmem:[#allocation4 + $0xaf8] ss:$48 sps:$4 sm:$0xff]  }
 0x290   : > { %5748 = vmatpush1.bf16.msra.mxu0 %v11998_v49  ;;  %5537 = vmatprep.subr.bf16.mxu1 %v12003_v23  ;;  %v12075_v49 = vld [vmem:[#allocation4 + $0xb54] ss:$48 sps:$4 sm:$0xff]   ;;  %v12078_v23 = vld [vmem:[#allocation4 + $0xb5c] ss:$48 sps:$4 sm:$0xff]  }
 0x291   : > { %5523 = vmatmul.mubr.bf16.gmra.mrb[36].mxu1 %v13137_v12  ;;  %5749 = vmatprep.subr.bf16.mxu0 %v12006_v47  ;;  %v12073_v47 = vld [vmem:[#allocation4 + $0xb50] ss:$48 sps:$4 sm:$0xff]  }
 0x292   : > { %5735 = vmatmul.mubr.bf16.gmra.mrb[44].mxu0 %v13137_v12  ;;  %5565 = vmatprep.mubr.bf16.mxu1 %v13141_v40 }
 0x293   : > { %5538 = vmatpush1.bf16.msra.mxu1 %v12001_v5  ;;  %5777 = vmatprep.mubr.bf16.mxu0 %v13141_v40  ;;  %v12076_v5 = vld [vmem:[#allocation4 + $0xb58] ss:$48 sps:$4 sm:$0xff]  }
 0x294   : > { %5750 = vmatpush1.bf16.msra.mxu0 %v12004_v28  ;;  %5539 = vmatprep.subr.bf16.mxu1 %v12009_v29  ;;  %v12081_v28 = vld [vmem:[#allocation4 + $0xbb4] ss:$48 sps:$4 sm:$0xff]   ;;  %v12084_v29 = vld [vmem:[#allocation4 + $0xbbc] ss:$48 sps:$4 sm:$0xff]  }
 0x295   : > { %5751 = vmatprep.subr.bf16.mxu0 %v12012_v30  ;;  %v12079_v30 = vld [vmem:[#allocation4 + $0xbb0] ss:$48 sps:$4 sm:$0xff]  }
 0x297   : > { %5540 = vmatpush1.bf16.msra.mxu1 %v12007_v31  ;;  %v12082_v31 = vld [vmem:[#allocation4 + $0xbb8] ss:$48 sps:$4 sm:$0xff]  }
 0x298   : > { %5752 = vmatpush1.bf16.msra.mxu0 %v12010_v32  ;;  %5541 = vmatprep.subr.bf16.mxu1 %v12015_v33  ;;  %v12087_v32 = vld [vmem:[#allocation4 + $0xc14] ss:$48 sps:$4 sm:$0xff]   ;;  %v12090_v33 = vld [vmem:[#allocation4 + $0xc1c] ss:$48 sps:$4 sm:$0xff]  }
 0x299   : > { %5753 = vmatprep.subr.bf16.mxu0 %v12018_v34  ;;  %v12085_v34 = vld [vmem:[#allocation4 + $0xc10] ss:$48 sps:$4 sm:$0xff]  }
 0x29b   : > { %5542 = vmatpush1.bf16.msra.mxu1 %v12013_v36  ;;  %v12088_v36 = vld [vmem:[#allocation4 + $0xc18] ss:$48 sps:$4 sm:$0xff]  }
 0x29c   : > { %5754 = vmatpush1.bf16.msra.mxu0 %v12016_v37  ;;  %5543 = vmatprep.subr.bf16.mxu1 %v12021_v52  ;;  %v12093_v37 = vld [vmem:[#allocation4 + $0xc74] ss:$48 sps:$4 sm:$0xff]   ;;  %v12096_v52 = vld [vmem:[#allocation4 + $0xc7c] ss:$48 sps:$4 sm:$0xff]  }
 0x29d   : > { %5755 = vmatprep.subr.bf16.mxu0 %v12024_v38  ;;  %v12091_v38 = vld [vmem:[#allocation4 + $0xc70] ss:$48 sps:$4 sm:$0xff]  }
 0x29f   : > { %5544 = vmatpush1.bf16.msra.mxu1 %v12019_v42  ;;  %v12094_v42 = vld [vmem:[#allocation4 + $0xc78] ss:$48 sps:$4 sm:$0xff]  }
 0x2a0   : > { %5756 = vmatpush1.bf16.msra.mxu0 %v12022_v51  ;;  %5545 = vmatprep.subr.bf16.mxu1 %v12027_v35  ;;  %v12099_v51 = vld [vmem:[#allocation4 + $0xcd4] ss:$48 sps:$4 sm:$0xff]   ;;  %v12102_v35 = vld [vmem:[#allocation4 + $0xcdc] ss:$48 sps:$4 sm:$0xff]  }
 0x2a1   : > { %5757 = vmatprep.subr.bf16.mxu0 %v12030_v46  ;;  %v12097_v46 = vld [vmem:[#allocation4 + $0xcd0] ss:$48 sps:$4 sm:$0xff]  }
 0x2a3   : > { %5546 = vmatpush1.bf16.msra.mxu1 %v12025_v39  ;;  %v12100_v39 = vld [vmem:[#allocation4 + $0xcd8] ss:$48 sps:$4 sm:$0xff]  }
 0x2a4   : > { %5758 = vmatpush1.bf16.msra.mxu0 %v12028_v54  ;;  %5547 = vmatprep.subr.bf16.mxu1 %v12033_v55  ;;  %v12105_v54 = vld [vmem:[#allocation4 + $0xd34] ss:$48 sps:$4 sm:$0xff]   ;;  %v12108_v55 = vld [vmem:[#allocation4 + $0xd3c] ss:$48 sps:$4 sm:$0xff]  }
 0x2a5   : > { %5759 = vmatprep.subr.bf16.mxu0 %v12036_v57  ;;  %v12103_v57 = vld [vmem:[#allocation4 + $0xd30] ss:$48 sps:$4 sm:$0xff]  }
 0x2a7   : > { %5548 = vmatpush1.bf16.msra.mxu1 %v12031_v58  ;;  %v12106_v58 = vld [vmem:[#allocation4 + $0xd38] ss:$48 sps:$4 sm:$0xff]  }
 0x2a8   : > { %5760 = vmatpush1.bf16.msra.mxu0 %v12034_v56  ;;  %5549 = vmatprep.subr.bf16.mxu1 %v12039_v61  ;;  %v12111_v56 = vld [vmem:[#allocation4 + $0xd94] ss:$48 sps:$4 sm:$0xff]   ;;  %v12114_v61 = vld [vmem:[#allocation4 + $0xd9c] ss:$48 sps:$4 sm:$0xff]  }
 0x2a9   : > { %5761 = vmatprep.subr.bf16.mxu0 %v12042_v3  ;;  %v12109_v3 = vld [vmem:[#allocation4 + $0xd90] ss:$48 sps:$4 sm:$0xff]  }
 0x2ab   : > { %5550 = vmatpush1.bf16.msra.mxu1 %v12037_v4  ;;  %v12112_v4 = vld [vmem:[#allocation4 + $0xd98] ss:$48 sps:$4 sm:$0xff]  }
 0x2ac   : > { %5762 = vmatpush1.bf16.msra.mxu0 %v12040_v8  ;;  %5551 = vmatprep.subr.bf16.mxu1 %v12045_v9  ;;  %v12117_v8 = vld [vmem:[#allocation4 + $0xdf4] ss:$48 sps:$4 sm:$0xff]   ;;  %v12120_v9 = vld [vmem:[#allocation4 + $0xdfc] ss:$48 sps:$4 sm:$0xff]  }
 0x2ad   : > { %5763 = vmatprep.subr.bf16.mxu0 %v12048_v44  ;;  %v12115_v44 = vld [vmem:[#allocation4 + $0xdf0] ss:$48 sps:$4 sm:$0xff]  }
 0x2af   : > { %5552 = vmatpush1.bf16.msra.mxu1 %v12043_v10  ;;  %v12118_v10 = vld [vmem:[#allocation4 + $0xdf8] ss:$48 sps:$4 sm:$0xff]  }
 0x2b0   : > { %5764 = vmatpush1.bf16.msra.mxu0 %v12046_v45  ;;  %5553 = vmatprep.subr.bf16.mxu1 %v12051_v11  ;;  %v12123_v45 = vld [vmem:[#allocation4 + $0xe54] ss:$48 sps:$4 sm:$0xff]   ;;  %v12126_v11 = vld [vmem:[#allocation4 + $0xe5c] ss:$48 sps:$4 sm:$0xff]  }
 0x2b1   : > { %5765 = vmatprep.subr.bf16.mxu0 %v12054_v13  ;;  %v12121_v13 = vld [vmem:[#allocation4 + $0xe50] ss:$48 sps:$4 sm:$0xff]  }
 0x2b3   : > { %5554 = vmatpush1.bf16.msra.mxu1 %v12049_v14  ;;  %v12124_v14 = vld [vmem:[#allocation4 + $0xe58] ss:$48 sps:$4 sm:$0xff]  }
 0x2b4   : > { %5766 = vmatpush1.bf16.msra.mxu0 %v12052_v15  ;;  %5555 = vmatprep.subr.bf16.mxu1 %v12057_v43  ;;  %v12129_v15 = vld [vmem:[#allocation4 + $0xeb4] ss:$48 sps:$4 sm:$0xff]   ;;  %v12132_v43 = vld [vmem:[#allocation4 + $0xebc] ss:$48 sps:$4 sm:$0xff]  }
 0x2b5   : > { %5767 = vmatprep.subr.bf16.mxu0 %v12060_v2  ;;  %v12127_v2 = vld [vmem:[#allocation4 + $0xeb0] ss:$48 sps:$4 sm:$0xff]  }
 0x2b7   : > { %5556 = vmatpush1.bf16.msra.mxu1 %v12055_v63  ;;  %v12130_v63 = vld [vmem:[#allocation4 + $0xeb8] ss:$48 sps:$4 sm:$0xff]  }
 0x2b8   : > { %5768 = vmatpush1.bf16.msra.mxu0 %v12058_v16  ;;  %5557 = vmatprep.subr.bf16.mxu1 %v12063_v17  ;;  %v12135_v16 = vld [vmem:[#allocation4 + $0xf14] ss:$48 sps:$4 sm:$0xff]   ;;  %v12138_v17 = vld [vmem:[#allocation4 + $0xf1c] ss:$48 sps:$4 sm:$0xff]  }
 0x2b9   : > { %5769 = vmatprep.subr.bf16.mxu0 %v12066_v18  ;;  %v12133_v18 = vld [vmem:[#allocation4 + $0xf10] ss:$48 sps:$4 sm:$0xff]  }
 0x2bb   : > { %5558 = vmatpush1.bf16.msra.mxu1 %v12061_v1  ;;  %v12136_v1 = vld [vmem:[#allocation4 + $0xf18] ss:$48 sps:$4 sm:$0xff]  }
 0x2bc   : > { %5770 = vmatpush1.bf16.msra.mxu0 %v12064_v20  ;;  %5559 = vmatprep.subr.bf16.mxu1 %v12069_v21  ;;  %v12141_v20 = vld [vmem:[#allocation4 + $0xf74] ss:$48 sps:$4 sm:$0xff]   ;;  %v12144_v21 = vld [vmem:[#allocation4 + $0xf7c] ss:$48 sps:$4 sm:$0xff]  }
 0x2bd   : > { %5771 = vmatprep.subr.bf16.mxu0 %v12072_v48  ;;  %v12139_v48 = vld [vmem:[#allocation4 + $0xf70] ss:$48 sps:$4 sm:$0xff]  }
 0x2bf   : > { %5560 = vmatpush1.bf16.msra.mxu1 %v12067_v22  ;;  %v12142_v22 = vld [vmem:[#allocation4 + $0xf78] ss:$48 sps:$4 sm:$0xff]  }
 0x2c0   : > { %5772 = vmatpush1.bf16.msra.mxu0 %v12070_v6  ;;  %5561 = vmatprep.subr.bf16.mxu1 %v12075_v49  ;;  %v12147_v6 = vld [vmem:[#allocation4 + $0xfd4] ss:$48 sps:$4 sm:$0xff]   ;;  %v12150_v49 = vld [vmem:[#allocation4 + $0xfdc] ss:$48 sps:$4 sm:$0xff]  }
 0x2c1   : > { %5773 = vmatprep.subr.bf16.mxu0 %v12078_v23  ;;  %v12145_v23 = vld [vmem:[#allocation4 + $0xfd0] ss:$48 sps:$4 sm:$0xff]  }
 0x2c3   : > { %5562 = vmatpush1.bf16.msra.mxu1 %v12073_v47  ;;  %v12148_v47 = vld [vmem:[#allocation4 + $0xfd8] ss:$48 sps:$4 sm:$0xff]  }
 0x2c4   : > { %5774 = vmatpush1.bf16.msra.mxu0 %v12076_v5  ;;  %5563 = vmatprep.subr.bf16.mxu1 %v12081_v28  ;;  %v12153_v5 = vld [vmem:[#allocation4 + $0x1034] ss:$48 sps:$4 sm:$0xff]   ;;  %v12156_v28 = vld [vmem:[#allocation4 + $0x103c] ss:$48 sps:$4 sm:$0xff]  }
 0x2c5   : > { %5775 = vmatprep.subr.bf16.mxu0 %v12084_v29  ;;  %v12151_v29 = vld [vmem:[#allocation4 + $0x1030] ss:$48 sps:$4 sm:$0xff]  }
 0x2c7   : > { %5564 = vmatpush1.bf16.msra.mxu1 %v12079_v30  ;;  %v12154_v30 = vld [vmem:[#allocation4 + $0x1038] ss:$48 sps:$4 sm:$0xff]  }
 0x2c8   : > { %5776 = vmatpush1.bf16.msra.mxu0 %v12082_v31  ;;  %5586 = vmatprep.subr.bf16.mxu1 %v12087_v32  ;;  %v12159_v31 = vld [vmem:[#allocation4 + $0x1094] ss:$48 sps:$4 sm:$0xff]   ;;  %v12162_v32 = vld [vmem:[#allocation4 + $0x109c] ss:$48 sps:$4 sm:$0xff]  }
 0x2c9   : > { %5798 = vmatprep.subr.bf16.mxu0 %v12090_v33  ;;  %v12157_v33 = vld [vmem:[#allocation4 + $0x1090] ss:$48 sps:$4 sm:$0xff]  }
 0x2ca   : > { %5566 = vmatmul.mubr.bf16.vlgmr.msra.gmra.mrb[32].mxu1 %v13143_v41 }
 0x2cb   : > { %5778 = vmatmul.mubr.bf16.vlgmr.msra.gmra.mrb[40].mxu0 %v13143_v41  ;;  %5575 = vmatprep.mubr.bf16.mxu1 %v13161_v25 }
 0x2cc   : > { %5587 = vmatpush1.bf16.msra.mxu1 %v12085_v34  ;;  %5787 = vmatprep.mubr.bf16.mxu0 %v13161_v25  ;;  %v12160_v34 = vld [vmem:[#allocation4 + $0x1098] ss:$48 sps:$4 sm:$0xff]  }
 0x2cd   : > { %5799 = vmatpush1.bf16.msra.mxu0 %v12088_v36  ;;  %5588 = vmatprep.subr.bf16.mxu1 %v12093_v37  ;;  %v12165_v36 = vld [vmem:[#allocation4 + $0x10f4] ss:$48 sps:$4 sm:$0xff]   ;;  %v12168_v37 = vld [vmem:[#allocation4 + $0x10fc] ss:$48 sps:$4 sm:$0xff]  }
 0x2ce   : > { %5800 = vmatprep.subr.bf16.mxu0 %v12096_v52  ;;  %v12163_v52 = vld [vmem:[#allocation4 + $0x10f0] ss:$48 sps:$4 sm:$0xff]  }
 0x2d0   : > { %5589 = vmatpush1.bf16.msra.mxu1 %v12091_v38  ;;  %v12166_v38 = vld [vmem:[#allocation4 + $0x10f8] ss:$48 sps:$4 sm:$0xff]  }
 0x2d1   : > { %5801 = vmatpush1.bf16.msra.mxu0 %v12094_v42  ;;  %5590 = vmatprep.subr.bf16.mxu1 %v12099_v51  ;;  %v12171_v42 = vld [vmem:[#allocation4 + $0x1154] ss:$48 sps:$4 sm:$0xff]   ;;  %v12174_v51 = vld [vmem:[#allocation4 + $0x115c] ss:$48 sps:$4 sm:$0xff]  }
 0x2d2   : > { %5576 = vmatmul.mubr.bf16.gmra.mrb[36].mxu1 %v13163_v26  ;;  %5802 = vmatprep.subr.bf16.mxu0 %v12102_v35  ;;  %v12169_v35 = vld [vmem:[#allocation4 + $0x1150] ss:$48 sps:$4 sm:$0xff]  }
 0x2d3   : > { %5788 = vmatmul.mubr.bf16.gmra.mrb[44].mxu0 %v13163_v26  ;;  %5618 = vmatprep.mubr.bf16.mxu1 %v13177_v59 }
 0x2d4   : > { %5591 = vmatpush1.bf16.msra.mxu1 %v12097_v46  ;;  %5830 = vmatprep.mubr.bf16.mxu0 %v13177_v59  ;;  %v12172_v46 = vld [vmem:[#allocation4 + $0x1158] ss:$48 sps:$4 sm:$0xff]  }
 0x2d5   : > { %5803 = vmatpush1.bf16.msra.mxu0 %v12100_v39  ;;  %5592 = vmatprep.subr.bf16.mxu1 %v12105_v54  ;;  %v12177_v39 = vld [vmem:[#allocation4 + $0x11b4] ss:$48 sps:$4 sm:$0xff]   ;;  %v12180_v54 = vld [vmem:[#allocation4 + $0x11bc] ss:$48 sps:$4 sm:$0xff]  }
 0x2d6   : > { %5804 = vmatprep.subr.bf16.mxu0 %v12108_v55  ;;  %v12175_v55 = vld [vmem:[#allocation4 + $0x11b0] ss:$48 sps:$4 sm:$0xff]  }
 0x2d8   : > { %5593 = vmatpush1.bf16.msra.mxu1 %v12103_v57  ;;  %v12178_v57 = vld [vmem:[#allocation4 + $0x11b8] ss:$48 sps:$4 sm:$0xff]  }
 0x2d9   : > { %5805 = vmatpush1.bf16.msra.mxu0 %v12106_v58  ;;  %5594 = vmatprep.subr.bf16.mxu1 %v12111_v56  ;;  %v12183_v58 = vld [vmem:[#allocation4 + $0x1214] ss:$48 sps:$4 sm:$0xff]   ;;  %v12186_v56 = vld [vmem:[#allocation4 + $0x121c] ss:$48 sps:$4 sm:$0xff]  }
 0x2da   : > { %5806 = vmatprep.subr.bf16.mxu0 %v12114_v61  ;;  %v12181_v61 = vld [vmem:[#allocation4 + $0x1210] ss:$48 sps:$4 sm:$0xff]  }
 0x2dc   : > { %5595 = vmatpush1.bf16.msra.mxu1 %v12109_v3  ;;  %v12184_v3 = vld [vmem:[#allocation4 + $0x1218] ss:$48 sps:$4 sm:$0xff]  }
 0x2dd   : > { %5807 = vmatpush1.bf16.msra.mxu0 %v12112_v4  ;;  %5596 = vmatprep.subr.bf16.mxu1 %v12117_v8  ;;  %v12189_v4 = vld [vmem:[#allocation4 + $0x1274] ss:$48 sps:$4 sm:$0xff]   ;;  %v12192_v8 = vld [vmem:[#allocation4 + $0x127c] ss:$48 sps:$4 sm:$0xff]  }
 0x2de   : > { %5808 = vmatprep.subr.bf16.mxu0 %v12120_v9  ;;  %v12187_v9 = vld [vmem:[#allocation4 + $0x1270] ss:$48 sps:$4 sm:$0xff]  }
 0x2e0   : > { %5597 = vmatpush1.bf16.msra.mxu1 %v12115_v44  ;;  %v12190_v44 = vld [vmem:[#allocation4 + $0x1278] ss:$48 sps:$4 sm:$0xff]  }
 0x2e1   : > { %5809 = vmatpush1.bf16.msra.mxu0 %v12118_v10  ;;  %5598 = vmatprep.subr.bf16.mxu1 %v12123_v45  ;;  %v12195_v10 = vld [vmem:[#allocation4 + $0x12d4] ss:$48 sps:$4 sm:$0xff]   ;;  %v12198_v45 = vld [vmem:[#allocation4 + $0x12dc] ss:$48 sps:$4 sm:$0xff]  }
 0x2e2   : > { %5810 = vmatprep.subr.bf16.mxu0 %v12126_v11  ;;  %v12193_v11 = vld [vmem:[#allocation4 + $0x12d0] ss:$48 sps:$4 sm:$0xff]  }
 0x2e4   : > { %5599 = vmatpush1.bf16.msra.mxu1 %v12121_v13  ;;  %v12196_v13 = vld [vmem:[#allocation4 + $0x12d8] ss:$48 sps:$4 sm:$0xff]  }
 0x2e5   : > { %5811 = vmatpush1.bf16.msra.mxu0 %v12124_v14  ;;  %5600 = vmatprep.subr.bf16.mxu1 %v12129_v15  ;;  %v12201_v14 = vld [vmem:[#allocation4 + $0x1334] ss:$48 sps:$4 sm:$0xff]   ;;  %v12204_v15 = vld [vmem:[#allocation4 + $0x133c] ss:$48 sps:$4 sm:$0xff]  }
 0x2e6   : > { %5812 = vmatprep.subr.bf16.mxu0 %v12132_v43  ;;  %v12199_v43 = vld [vmem:[#allocation4 + $0x1330] ss:$48 sps:$4 sm:$0xff]  }
 0x2e8   : > { %5601 = vmatpush1.bf16.msra.mxu1 %v12127_v2  ;;  %v12202_v2 = vld [vmem:[#allocation4 + $0x1338] ss:$48 sps:$4 sm:$0xff]  }
 0x2e9   : > { %5813 = vmatpush1.bf16.msra.mxu0 %v12130_v63  ;;  %5602 = vmatprep.subr.bf16.mxu1 %v12135_v16  ;;  %v12207_v63 = vld [vmem:[#allocation4 + $0x1394] ss:$48 sps:$4 sm:$0xff]   ;;  %v12210_v16 = vld [vmem:[#allocation4 + $0x139c] ss:$48 sps:$4 sm:$0xff]  }
 0x2ea   : > { %5814 = vmatprep.subr.bf16.mxu0 %v12138_v17  ;;  %v12205_v17 = vld [vmem:[#allocation4 + $0x1390] ss:$48 sps:$4 sm:$0xff]  }
 0x2ec   : > { %5603 = vmatpush1.bf16.msra.mxu1 %v12133_v18  ;;  %v12208_v18 = vld [vmem:[#allocation4 + $0x1398] ss:$48 sps:$4 sm:$0xff]  }
 0x2ed   : > { %5815 = vmatpush1.bf16.msra.mxu0 %v12136_v1  ;;  %5604 = vmatprep.subr.bf16.mxu1 %v12141_v20  ;;  %v12213_v1 = vld [vmem:[#allocation4 + $0x13f4] ss:$48 sps:$4 sm:$0xff]   ;;  %v12216_v20 = vld [vmem:[#allocation4 + $0x13fc] ss:$48 sps:$4 sm:$0xff]  }
 0x2ee   : > { %5816 = vmatprep.subr.bf16.mxu0 %v12144_v21 }
 0x2f0   : > { %5605 = vmatpush1.bf16.msra.mxu1 %v12139_v48 }
 0x2f1   : > { %5817 = vmatpush1.bf16.msra.mxu0 %v12142_v22  ;;  %5606 = vmatprep.subr.bf16.mxu1 %v12147_v6  ;;  %v12211_v6 = vld [vmem:[#allocation4 + $0x13f0] ss:$48 sps:$4 sm:$0xff]  }
 0x2f2   : > { %5818 = vmatprep.subr.bf16.mxu0 %v12150_v49 }
 0x2f4   : > { %5607 = vmatpush1.bf16.msra.mxu1 %v12145_v23  ;;  %v12214_v23 = vld [vmem:[#allocation4 + $0x13f8] ss:$48 sps:$4 sm:$0xff]  }
 0x2f5   : > { %5819 = vmatpush1.bf16.msra.mxu0 %v12148_v47  ;;  %5608 = vmatprep.subr.bf16.mxu1 %v12153_v5  ;;  %v12219_v5 = vld [vmem:[#allocation4 + $0x1454] ss:$48 sps:$4 sm:$0xff]  }
 0x2f6   : > { %5820 = vmatprep.subr.bf16.mxu0 %v12156_v28 }
 0x2f8   : > { %5609 = vmatpush1.bf16.msra.mxu1 %v12151_v29 }
 0x2f9   : > { %5821 = vmatpush1.bf16.msra.mxu0 %v12154_v30  ;;  %5610 = vmatprep.subr.bf16.mxu1 %v12159_v31  ;;  %v12222_v30 = vld [vmem:[#allocation4 + $0x145c] ss:$48 sps:$4 sm:$0xff]  }
 0x2fa   : > { %5822 = vmatprep.subr.bf16.mxu0 %v12162_v32  ;;  %v12217_v32 = vld [vmem:[#allocation4 + $0x1450] ss:$48 sps:$4 sm:$0xff]  }
 0x2fc   : > { %5611 = vmatpush1.bf16.msra.mxu1 %v12157_v33  ;;  %v12220_v33 = vld [vmem:[#allocation4 + $0x1458] ss:$48 sps:$4 sm:$0xff]  }
 0x2fd   : > { %5823 = vmatpush1.bf16.msra.mxu0 %v12160_v34  ;;  %5612 = vmatprep.subr.bf16.mxu1 %v12165_v36  ;;  %v12225_v34 = vld [vmem:[#allocation4 + $0x14b4] ss:$48 sps:$4 sm:$0xff]   ;;  %v12228_v36 = vld [vmem:[#allocation4 + $0x14bc] ss:$48 sps:$4 sm:$0xff]  }
 0x2fe   : > { %5824 = vmatprep.subr.bf16.mxu0 %v12168_v37 }
 0x300   : > { %5613 = vmatpush1.bf16.msra.mxu1 %v12163_v52 }
 0x301   : > { %5825 = vmatpush1.bf16.msra.mxu0 %v12166_v38  ;;  %5614 = vmatprep.subr.bf16.mxu1 %v12171_v42  ;;  %v12223_v42 = vld [vmem:[#allocation4 + $0x14b0] ss:$48 sps:$4 sm:$0xff]  }
 0x302   : > { %5826 = vmatprep.subr.bf16.mxu0 %v12174_v51 }
 0x304   : > { %5615 = vmatpush1.bf16.msra.mxu1 %v12169_v35  ;;  %v12226_v35 = vld [vmem:[#allocation4 + $0x14b8] ss:$48 sps:$4 sm:$0xff]  }
 0x305   : > { %5827 = vmatpush1.bf16.msra.mxu0 %v12172_v46  ;;  %5616 = vmatprep.subr.bf16.mxu1 %v12177_v39  ;;  %v12231_v39 = vld [vmem:[#allocation4 + $0x24] ss:$48 sps:$4 sm:$0xff]  }
 0x306   : > { %5828 = vmatprep.subr.bf16.mxu0 %v12180_v54 }
 0x308   : > { %5617 = vmatpush1.bf16.msra.mxu1 %v12175_v55 }
 0x309   : > { %5829 = vmatpush1.bf16.msra.mxu0 %v12178_v57  ;;  %5639 = vmatprep.subr.bf16.mxu1 %v12183_v58  ;;  %v12234_v57 = vld [vmem:[#allocation4 + $0x2c] ss:$48 sps:$4 sm:$0xff]  }
 0x30a   : > { %5851 = vmatprep.subr.bf16.mxu0 %v12186_v56  ;;  %v12229_v56 = vld [vmem:[#allocation4 + $0x20] ss:$48 sps:$4 sm:$0xff]  }
 0x30b   : > { %5619 = vmatmul.mubr.bf16.vlgmr.msra.gmra.mrb[32].mxu1 %v13145_v53 }
 0x30c   : > { %5831 = vmatmul.mubr.bf16.vlgmr.msra.gmra.mrb[40].mxu0 %v13145_v53  ;;  %5628 = vmatprep.mubr.bf16.mxu1 %v13185_v19 }
 0x30d   : > { %5640 = vmatpush1.bf16.msra.mxu1 %v12181_v61  ;;  %5840 = vmatprep.mubr.bf16.mxu0 %v13185_v19  ;;  %v12232_v61 = vld [vmem:[#allocation4 + $0x28] ss:$48 sps:$4 sm:$0xff]  }
 0x30e   : > { %5852 = vmatpush1.bf16.msra.mxu0 %v12184_v3  ;;  %5641 = vmatprep.subr.bf16.mxu1 %v12189_v4  ;;  %v12237_v3 = vld [vmem:[#allocation4 + $0x84] ss:$48 sps:$4 sm:$0xff]   ;;  %v12240_v4 = vld [vmem:[#allocation4 + $0x8c] ss:$48 sps:$4 sm:$0xff]  }
 0x30f   : > { %5853 = vmatprep.subr.bf16.mxu0 %v12192_v8  ;;  %v12235_v8 = vld [vmem:[#allocation4 + $0x80] ss:$48 sps:$4 sm:$0xff]  }
 0x311   : > { %5642 = vmatpush1.bf16.msra.mxu1 %v12187_v9  ;;  %v12238_v9 = vld [vmem:[#allocation4 + $0x88] ss:$48 sps:$4 sm:$0xff]  }
 0x312   : > { %5854 = vmatpush1.bf16.msra.mxu0 %v12190_v44  ;;  %5643 = vmatprep.subr.bf16.mxu1 %v12195_v10  ;;  %v12243_v44 = vld [vmem:[#allocation4 + $0xe4] ss:$48 sps:$4 sm:$0xff]   ;;  %v12246_v10 = vld [vmem:[#allocation4 + $0xec] ss:$48 sps:$4 sm:$0xff]  }
 0x313   : > { %5629 = vmatmul.mubr.bf16.gmra.mrb[36].mxu1 %v13165_v27  ;;  %5855 = vmatprep.subr.bf16.mxu0 %v12198_v45  ;;  %v12241_v45 = vld [vmem:[#allocation4 + $0xe0] ss:$48 sps:$4 sm:$0xff]  }
 0x314   : > { %5841 = vmatmul.mubr.bf16.gmra.mrb[44].mxu0 %v13165_v27  ;;  %5671 = vmatprep.mubr.bf16.mxu1 %v12823_v0 }
 0x315   : > { %5644 = vmatpush1.bf16.msra.mxu1 %v12193_v11  ;;  %5883 = vmatprep.mubr.bf16.mxu0 %v12823_v0  ;;  %v12244_v11 = vld [vmem:[#allocation4 + $0xe8] ss:$48 sps:$4 sm:$0xff]  }
 0x316   : > { %5856 = vmatpush1.bf16.msra.mxu0 %v12196_v13  ;;  %5645 = vmatprep.subr.bf16.mxu1 %v12201_v14  ;;  %v12249_v13 = vld [vmem:[#allocation4 + $0x144] ss:$48 sps:$4 sm:$0xff]   ;;  %v12252_v14 = vld [vmem:[#allocation4 + $0x14c] ss:$48 sps:$4 sm:$0xff]  }
 0x317   : > { %5857 = vmatprep.subr.bf16.mxu0 %v12204_v15  ;;  %v12247_v15 = vld [vmem:[#allocation4 + $0x140] ss:$48 sps:$4 sm:$0xff]  }
 0x319   : > { %5646 = vmatpush1.bf16.msra.mxu1 %v12199_v43  ;;  %v12250_v43 = vld [vmem:[#allocation4 + $0x148] ss:$48 sps:$4 sm:$0xff]  }
 0x31a   : > { %5858 = vmatpush1.bf16.msra.mxu0 %v12202_v2  ;;  %5647 = vmatprep.subr.bf16.mxu1 %v12207_v63  ;;  %v12255_v2 = vld [vmem:[#allocation4 + $0x1a4] ss:$48 sps:$4 sm:$0xff]   ;;  %v12258_v63 = vld [vmem:[#allocation4 + $0x1ac] ss:$48 sps:$4 sm:$0xff]  }
 0x31b   : > { %5859 = vmatprep.subr.bf16.mxu0 %v12210_v16  ;;  %v12253_v16 = vld [vmem:[#allocation4 + $0x1a0] ss:$48 sps:$4 sm:$0xff]  }
 0x31c   : > { %v13237_v21 = vpop.f32.mrb[24].mxu1 }
 0x31d   : > { %5648 = vmatpush1.bf16.msra.mxu1 %v12205_v17  ;;  %v13239_v48 = vpop.f32.mrb[32].mxu0  ;;  %v13241_v22 = vpop.f32.mrb[25].mxu1  ;;  %v12256_v17 = vld [vmem:[#allocation4 + $0x1a8] ss:$48 sps:$4 sm:$0xff]  }
 0x31e   : > { %5860 = vmatpush1.bf16.msra.mxu0 %v12208_v18  ;;  %v13243_v49 = vpop.f32.mrb[33].mxu0  ;;  %5649 = vmatprep.subr.bf16.mxu1 %v12213_v1  ;;  %v13245_v47 = vpop.f32.mrb[26].mxu1  ;;  %v12261_v18 = vld [vmem:[#allocation4 + $0x204] ss:$48 sps:$4 sm:$0xff]   ;;  %v12264_v1 = vld [vmem:[#allocation4 + $0x20c] ss:$48 sps:$4 sm:$0xff]  }
 0x31f   : > { %5861 = vmatprep.subr.bf16.mxu0 %v12216_v20  ;;  %v13247_v28 = vpop.f32.mrb[34].mxu0  ;;  %v13249_v29 = vpop.f32.mrb[27].mxu1  ;;  %v12259_v20 = vld [vmem:[#allocation4 + $0x200] ss:$48 sps:$4 sm:$0xff]  }
 0x320   : > { %v13251_v31 = vpop.f32.mrb[35].mxu0 }
 0x321   : > { %5650 = vmatpush1.bf16.msra.mxu1 %v12211_v6  ;;  %v12262_v6 = vld [vmem:[#allocation4 + $0x208] ss:$48 sps:$4 sm:$0xff]  }
 0x322   : > { %5862 = vmatpush1.bf16.msra.mxu0 %v12214_v23  ;;  %5651 = vmatprep.subr.bf16.mxu1 %v12219_v5  ;;  %v12267_v23 = vld [vmem:[#allocation4 + $0x264] ss:$48 sps:$4 sm:$0xff]   ;;  %v12270_v5 = vld [vmem:[#allocation4 + $0x26c] ss:$48 sps:$4 sm:$0xff]  }
 0x323   : > { %5863 = vmatprep.subr.bf16.mxu0 %v12222_v30  ;;  %v12268_v30 = vld [vmem:[#allocation4 + $0x268] ss:$48 sps:$4 sm:$0xff]  }
 0x324   : > { %v13253_v37 = vpop.f32.mrb[28].mxu1 }
 0x325   : > { %5652 = vmatpush1.bf16.msra.mxu1 %v12217_v32  ;;  %v13255_v52 = vpop.f32.mrb[36].mxu0  ;;  %v13257_v38 = vpop.f32.mrb[29].mxu1  ;;  %v12273_v32 = vld [vmem:[#allocation4 + $0x2c4] ss:$48 sps:$4 sm:$0xff]  }
 0x326   : > { %5864 = vmatpush1.bf16.msra.mxu0 %v12220_v33  ;;  %v13259_v51 = vpop.f32.mrb[37].mxu0  ;;  %5653 = vmatprep.subr.bf16.mxu1 %v12225_v34  ;;  %v13261_v46 = vpop.f32.mrb[30].mxu1  ;;  %v12276_v33 = vld [vmem:[#allocation4 + $0x2cc] ss:$48 sps:$4 sm:$0xff]   ;;  %v12271_v34 = vld [vmem:[#allocation4 + $0x2c0] ss:$48 sps:$4 sm:$0xff]  }
 0x327   : > { %5865 = vmatprep.subr.bf16.mxu0 %v12228_v36  ;;  %v13263_v54 = vpop.f32.mrb[38].mxu0  ;;  %v13265_v55 = vpop.f32.mrb[31].mxu1  ;;  %v12274_v36 = vld [vmem:[#allocation4 + $0x2c8] ss:$48 sps:$4 sm:$0xff]  }
 0x328   : > { %v13267_v58 = vpop.f32.mrb[39].mxu0 }
 0x329   : > { %5654 = vmatpush1.bf16.msra.mxu1 %v12223_v42  ;;  %v12279_v42 = vld [vmem:[#allocation4 + $0x324] ss:$48 sps:$4 sm:$0xff]  }
 0x32a   : > { %5866 = vmatpush1.bf16.msra.mxu0 %v12226_v35  ;;  %5904 = vmatprep.subr.bf16.mxu1 %v12231_v39  ;;  %v12282_v35 = vld [vmem:[#allocation4 + $0x32c] ss:$48 sps:$4 sm:$0xff]   ;;  %v12277_v39 = vld [vmem:[#allocation4 + $0x320] ss:$48 sps:$4 sm:$0xff]  }
 0x32b   : > { %6116 = vmatprep.subr.bf16.mxu0 %v12234_v57  ;;  %v12280_v57 = vld [vmem:[#allocation4 + $0x328] ss:$48 sps:$4 sm:$0xff]  }
 0x32c   : > { %5672 = vmatmul.mubr.bf16.vlgmr.msra.gmra.mrb[32].mxu1 %v13179_v60 }
 0x32d   : > { %5884 = vmatmul.mubr.bf16.vlgmr.msra.gmra.mrb[40].mxu0 %v13179_v60  ;;  %5905 = vmatpush1.bf16.msra.mxu1 %v12229_v56  ;;  %v12285_v56 = vld [vmem:[#allocation4 + $0x384] ss:$48 sps:$4 sm:$0xff]  }
 0x32e   : > { %6117 = vmatpush1.bf16.msra.mxu0 %v12232_v61  ;;  %5906 = vmatprep.subr.bf16.mxu1 %v12237_v3  ;;  %v12288_v61 = vld [vmem:[#allocation4 + $0x38c] ss:$48 sps:$4 sm:$0xff]   ;;  %v12283_v3 = vld [vmem:[#allocation4 + $0x380] ss:$48 sps:$4 sm:$0xff]  }
 0x32f   : > { %6118 = vmatprep.subr.bf16.mxu0 %v12240_v4  ;;  %5681 = vmatprep.mubr.bf16.mxu1 %v12823_v0  ;;  %v12286_v4 = vld [vmem:[#allocation4 + $0x388] ss:$48 sps:$4 sm:$0xff]  }
 0x330   : > { %5893 = vmatprep.mubr.bf16.mxu0 %v12823_v0 }
 0x331   : > { %5907 = vmatpush1.bf16.msra.mxu1 %v12235_v8  ;;  %v12291_v8 = vld [vmem:[#allocation4 + $0x3e4] ss:$48 sps:$4 sm:$0xff]  }
 0x332   : > { %6119 = vmatpush1.bf16.msra.mxu0 %v12238_v9  ;;  %5908 = vmatprep.subr.bf16.mxu1 %v12243_v44  ;;  %v12294_v9 = vld [vmem:[#allocation4 + $0x3ec] ss:$48 sps:$4 sm:$0xff]   ;;  %v12289_v44 = vld [vmem:[#allocation4 + $0x3e0] ss:$48 sps:$4 sm:$0xff]  }
 0x333   : > { %6120 = vmatprep.subr.bf16.mxu0 %v12246_v10  ;;  %v12292_v10 = vld [vmem:[#allocation4 + $0x3e8] ss:$48 sps:$4 sm:$0xff]  }
 0x334   : > { %5682 = vmatmul.mubr.bf16.gmra.mrb[36].mxu1 %v13187_v7 }
 0x335   : > { %5894 = vmatmul.mubr.bf16.gmra.mrb[44].mxu0 %v13187_v7  ;;  %5909 = vmatpush1.bf16.msra.mxu1 %v12241_v45  ;;  %v12297_v45 = vld [vmem:[#allocation4 + $0x444] ss:$48 sps:$4 sm:$0xff]  }
 0x336   : > { %5936 = vmatprep.mubr.bf16.mxu1 %v13139_v50  ;;  %6121 = vmatpush1.bf16.msra.mxu0 %v12244_v11  ;;  %v12300_v11 = vld [vmem:[#allocation4 + $0x44c] ss:$48 sps:$4 sm:$0xff]  }
 0x337   : > { %6148 = vmatprep.mubr.bf16.mxu0 %v13139_v50  ;;  %5910 = vmatprep.subr.bf16.mxu1 %v12249_v13  ;;  %v12265_v50 = vld [vmem:[#allocation4 + $0x260] ss:$48 sps:$4 sm:$0xff]  }
 0x338   : > { %6122 = vmatprep.subr.bf16.mxu0 %v12252_v14  ;;  %v12295_v13 = vld [vmem:[#allocation4 + $0x440] ss:$48 sps:$4 sm:$0xff]   ;;  %v12298_v14 = vld [vmem:[#allocation4 + $0x448] ss:$48 sps:$4 sm:$0xff]  }
 0x339   : > { %5911 = vmatpush1.bf16.msra.mxu1 %v12247_v15  ;;  %v12303_v15 = vld [vmem:[#allocation4 + $0x4a4] ss:$48 sps:$4 sm:$0xff]  }
 0x33a   : > { %6123 = vmatpush1.bf16.msra.mxu0 %v12250_v43  ;;  %5912 = vmatprep.subr.bf16.mxu1 %v12255_v2  ;;  %v12306_v43 = vld [vmem:[#allocation4 + $0x4ac] ss:$48 sps:$4 sm:$0xff]   ;;  %v12301_v2 = vld [vmem:[#allocation4 + $0x4a0] ss:$48 sps:$4 sm:$0xff]  }
 0x33b   : > { %6124 = vmatprep.subr.bf16.mxu0 %v12258_v63  ;;  %v12304_v63 = vld [vmem:[#allocation4 + $0x4a8] ss:$48 sps:$4 sm:$0xff]  }
 0x33d   : > { %5913 = vmatpush1.bf16.msra.mxu1 %v12253_v16  ;;  %v12309_v16 = vld [vmem:[#allocation4 + $0x504] ss:$48 sps:$4 sm:$0xff]  }
 0x33e   : > { %6125 = vmatpush1.bf16.msra.mxu0 %v12256_v17  ;;  %5914 = vmatprep.subr.bf16.mxu1 %v12261_v18  ;;  %v12312_v17 = vld [vmem:[#allocation4 + $0x50c] ss:$48 sps:$4 sm:$0xff]   ;;  %v12307_v18 = vld [vmem:[#allocation4 + $0x500] ss:$48 sps:$4 sm:$0xff]  }
 0x33f   : > { %6126 = vmatprep.subr.bf16.mxu0 %v12264_v1  ;;  %v12310_v1 = vld [vmem:[#allocation4 + $0x508] ss:$48 sps:$4 sm:$0xff]  }
 0x341   : > { %5915 = vmatpush1.bf16.msra.mxu1 %v12259_v20  ;;  %v12315_v20 = vld [vmem:[#allocation4 + $0x564] ss:$48 sps:$4 sm:$0xff]  }
 0x342   : > { %6127 = vmatpush1.bf16.msra.mxu0 %v12262_v6  ;;  %5916 = vmatprep.subr.bf16.mxu1 %v12267_v23  ;;  %v12318_v6 = vld [vmem:[#allocation4 + $0x56c] ss:$48 sps:$4 sm:$0xff]   ;;  %v12313_v23 = vld [vmem:[#allocation4 + $0x560] ss:$48 sps:$4 sm:$0xff]  }
 0x343   : > { %6128 = vmatprep.subr.bf16.mxu0 %v12270_v5  ;;  %v12316_v5 = vld [vmem:[#allocation4 + $0x568] ss:$48 sps:$4 sm:$0xff]  }
 0x345   : > { %5917 = vmatpush1.bf16.msra.mxu1 %v12265_v50  ;;  %v12321_v50 = vld [vmem:[#allocation4 + $0x5c4] ss:$48 sps:$4 sm:$0xff]  }
 0x346   : > { %6129 = vmatpush1.bf16.msra.mxu0 %v12268_v30  ;;  %5918 = vmatprep.subr.bf16.mxu1 %v12273_v32  ;;  %v12324_v30 = vld [vmem:[#allocation4 + $0x5cc] ss:$48 sps:$4 sm:$0xff]   ;;  %v12319_v32 = vld [vmem:[#allocation4 + $0x5c0] ss:$48 sps:$4 sm:$0xff]  }
 0x347   : > { %6130 = vmatprep.subr.bf16.mxu0 %v12276_v33  ;;  %v12322_v33 = vld [vmem:[#allocation4 + $0x5c8] ss:$48 sps:$4 sm:$0xff]  }
 0x349   : > { %5919 = vmatpush1.bf16.msra.mxu1 %v12271_v34  ;;  %v12327_v34 = vld [vmem:[#allocation4 + $0x624] ss:$48 sps:$4 sm:$0xff]  }
 0x34a   : > { %6131 = vmatpush1.bf16.msra.mxu0 %v12274_v36  ;;  %5920 = vmatprep.subr.bf16.mxu1 %v12279_v42  ;;  %v12330_v36 = vld [vmem:[#allocation4 + $0x62c] ss:$48 sps:$4 sm:$0xff]   ;;  %v12325_v42 = vld [vmem:[#allocation4 + $0x620] ss:$48 sps:$4 sm:$0xff]  }
 0x34b   : > { %6132 = vmatprep.subr.bf16.mxu0 %v12282_v35  ;;  %v12328_v35 = vld [vmem:[#allocation4 + $0x628] ss:$48 sps:$4 sm:$0xff]  }
 0x34d   : > { %5921 = vmatpush1.bf16.msra.mxu1 %v12277_v39  ;;  %v12333_v39 = vld [vmem:[#allocation4 + $0x684] ss:$48 sps:$4 sm:$0xff]  }
 0x34e   : > { %6133 = vmatpush1.bf16.msra.mxu0 %v12280_v57  ;;  %5922 = vmatprep.subr.bf16.mxu1 %v12285_v56  ;;  %v12336_v57 = vld [vmem:[#allocation4 + $0x68c] ss:$48 sps:$4 sm:$0xff]   ;;  %v12331_v56 = vld [vmem:[#allocation4 + $0x680] ss:$48 sps:$4 sm:$0xff]  }
 0x34f   : > { %6134 = vmatprep.subr.bf16.mxu0 %v12288_v61  ;;  %v12334_v61 = vld [vmem:[#allocation4 + $0x688] ss:$48 sps:$4 sm:$0xff]  }
 0x351   : > { %5923 = vmatpush1.bf16.msra.mxu1 %v12283_v3  ;;  %v12339_v3 = vld [vmem:[#allocation4 + $0x6e4] ss:$48 sps:$4 sm:$0xff]  }
 0x352   : > { %6135 = vmatpush1.bf16.msra.mxu0 %v12286_v4  ;;  %5924 = vmatprep.subr.bf16.mxu1 %v12291_v8  ;;  %v12342_v4 = vld [vmem:[#allocation4 + $0x6ec] ss:$48 sps:$4 sm:$0xff]   ;;  %v12337_v8 = vld [vmem:[#allocation4 + $0x6e0] ss:$48 sps:$4 sm:$0xff]  }
 0x353   : > { %6136 = vmatprep.subr.bf16.mxu0 %v12294_v9  ;;  %v12340_v9 = vld [vmem:[#allocation4 + $0x6e8] ss:$48 sps:$4 sm:$0xff]  }
 0x355   : > { %5925 = vmatpush1.bf16.msra.mxu1 %v12289_v44  ;;  %v12345_v44 = vld [vmem:[#allocation4 + $0x744] ss:$48 sps:$4 sm:$0xff]  }
 0x356   : > { %6137 = vmatpush1.bf16.msra.mxu0 %v12292_v10  ;;  %5926 = vmatprep.subr.bf16.mxu1 %v12297_v45  ;;  %v12346_v10 = vld [vmem:[#allocation4 + $0x748] ss:$48 sps:$4 sm:$0xff]   ;;  %v12351_v45 = vld [vmem:[#allocation4 + $0x7a4] ss:$48 sps:$4 sm:$0xff]  }
 0x357   : > { %6138 = vmatprep.subr.bf16.mxu0 %v12300_v11  ;;  %v12354_v11 = vld [vmem:[#allocation4 + $0x7ac] ss:$48 sps:$4 sm:$0xff]  }
 0x359   : > { %5927 = vmatpush1.bf16.msra.mxu1 %v12295_v13  ;;  %v12349_v13 = vld [vmem:[#allocation4 + $0x7a0] ss:$48 sps:$4 sm:$0xff]  }
 0x35a   : > { %6139 = vmatpush1.bf16.msra.mxu0 %v12298_v14  ;;  %5928 = vmatprep.subr.bf16.mxu1 %v12303_v15  ;;  %v12352_v14 = vld [vmem:[#allocation4 + $0x7a8] ss:$48 sps:$4 sm:$0xff]   ;;  %v12357_v15 = vld [vmem:[#allocation4 + $0x804] ss:$48 sps:$4 sm:$0xff]  }
 0x35b   : > { %6140 = vmatprep.subr.bf16.mxu0 %v12306_v43  ;;  %v12355_v43 = vld [vmem:[#allocation4 + $0x800] ss:$48 sps:$4 sm:$0xff]  }
 0x35d   : > { %5929 = vmatpush1.bf16.msra.mxu1 %v12301_v2  ;;  %v12363_v2 = vld [vmem:[#allocation4 + $0x864] ss:$48 sps:$4 sm:$0xff]  }
 0x35e   : > { %6141 = vmatpush1.bf16.msra.mxu0 %v12304_v63  ;;  %5930 = vmatprep.subr.bf16.mxu1 %v12309_v16  ;;  %v12366_v63 = vld [vmem:[#allocation4 + $0x86c] ss:$48 sps:$4 sm:$0xff]   ;;  %v12361_v16 = vld [vmem:[#allocation4 + $0x860] ss:$48 sps:$4 sm:$0xff]  }
 0x35f   : > { %6142 = vmatprep.subr.bf16.mxu0 %v12312_v17  ;;  %v12364_v17 = vld [vmem:[#allocation4 + $0x868] ss:$48 sps:$4 sm:$0xff]  }
 0x361   : > { %5931 = vmatpush1.bf16.msra.mxu1 %v12307_v18  ;;  %v12369_v18 = vld [vmem:[#allocation4 + $0x8c4] ss:$48 sps:$4 sm:$0xff]  }
 0x362   : > { %6143 = vmatpush1.bf16.msra.mxu0 %v12310_v1  ;;  %5932 = vmatprep.subr.bf16.mxu1 %v12315_v20  ;;  %v12372_v1 = vld [vmem:[#allocation4 + $0x8cc] ss:$48 sps:$4 sm:$0xff]   ;;  %v12367_v20 = vld [vmem:[#allocation4 + $0x8c0] ss:$48 sps:$4 sm:$0xff]  }
 0x363   : > { %6144 = vmatprep.subr.bf16.mxu0 %v12318_v6  ;;  %v12370_v6 = vld [vmem:[#allocation4 + $0x8c8] ss:$48 sps:$4 sm:$0xff]  }
 0x365   : > { %5933 = vmatpush1.bf16.msra.mxu1 %v12313_v23  ;;  %v12375_v23 = vld [vmem:[#allocation4 + $0x924] ss:$48 sps:$4 sm:$0xff]  }
 0x366   : > { %6145 = vmatpush1.bf16.msra.mxu0 %v12316_v5  ;;  %5934 = vmatprep.subr.bf16.mxu1 %v12321_v50  ;;  %v12378_v5 = vld [vmem:[#allocation4 + $0x92c] ss:$48 sps:$4 sm:$0xff]   ;;  %v12373_v50 = vld [vmem:[#allocation4 + $0x920] ss:$48 sps:$4 sm:$0xff]  }
 0x367   : > { %6146 = vmatprep.subr.bf16.mxu0 %v12324_v30  ;;  %v12376_v30 = vld [vmem:[#allocation4 + $0x928] ss:$48 sps:$4 sm:$0xff]  }
 0x369   : > { %5935 = vmatpush1.bf16.msra.mxu1 %v12319_v32  ;;  %v12381_v32 = vld [vmem:[#allocation4 + $0x984] ss:$48 sps:$4 sm:$0xff]  }
 0x36a   : > { %6147 = vmatpush1.bf16.msra.mxu0 %v12322_v33  ;;  %5957 = vmatprep.subr.bf16.mxu1 %v12327_v34  ;;  %v12384_v33 = vld [vmem:[#allocation4 + $0x98c] ss:$48 sps:$4 sm:$0xff]   ;;  %v12379_v34 = vld [vmem:[#allocation4 + $0x980] ss:$48 sps:$4 sm:$0xff]  }
 0x36b   : > { %6169 = vmatprep.subr.bf16.mxu0 %v12330_v36  ;;  %v12382_v36 = vld [vmem:[#allocation4 + $0x988] ss:$48 sps:$4 sm:$0xff]  }
 0x36c   : > { %5937 = vmatmul.mubr.bf16.vlgmr.msra.gmra.mrb[40].mxu1 %v13123_v62 }
 0x36d   : > { %6149 = vmatmul.mubr.bf16.vlgmr.msra.gmra.mrb[48].mxu0 %v13123_v62  ;;  %5946 = vmatprep.mubr.bf16.mxu1 %v13159_v24  ;;  %v12348_v62 = vld [vmem:[#allocation4 + $0x74c] ss:$48 sps:$4 sm:$0xff]  }
 0x36e   : > { %5958 = vmatpush1.bf16.msra.mxu1 %v12325_v42  ;;  %6158 = vmatprep.mubr.bf16.mxu0 %v13159_v24  ;;  %v12343_v24 = vld [vmem:[#allocation4 + $0x740] ss:$48 sps:$4 sm:$0xff]   ;;  %v12387_v42 = vld [vmem:[#allocation4 + $0x9e4] ss:$48 sps:$4 sm:$0xff]  }
 0x36f   : > { %6170 = vmatpush1.bf16.msra.mxu0 %v12328_v35  ;;  %5959 = vmatprep.subr.bf16.mxu1 %v12333_v39  ;;  %v12390_v35 = vld [vmem:[#allocation4 + $0x9ec] ss:$48 sps:$4 sm:$0xff]   ;;  %v12385_v39 = vld [vmem:[#allocation4 + $0x9e0] ss:$48 sps:$4 sm:$0xff]  }
 0x370   : > { %6171 = vmatprep.subr.bf16.mxu0 %v12336_v57  ;;  %v12388_v57 = vld [vmem:[#allocation4 + $0x9e8] ss:$48 sps:$4 sm:$0xff]  }
 0x372   : > { %5960 = vmatpush1.bf16.msra.mxu1 %v12331_v56  ;;  %v12393_v56 = vld [vmem:[#allocation4 + $0xa44] ss:$48 sps:$4 sm:$0xff]  }
 0x373   : > { %6172 = vmatpush1.bf16.msra.mxu0 %v12334_v61  ;;  %5961 = vmatprep.subr.bf16.mxu1 %v12339_v3  ;;  %v12396_v61 = vld [vmem:[#allocation4 + $0xa4c] ss:$48 sps:$4 sm:$0xff]   ;;  %v12391_v3 = vld [vmem:[#allocation4 + $0xa40] ss:$48 sps:$4 sm:$0xff]  }
 0x374   : > { %5947 = vmatmul.mubr.bf16.gmra.mrb[44].mxu1 %v13137_v12  ;;  %6173 = vmatprep.subr.bf16.mxu0 %v12342_v4  ;;  %v12394_v4 = vld [vmem:[#allocation4 + $0xa48] ss:$48 sps:$4 sm:$0xff]  }
 0x375   : > { %6159 = vmatmul.mubr.bf16.gmra.mrb[52].mxu0 %v13137_v12  ;;  %5989 = vmatprep.mubr.bf16.mxu1 %v13141_v40  ;;  %v12360_v12 = vld [vmem:[#allocation4 + $0x80c] ss:$48 sps:$4 sm:$0xff]  }
 0x376   : > { %5962 = vmatpush1.bf16.msra.mxu1 %v12337_v8  ;;  %6201 = vmatprep.mubr.bf16.mxu0 %v13141_v40  ;;  %v12358_v40 = vld [vmem:[#allocation4 + $0x808] ss:$48 sps:$4 sm:$0xff]   ;;  %v12399_v8 = vld [vmem:[#allocation4 + $0xaa4] ss:$48 sps:$4 sm:$0xff]  }
 0x377   : > { %6174 = vmatpush1.bf16.msra.mxu0 %v12340_v9  ;;  %5963 = vmatprep.subr.bf16.mxu1 %v12345_v44  ;;  %v12402_v9 = vld [vmem:[#allocation4 + $0xaac] ss:$48 sps:$4 sm:$0xff]   ;;  %v12397_v44 = vld [vmem:[#allocation4 + $0xaa0] ss:$48 sps:$4 sm:$0xff]  }
 0x378   : > { %6175 = vmatprep.subr.bf16.mxu0 %v12348_v62  ;;  %v12400_v62 = vld [vmem:[#allocation4 + $0xaa8] ss:$48 sps:$4 sm:$0xff]  }
 0x37a   : > { %5964 = vmatpush1.bf16.msra.mxu1 %v12343_v24  ;;  %v12405_v24 = vld [vmem:[#allocation4 + $0xb04] ss:$48 sps:$4 sm:$0xff]  }
 0x37b   : > { %6176 = vmatpush1.bf16.msra.mxu0 %v12346_v10  ;;  %5965 = vmatprep.subr.bf16.mxu1 %v12351_v45  ;;  %v12408_v10 = vld [vmem:[#allocation4 + $0xb0c] ss:$48 sps:$4 sm:$0xff]   ;;  %v12403_v45 = vld [vmem:[#allocation4 + $0xb00] ss:$48 sps:$4 sm:$0xff]  }
 0x37c   : > { %6177 = vmatprep.subr.bf16.mxu0 %v12354_v11  ;;  %v12406_v11 = vld [vmem:[#allocation4 + $0xb08] ss:$48 sps:$4 sm:$0xff]  }
 0x37e   : > { %5966 = vmatpush1.bf16.msra.mxu1 %v12349_v13  ;;  %v12411_v13 = vld [vmem:[#allocation4 + $0xb64] ss:$48 sps:$4 sm:$0xff]  }
 0x37f   : > { %6178 = vmatpush1.bf16.msra.mxu0 %v12352_v14  ;;  %5967 = vmatprep.subr.bf16.mxu1 %v12357_v15  ;;  %v12414_v14 = vld [vmem:[#allocation4 + $0xb6c] ss:$48 sps:$4 sm:$0xff]   ;;  %v12409_v15 = vld [vmem:[#allocation4 + $0xb60] ss:$48 sps:$4 sm:$0xff]  }
 0x380   : > { %6179 = vmatprep.subr.bf16.mxu0 %v12360_v12  ;;  %v12412_v12 = vld [vmem:[#allocation4 + $0xb68] ss:$48 sps:$4 sm:$0xff]  }
 0x382   : > { %5968 = vmatpush1.bf16.msra.mxu1 %v12355_v43  ;;  %v12417_v43 = vld [vmem:[#allocation4 + $0xbc4] ss:$48 sps:$4 sm:$0xff]  }
 0x383   : > { %6180 = vmatpush1.bf16.msra.mxu0 %v12358_v40  ;;  %5969 = vmatprep.subr.bf16.mxu1 %v12363_v2  ;;  %v12420_v40 = vld [vmem:[#allocation4 + $0xbcc] ss:$48 sps:$4 sm:$0xff]   ;;  %v12415_v2 = vld [vmem:[#allocation4 + $0xbc0] ss:$48 sps:$4 sm:$0xff]  }
 0x384   : > { %6181 = vmatprep.subr.bf16.mxu0 %v12366_v63  ;;  %v12418_v63 = vld [vmem:[#allocation4 + $0xbc8] ss:$48 sps:$4 sm:$0xff]  }
 0x386   : > { %5970 = vmatpush1.bf16.msra.mxu1 %v12361_v16  ;;  %v12423_v16 = vld [vmem:[#allocation4 + $0xc24] ss:$48 sps:$4 sm:$0xff]  }
 0x387   : > { %6182 = vmatpush1.bf16.msra.mxu0 %v12364_v17  ;;  %5971 = vmatprep.subr.bf16.mxu1 %v12369_v18  ;;  %v12426_v17 = vld [vmem:[#allocation4 + $0xc2c] ss:$48 sps:$4 sm:$0xff]   ;;  %v12421_v18 = vld [vmem:[#allocation4 + $0xc20] ss:$48 sps:$4 sm:$0xff]  }
 0x388   : > { %6183 = vmatprep.subr.bf16.mxu0 %v12372_v1  ;;  %v12424_v1 = vld [vmem:[#allocation4 + $0xc28] ss:$48 sps:$4 sm:$0xff]  }
 0x38a   : > { %5972 = vmatpush1.bf16.msra.mxu1 %v12367_v20  ;;  %v12429_v20 = vld [vmem:[#allocation4 + $0xc84] ss:$48 sps:$4 sm:$0xff]  }
 0x38b   : > { %6184 = vmatpush1.bf16.msra.mxu0 %v12370_v6  ;;  %5973 = vmatprep.subr.bf16.mxu1 %v12375_v23  ;;  %v12432_v6 = vld [vmem:[#allocation4 + $0xc8c] ss:$48 sps:$4 sm:$0xff]   ;;  %v12427_v23 = vld [vmem:[#allocation4 + $0xc80] ss:$48 sps:$4 sm:$0xff]  }
 0x38c   : > { %6185 = vmatprep.subr.bf16.mxu0 %v12378_v5  ;;  %v12430_v5 = vld [vmem:[#allocation4 + $0xc88] ss:$48 sps:$4 sm:$0xff]  }
 0x38e   : > { %5974 = vmatpush1.bf16.msra.mxu1 %v12373_v50  ;;  %v12435_v50 = vld [vmem:[#allocation4 + $0xce4] ss:$48 sps:$4 sm:$0xff]  }
 0x38f   : > { %6186 = vmatpush1.bf16.msra.mxu0 %v12376_v30  ;;  %5975 = vmatprep.subr.bf16.mxu1 %v12381_v32  ;;  %v12438_v30 = vld [vmem:[#allocation4 + $0xcec] ss:$48 sps:$4 sm:$0xff]   ;;  %v12433_v32 = vld [vmem:[#allocation4 + $0xce0] ss:$48 sps:$4 sm:$0xff]  }
 0x390   : > { %6187 = vmatprep.subr.bf16.mxu0 %v12384_v33  ;;  %v12436_v33 = vld [vmem:[#allocation4 + $0xce8] ss:$48 sps:$4 sm:$0xff]  }
 0x392   : > { %5976 = vmatpush1.bf16.msra.mxu1 %v12379_v34  ;;  %v12441_v34 = vld [vmem:[#allocation4 + $0xd44] ss:$48 sps:$4 sm:$0xff]  }
 0x393   : > { %6188 = vmatpush1.bf16.msra.mxu0 %v12382_v36  ;;  %5977 = vmatprep.subr.bf16.mxu1 %v12387_v42  ;;  %v12442_v36 = vld [vmem:[#allocation4 + $0xd48] ss:$48 sps:$4 sm:$0xff]   ;;  %v12447_v42 = vld [vmem:[#allocation4 + $0xda4] ss:$48 sps:$4 sm:$0xff]  }
 0x394   : > { %6189 = vmatprep.subr.bf16.mxu0 %v12390_v35  ;;  %v12450_v35 = vld [vmem:[#allocation4 + $0xdac] ss:$48 sps:$4 sm:$0xff]  }
 0x396   : > { %5978 = vmatpush1.bf16.msra.mxu1 %v12385_v39  ;;  %v12445_v39 = vld [vmem:[#allocation4 + $0xda0] ss:$48 sps:$4 sm:$0xff]  }
 0x397   : > { %6190 = vmatpush1.bf16.msra.mxu0 %v12388_v57  ;;  %5979 = vmatprep.subr.bf16.mxu1 %v12393_v56  ;;  %v12448_v57 = vld [vmem:[#allocation4 + $0xda8] ss:$48 sps:$4 sm:$0xff]   ;;  %v12453_v56 = vld [vmem:[#allocation4 + $0xe04] ss:$48 sps:$4 sm:$0xff]  }
 0x398   : > { %6191 = vmatprep.subr.bf16.mxu0 %v12396_v61  ;;  %v12451_v61 = vld [vmem:[#allocation4 + $0xe00] ss:$48 sps:$4 sm:$0xff]  }
 0x39a   : > { %5980 = vmatpush1.bf16.msra.mxu1 %v12391_v3  ;;  %v12459_v3 = vld [vmem:[#allocation4 + $0xe64] ss:$48 sps:$4 sm:$0xff]  }
 0x39b   : > { %6192 = vmatpush1.bf16.msra.mxu0 %v12394_v4  ;;  %5981 = vmatprep.subr.bf16.mxu1 %v12399_v8  ;;  %v12462_v4 = vld [vmem:[#allocation4 + $0xe6c] ss:$48 sps:$4 sm:$0xff]   ;;  %v12457_v8 = vld [vmem:[#allocation4 + $0xe60] ss:$48 sps:$4 sm:$0xff]  }
 0x39c   : > { %6193 = vmatprep.subr.bf16.mxu0 %v12402_v9  ;;  %v12460_v9 = vld [vmem:[#allocation4 + $0xe68] ss:$48 sps:$4 sm:$0xff]  }
 0x39e   : > { %5982 = vmatpush1.bf16.msra.mxu1 %v12397_v44  ;;  %v12465_v44 = vld [vmem:[#allocation4 + $0xec4] ss:$48 sps:$4 sm:$0xff]  }
 0x39f   : > { %6194 = vmatpush1.bf16.msra.mxu0 %v12400_v62  ;;  %5983 = vmatprep.subr.bf16.mxu1 %v12405_v24  ;;  %v12468_v62 = vld [vmem:[#allocation4 + $0xecc] ss:$48 sps:$4 sm:$0xff]   ;;  %v12463_v24 = vld [vmem:[#allocation4 + $0xec0] ss:$48 sps:$4 sm:$0xff]  }
 0x3a0   : > { %6195 = vmatprep.subr.bf16.mxu0 %v12408_v10  ;;  %v12466_v10 = vld [vmem:[#allocation4 + $0xec8] ss:$48 sps:$4 sm:$0xff]  }
 0x3a2   : > { %5984 = vmatpush1.bf16.msra.mxu1 %v12403_v45  ;;  %v12471_v45 = vld [vmem:[#allocation4 + $0xf24] ss:$48 sps:$4 sm:$0xff]  }
 0x3a3   : > { %6196 = vmatpush1.bf16.msra.mxu0 %v12406_v11  ;;  %5985 = vmatprep.subr.bf16.mxu1 %v12411_v13  ;;  %v12474_v11 = vld [vmem:[#allocation4 + $0xf2c] ss:$48 sps:$4 sm:$0xff]   ;;  %v12469_v13 = vld [vmem:[#allocation4 + $0xf20] ss:$48 sps:$4 sm:$0xff]  }
 0x3a4   : > { %6197 = vmatprep.subr.bf16.mxu0 %v12414_v14  ;;  %v12472_v14 = vld [vmem:[#allocation4 + $0xf28] ss:$48 sps:$4 sm:$0xff]  }
 0x3a6   : > { %5986 = vmatpush1.bf16.msra.mxu1 %v12409_v15  ;;  %v12477_v15 = vld [vmem:[#allocation4 + $0xf84] ss:$48 sps:$4 sm:$0xff]  }
 0x3a7   : > { %6198 = vmatpush1.bf16.msra.mxu0 %v12412_v12  ;;  %5987 = vmatprep.subr.bf16.mxu1 %v12417_v43  ;;  %v12480_v12 = vld [vmem:[#allocation4 + $0xf8c] ss:$48 sps:$4 sm:$0xff]   ;;  %v12475_v43 = vld [vmem:[#allocation4 + $0xf80] ss:$48 sps:$4 sm:$0xff]  }
 0x3a8   : > { %6199 = vmatprep.subr.bf16.mxu0 %v12420_v40  ;;  %v12478_v40 = vld [vmem:[#allocation4 + $0xf88] ss:$48 sps:$4 sm:$0xff]  }
 0x3aa   : > { %5988 = vmatpush1.bf16.msra.mxu1 %v12415_v2  ;;  %v12483_v2 = vld [vmem:[#allocation4 + $0xfe4] ss:$48 sps:$4 sm:$0xff]  }
 0x3ab   : > { %6200 = vmatpush1.bf16.msra.mxu0 %v12418_v63  ;;  %6010 = vmatprep.subr.bf16.mxu1 %v12423_v16  ;;  %v12486_v63 = vld [vmem:[#allocation4 + $0xfec] ss:$48 sps:$4 sm:$0xff]   ;;  %v12481_v16 = vld [vmem:[#allocation4 + $0xfe0] ss:$48 sps:$4 sm:$0xff]  }
 0x3ac   : > { %6222 = vmatprep.subr.bf16.mxu0 %v12426_v17  ;;  %v12484_v17 = vld [vmem:[#allocation4 + $0xfe8] ss:$48 sps:$4 sm:$0xff]  }
 0x3ad   : > { %5990 = vmatmul.mubr.bf16.vlgmr.msra.gmra.mrb[40].mxu1 %v13143_v41 }
 0x3ae   : > { %6202 = vmatmul.mubr.bf16.vlgmr.msra.gmra.mrb[48].mxu0 %v13143_v41  ;;  %5999 = vmatprep.mubr.bf16.mxu1 %v13161_v25  ;;  %v12444_v41 = vld [vmem:[#allocation4 + $0xd4c] ss:$48 sps:$4 sm:$0xff]  }
 0x3af   : > { %6011 = vmatpush1.bf16.msra.mxu1 %v12421_v18  ;;  %6211 = vmatprep.mubr.bf16.mxu0 %v13161_v25  ;;  %v12439_v25 = vld [vmem:[#allocation4 + $0xd40] ss:$48 sps:$4 sm:$0xff]   ;;  %v12489_v18 = vld [vmem:[#allocation4 + $0x1044] ss:$48 sps:$4 sm:$0xff]  }
 0x3b0   : > { %6223 = vmatpush1.bf16.msra.mxu0 %v12424_v1  ;;  %6012 = vmatprep.subr.bf16.mxu1 %v12429_v20  ;;  %v12492_v1 = vld [vmem:[#allocation4 + $0x104c] ss:$48 sps:$4 sm:$0xff]   ;;  %v12487_v20 = vld [vmem:[#allocation4 + $0x1040] ss:$48 sps:$4 sm:$0xff]  }
 0x3b1   : > { %6224 = vmatprep.subr.bf16.mxu0 %v12432_v6  ;;  %v12490_v6 = vld [vmem:[#allocation4 + $0x1048] ss:$48 sps:$4 sm:$0xff]  }
 0x3b3   : > { %6013 = vmatpush1.bf16.msra.mxu1 %v12427_v23  ;;  %v12495_v23 = vld [vmem:[#allocation4 + $0x10a4] ss:$48 sps:$4 sm:$0xff]  }
 0x3b4   : > { %6225 = vmatpush1.bf16.msra.mxu0 %v12430_v5  ;;  %6014 = vmatprep.subr.bf16.mxu1 %v12435_v50  ;;  %v12498_v5 = vld [vmem:[#allocation4 + $0x10ac] ss:$48 sps:$4 sm:$0xff]   ;;  %v12493_v50 = vld [vmem:[#allocation4 + $0x10a0] ss:$48 sps:$4 sm:$0xff]  }
 0x3b5   : > { %6000 = vmatmul.mubr.bf16.gmra.mrb[44].mxu1 %v13163_v26  ;;  %6226 = vmatprep.subr.bf16.mxu0 %v12438_v30  ;;  %v12496_v30 = vld [vmem:[#allocation4 + $0x10a8] ss:$48 sps:$4 sm:$0xff]  }
 0x3b6   : > { %6212 = vmatmul.mubr.bf16.gmra.mrb[52].mxu0 %v13163_v26  ;;  %6042 = vmatprep.mubr.bf16.mxu1 %v13177_v59  ;;  %v12456_v26 = vld [vmem:[#allocation4 + $0xe0c] ss:$48 sps:$4 sm:$0xff]  }
 0x3b7   : > { %6015 = vmatpush1.bf16.msra.mxu1 %v12433_v32  ;;  %6254 = vmatprep.mubr.bf16.mxu0 %v13177_v59  ;;  %v12454_v59 = vld [vmem:[#allocation4 + $0xe08] ss:$48 sps:$4 sm:$0xff]   ;;  %v12501_v32 = vld [vmem:[#allocation4 + $0x1104] ss:$48 sps:$4 sm:$0xff]  }
 0x3b8   : > { %6227 = vmatpush1.bf16.msra.mxu0 %v12436_v33  ;;  %6016 = vmatprep.subr.bf16.mxu1 %v12441_v34  ;;  %v12504_v33 = vld [vmem:[#allocation4 + $0x110c] ss:$48 sps:$4 sm:$0xff]   ;;  %v12499_v34 = vld [vmem:[#allocation4 + $0x1100] ss:$48 sps:$4 sm:$0xff]  }
 0x3b9   : > { %6228 = vmatprep.subr.bf16.mxu0 %v12444_v41  ;;  %v12502_v41 = vld [vmem:[#allocation4 + $0x1108] ss:$48 sps:$4 sm:$0xff]  }
 0x3bb   : > { %6017 = vmatpush1.bf16.msra.mxu1 %v12439_v25  ;;  %v12507_v25 = vld [vmem:[#allocation4 + $0x1164] ss:$48 sps:$4 sm:$0xff]  }
 0x3bc   : > { %6229 = vmatpush1.bf16.msra.mxu0 %v12442_v36  ;;  %6018 = vmatprep.subr.bf16.mxu1 %v12447_v42  ;;  %v12510_v36 = vld [vmem:[#allocation4 + $0x116c] ss:$48 sps:$4 sm:$0xff]   ;;  %v12505_v42 = vld [vmem:[#allocation4 + $0x1160] ss:$48 sps:$4 sm:$0xff]  }
 0x3bd   : > { %6230 = vmatprep.subr.bf16.mxu0 %v12450_v35  ;;  %v12508_v35 = vld [vmem:[#allocation4 + $0x1168] ss:$48 sps:$4 sm:$0xff]  }
 0x3bf   : > { %6019 = vmatpush1.bf16.msra.mxu1 %v12445_v39  ;;  %v12513_v39 = vld [vmem:[#allocation4 + $0x11c4] ss:$48 sps:$4 sm:$0xff]  }
 0x3c0   : > { %6231 = vmatpush1.bf16.msra.mxu0 %v12448_v57  ;;  %6020 = vmatprep.subr.bf16.mxu1 %v12453_v56  ;;  %v12516_v57 = vld [vmem:[#allocation4 + $0x11cc] ss:$48 sps:$4 sm:$0xff]   ;;  %v12511_v56 = vld [vmem:[#allocation4 + $0x11c0] ss:$48 sps:$4 sm:$0xff]  }
 0x3c1   : > { %6232 = vmatprep.subr.bf16.mxu0 %v12456_v26  ;;  %v12514_v26 = vld [vmem:[#allocation4 + $0x11c8] ss:$48 sps:$4 sm:$0xff]  }
 0x3c3   : > { %6021 = vmatpush1.bf16.msra.mxu1 %v12451_v61  ;;  %v12519_v61 = vld [vmem:[#allocation4 + $0x1224] ss:$48 sps:$4 sm:$0xff]  }
 0x3c4   : > { %6233 = vmatpush1.bf16.msra.mxu0 %v12454_v59  ;;  %6022 = vmatprep.subr.bf16.mxu1 %v12459_v3  ;;  %v12522_v59 = vld [vmem:[#allocation4 + $0x122c] ss:$48 sps:$4 sm:$0xff]   ;;  %v12517_v3 = vld [vmem:[#allocation4 + $0x1220] ss:$48 sps:$4 sm:$0xff]  }
 0x3c5   : > { %6234 = vmatprep.subr.bf16.mxu0 %v12462_v4  ;;  %v12520_v4 = vld [vmem:[#allocation4 + $0x1228] ss:$48 sps:$4 sm:$0xff]  }
 0x3c7   : > { %6023 = vmatpush1.bf16.msra.mxu1 %v12457_v8  ;;  %v12525_v8 = vld [vmem:[#allocation4 + $0x1284] ss:$48 sps:$4 sm:$0xff]  }
 0x3c8   : > { %6235 = vmatpush1.bf16.msra.mxu0 %v12460_v9  ;;  %6024 = vmatprep.subr.bf16.mxu1 %v12465_v44  ;;  %v12528_v9 = vld [vmem:[#allocation4 + $0x128c] ss:$48 sps:$4 sm:$0xff]   ;;  %v12523_v44 = vld [vmem:[#allocation4 + $0x1280] ss:$48 sps:$4 sm:$0xff]  }
 0x3c9   : > { %6236 = vmatprep.subr.bf16.mxu0 %v12468_v62  ;;  %v12526_v62 = vld [vmem:[#allocation4 + $0x1288] ss:$48 sps:$4 sm:$0xff]  }
 0x3cb   : > { %6025 = vmatpush1.bf16.msra.mxu1 %v12463_v24  ;;  %v12531_v24 = vld [vmem:[#allocation4 + $0x12e4] ss:$48 sps:$4 sm:$0xff]  }
 0x3cc   : > { %6237 = vmatpush1.bf16.msra.mxu0 %v12466_v10  ;;  %6026 = vmatprep.subr.bf16.mxu1 %v12471_v45  ;;  %v12534_v10 = vld [vmem:[#allocation4 + $0x12ec] ss:$48 sps:$4 sm:$0xff]   ;;  %v12529_v45 = vld [vmem:[#allocation4 + $0x12e0] ss:$48 sps:$4 sm:$0xff]  }
 0x3cd   : > { %6238 = vmatprep.subr.bf16.mxu0 %v12474_v11  ;;  %v12532_v11 = vld [vmem:[#allocation4 + $0x12e8] ss:$48 sps:$4 sm:$0xff]  }
 0x3cf   : > { %6027 = vmatpush1.bf16.msra.mxu1 %v12469_v13  ;;  %v12537_v13 = vld [vmem:[#allocation4 + $0x1344] ss:$48 sps:$4 sm:$0xff]  }
 0x3d0   : > { %6239 = vmatpush1.bf16.msra.mxu0 %v12472_v14  ;;  %6028 = vmatprep.subr.bf16.mxu1 %v12477_v15  ;;  %v12538_v14 = vld [vmem:[#allocation4 + $0x1348] ss:$48 sps:$4 sm:$0xff]   ;;  %v12543_v15 = vld [vmem:[#allocation4 + $0x13a4] ss:$48 sps:$4 sm:$0xff]  }
 0x3d1   : > { %6240 = vmatprep.subr.bf16.mxu0 %v12480_v12  ;;  %v12546_v12 = vld [vmem:[#allocation4 + $0x13ac] ss:$48 sps:$4 sm:$0xff]  }
 0x3d3   : > { %6029 = vmatpush1.bf16.msra.mxu1 %v12475_v43  ;;  %v12541_v43 = vld [vmem:[#allocation4 + $0x13a0] ss:$48 sps:$4 sm:$0xff]  }
 0x3d4   : > { %6241 = vmatpush1.bf16.msra.mxu0 %v12478_v40  ;;  %6030 = vmatprep.subr.bf16.mxu1 %v12483_v2  ;;  %v12544_v40 = vld [vmem:[#allocation4 + $0x13a8] ss:$48 sps:$4 sm:$0xff]   ;;  %v12549_v2 = vld [vmem:[#allocation4 + $0x1404] ss:$48 sps:$4 sm:$0xff]  }
 0x3d5   : > { %6242 = vmatprep.subr.bf16.mxu0 %v12486_v63 }
 0x3d7   : > { %6031 = vmatpush1.bf16.msra.mxu1 %v12481_v16 }
 0x3d8   : > { %6243 = vmatpush1.bf16.msra.mxu0 %v12484_v17  ;;  %6032 = vmatprep.subr.bf16.mxu1 %v12489_v18  ;;  %v12547_v18 = vld [vmem:[#allocation4 + $0x1400] ss:$48 sps:$4 sm:$0xff]  }
 0x3d9   : > { %6244 = vmatprep.subr.bf16.mxu0 %v12492_v1 }
 0x3db   : > { %6033 = vmatpush1.bf16.msra.mxu1 %v12487_v20 }
 0x3dc   : > { %6245 = vmatpush1.bf16.msra.mxu0 %v12490_v6  ;;  %6034 = vmatprep.subr.bf16.mxu1 %v12495_v23  ;;  %v12550_v6 = vld [vmem:[#allocation4 + $0x1408] ss:$48 sps:$4 sm:$0xff]  }
 0x3dd   : > { %6246 = vmatprep.subr.bf16.mxu0 %v12498_v5  ;;  %v12555_v5 = vld [vmem:[#allocation4 + $0x1464] ss:$48 sps:$4 sm:$0xff]  }
 0x3df   : > { %6035 = vmatpush1.bf16.msra.mxu1 %v12493_v50 }
 0x3e0   : > { %6247 = vmatpush1.bf16.msra.mxu0 %v12496_v30  ;;  %6036 = vmatprep.subr.bf16.mxu1 %v12501_v32 }
 0x3e1   : > { %6248 = vmatprep.subr.bf16.mxu0 %v12504_v33  ;;  %v12558_v33 = vld [vmem:[#allocation4 + $0x146c] ss:$48 sps:$4 sm:$0xff]  }
 0x3e3   : > { %6037 = vmatpush1.bf16.msra.mxu1 %v12499_v34 }
 0x3e4   : > { %6249 = vmatpush1.bf16.msra.mxu0 %v12502_v41  ;;  %6038 = vmatprep.subr.bf16.mxu1 %v12507_v25 }
 0x3e5   : > { %6250 = vmatprep.subr.bf16.mxu0 %v12510_v36 }
 0x3e7   : > { %6039 = vmatpush1.bf16.msra.mxu1 %v12505_v42 }
 0x3e8   : > { %6251 = vmatpush1.bf16.msra.mxu0 %v12508_v35  ;;  %6040 = vmatprep.subr.bf16.mxu1 %v12513_v39  ;;  %v12556_v35 = vld [vmem:[#allocation4 + $0x1468] ss:$48 sps:$4 sm:$0xff]   ;;  %v12561_v39 = vld [vmem:[#allocation4 + $0x14c4] ss:$48 sps:$4 sm:$0xff]  }
 0x3e9   : > { %6252 = vmatprep.subr.bf16.mxu0 %v12516_v57 }
 0x3eb   : > { %6041 = vmatpush1.bf16.msra.mxu1 %v12511_v56  ;;  %v12564_v56 = vld [vmem:[#allocation4 + $0x14cc] ss:$48 sps:$4 sm:$0xff]  }
 0x3ec   : > { %6253 = vmatpush1.bf16.msra.mxu0 %v12514_v26  ;;  %6063 = vmatprep.subr.bf16.mxu1 %v12519_v61  ;;  %v6388_v26 = vld [vmem:[#allocation6] sm:$0xff] }
 0x3ed   : > { %6275 = vmatprep.subr.bf16.mxu0 %v12522_v59  ;;  %v6392_v61 = vld [vmem:[#allocation6 + $0x20] sm:$0xff] }
 0x3ee   : > { %6043 = vmatmul.mubr.bf16.vlgmr.msra.gmra.mrb[40].mxu1 %v13145_v53 }
 0x3ef   : > { %6255 = vmatmul.mubr.bf16.vlgmr.msra.gmra.mrb[48].mxu0 %v13145_v53  ;;  %6052 = vmatprep.mubr.bf16.mxu1 %v13185_v19  ;;  %v12540_v53 = vld [vmem:[#allocation4 + $0x134c] ss:$48 sps:$4 sm:$0xff]  }
 0x3f0   : > { %6064 = vmatpush1.bf16.msra.mxu1 %v12517_v3  ;;  %6264 = vmatprep.mubr.bf16.mxu0 %v13185_v19  ;;  %v12535_v19 = vld [vmem:[#allocation4 + $0x1340] ss:$48 sps:$4 sm:$0xff]   ;;  %v6389_v3 = vld [vmem:[#allocation6 + $0x8] sm:$0xff] }
 0x3f1   : > { %6276 = vmatpush1.bf16.msra.mxu0 %v12520_v4  ;;  %6065 = vmatprep.subr.bf16.mxu1 %v12525_v8  ;;  %v6393_v4 = vld [vmem:[#allocation6 + $0x28] sm:$0xff] }
 0x3f2   : > { %6277 = vmatprep.subr.bf16.mxu0 %v12528_v9 }
 0x3f4   : > { %6066 = vmatpush1.bf16.msra.mxu1 %v12523_v44  ;;  %v12559_v44 = vld [vmem:[#allocation4 + $0x14c0] ss:$48 sps:$4 sm:$0xff]  }
 0x3f5   : > { %6278 = vmatpush1.bf16.msra.mxu0 %v12526_v62  ;;  %6067 = vmatprep.subr.bf16.mxu1 %v12531_v24 }
 0x3f6   : > { %6053 = vmatmul.mubr.bf16.gmra.mrb[44].mxu1 %v13165_v27  ;;  %6279 = vmatprep.subr.bf16.mxu0 %v12534_v10  ;;  %v12562_v10 = vld [vmem:[#allocation4 + $0x14c8] ss:$48 sps:$4 sm:$0xff]  }
 0x3f7   : > { %6265 = vmatmul.mubr.bf16.gmra.mrb[52].mxu0 %v13165_v27  ;;  %6095 = vmatprep.mubr.bf16.mxu1 %v12823_v0  ;;  %v12552_v27 = vld [vmem:[#allocation4 + $0x140c] ss:$48 sps:$4 sm:$0xff]  }
 0x3f8   : > { %6068 = vmatpush1.bf16.msra.mxu1 %v12529_v45  ;;  %6307 = vmatprep.mubr.bf16.mxu0 %v12823_v0 }
 0x3f9   : > { %6280 = vmatpush1.bf16.msra.mxu0 %v12532_v11  ;;  %6069 = vmatprep.subr.bf16.mxu1 %v12537_v13  ;;  %v10728_v11 = vcombine.high %v6388_v26, %v6392_v61 }
 0x3fa   : > { %6281 = vmatprep.subr.bf16.mxu0 %v12540_v53 }
 0x3fc   : > { %6070 = vmatpush1.bf16.msra.mxu1 %v12535_v19 }
 0x3fd   : > { %6282 = vmatpush1.bf16.msra.mxu0 %v12538_v14  ;;  %6071 = vmatprep.subr.bf16.mxu1 %v12543_v15  ;;  %v10730_v14 = vcombine.high %v6389_v3, %v6393_v4  ;;  %v6396_v15 = vld [vmem:[#allocation6 + $0x40] sm:$0xff] }
 0x3fe   : > { %6283 = vmatprep.subr.bf16.mxu0 %v12546_v12  ;;  %v6400_v12 = vld [vmem:[#allocation6 + $0x60] sm:$0xff] }
 0x3ff   : > { %v13301_v63 = vpop.f32.mrb[32].mxu1 }
 0x400   : > { %6072 = vmatpush1.bf16.msra.mxu1 %v12541_v43  ;;  %v5885_v16 = vpop.f32.mrb[40].mxu0  ;;  %v13303_v17 = vpop.f32.mrb[33].mxu1 }
 0x401   : > { %6284 = vmatpush1.bf16.msra.mxu0 %v12544_v40  ;;  %v6328_v1 = vmax.f32 %v13237_v21, %v5885_v16  ;;  %v5887_v20 = vpop.f32.mrb[41].mxu0  ;;  %6073 = vmatprep.subr.bf16.mxu1 %v12549_v2  ;;  %v13306_v23 = vpop.f32.mrb[34].mxu1  ;;  %v12553_v21 = vld [vmem:[#allocation4 + $0x1460] ss:$48 sps:$4 sm:$0xff]   ;;  %v6397_v2 = vld [vmem:[#allocation6 + $0x48] sm:$0xff]  ;;  %v10727_v16 = vcombine.low %v6388_v26, %v6392_v61 }
 0x402   : > { %v6329_v50 = vmax.f32 %v13241_v22, %v5887_v20  ;;  %6285 = vmatprep.subr.bf16.mxu0 %v12552_v27  ;;  %v5889_v30 = vpop.f32.mrb[42].mxu0  ;;  %v13309_v32 = vpop.f32.mrb[35].mxu1  ;;  %v10736_v20 = vcombine.high %v6396_v15, %v6400_v12  ;;  %v6420_v61 = vld [vmem:[#allocation6 + $0x100] sm:$0xff] }
 0x403   : > { %v6334_v34 = vmax.f32 %v13245_v47, %v5889_v30  ;;  %v5891_v41 = vpop.f32.mrb[43].mxu0  ;;  %v6352_v36 = vmax.f32 %v6328_v1, 0.0  ;;  %v6404_v30 = vld [vmem:[#allocation6 + $0x80] sm:$0xff] }
 0x404   : > { %6074 = vmatpush1.bf16.msra.mxu1 %v12547_v18  ;;  %v6335_v25 = vmax.f32 %v13249_v29, %v5891_v41  ;;  %v6353_v57 = vmax.f32 %v6329_v50, 0.0  ;;  %v6409_v41 = vld [vmem:[#allocation6 + $0xa8] sm:$0xff] }
 0x405   : > { %v6358_v42 = vmax.f32 %v6334_v34, 0.0  ;;  %6286 = vmatpush1.bf16.msra.mxu0 %v12550_v6  ;;  %6075 = vmatprep.subr.bf16.mxu1 %v12555_v5  ;;  %v6405_v34 = vld [vmem:[#allocation6 + $0x88] sm:$0xff] }
 0x406   : > { %v6359_v22 = vmax.f32 %v6335_v25, 0.0  ;;  %6287 = vmatprep.subr.bf16.mxu0 %v12558_v33  ;;  %v6408_v33 = vld [vmem:[#allocation6 + $0xa0] sm:$0xff]  ;;  %v10735_v25 = vcombine.low %v6396_v15, %v6400_v12 }
 0x407   : > { %v13313_v59 = vpack.c.bf16 %v6358_v42, %v6352_v36  ;;  %v13315_v47 = vpop.f32.mrb[36].mxu1  ;;  %v10744_v36 = vcombine.high %v6404_v30, %v6408_v33  ;;  %v10746_v42 = vcombine.high %v6405_v34, %v6409_v41 }
 0x408   : > { %v13317_v29 = vpack.c.bf16 %v6359_v22, %v6353_v57  ;;  %6076 = vmatpush1.bf16.msra.mxu1 %v12553_v21  ;;  %v5895_v8 = vpop.f32.mrb[44].mxu0  ;;  %v13319_v9 = vpop.f32.mrb[37].mxu1  ;;  %v10743_v57 = vcombine.low %v6404_v30, %v6408_v33  ;;  %v6413_v22 = vld [vmem:[#allocation6 + $0xc8] sm:$0xff] }
 0x409   : > { %6288 = vmatpush1.bf16.msra.mxu0 %v12556_v35  ;;  %v6340_v62 = vmax.f32 %v13253_v37, %v5895_v8  ;;  %v5897_v24 = vpop.f32.mrb[45].mxu0  ;;  %6077 = vmatprep.subr.bf16.mxu1 %v12561_v39  ;;  %v13322_v45 = vpop.f32.mrb[38].mxu1  ;;  %v6401_v37 = vld [vmem:[#allocation6 + $0x68] sm:$0xff]  ;;  %v6412_v35 = vld [vmem:[#allocation6 + $0xc0] sm:$0xff] }
 0x40a   : > { %v6341_v13 = vmax.f32 %v13257_v38, %v5897_v24  ;;  %6289 = vmatprep.subr.bf16.mxu0 %v12564_v56  ;;  %v5899_v53 = vpop.f32.mrb[46].mxu0  ;;  %v13325_v19 = vpop.f32.mrb[39].mxu1  ;;  %v10729_v38 = vcombine.low %v6389_v3, %v6393_v4  ;;  %v10738_v50 = vcombine.high %v6397_v2, %v6401_v37  ;;  %v10737_v21 = vcombine.low %v6397_v2, %v6401_v37  ;;  %v6416_v39 = vld [vmem:[#allocation6 + $0xe0] sm:$0xff]  ;;  %v6417_v56 = vld [vmem:[#allocation6 + $0xe8] sm:$0xff] }
 0x40b   : > { %v6346_v43 = vmax.f32 %v13261_v46, %v5899_v53  ;;  %v5901_v40 = vpop.f32.mrb[47].mxu0  ;;  %v6364_v18 = vmax.f32 %v6340_v62, 0.0  ;;  %v10752_v26 = vcombine.high %v6412_v35, %v6416_v39  ;;  %v6424_v3 = vld [vmem:[#allocation6 + $0x120] sm:$0xff]  ;;  %v10754_v4 = vcombine.high %v6413_v22, %v6417_v56  ;;  %v6421_v8 = vld [vmem:[#allocation6 + $0x108] sm:$0xff] }
 0x40c   : > { %6078 = vmatpush1.bf16.msra.mxu1 %v12559_v44  ;;  %v6347_v27 = vmax.f32 %v13265_v55, %v5901_v40  ;;  %v6365_v6 = vmax.f32 %v6341_v13, 0.0  ;;  %v6425_v44 = vld [vmem:[#allocation6 + $0x128] sm:$0xff]  ;;  %v10753_v62 = vcombine.low %v6413_v22, %v6417_v56  ;;  %v10760_v24 = vcombine.high %v6420_v61, %v6424_v3  ;;  %v6432_v13 = vld [vmem:[#allocation6 + $0x160] sm:$0xff] }
 0x40d   : > { %v6370_v1 = vmax.f32 %v6346_v43, 0.0  ;;  %6290 = vmatpush1.bf16.msra.mxu0 %v12562_v10  ;;  %8692 = vmatprep.subr.bf16.mxu1 %v10728_v11  ;;  %v10762_v10 = vcombine.high %v6421_v8, %v6425_v44  ;;  %v6428_v11 = vld [vmem:[#allocation6 + $0x140] sm:$0xff]  ;;  %v6429_v53 = vld [vmem:[#allocation6 + $0x148] sm:$0xff]  ;;  %v10759_v15 = vcombine.low %v6420_v61, %v6424_v3 }
 0x40e   : > { %v6371_v5 = vmax.f32 %v6347_v27, 0.0  ;;  %8851 = vmatprep.subr.bf16.mxu0 %v10730_v14  ;;  %v6433_v14 = vld [vmem:[#allocation6 + $0x168] sm:$0xff]  ;;  %v10768_v12 = vcombine.high %v6428_v11, %v6432_v13  ;;  %v6436_v40 = vld [vmem:[#allocation6 + $0x180] sm:$0xff] }
 0x40f   : > { %v13329_v46 = vpack.c.bf16 %v6370_v1, %v6364_v18  ;;  %6096 = vmatmul.mubr.bf16.vlgmr.msra.gmra.mrb[40].mxu1 %v13179_v60  ;;  %v10770_v43 = vcombine.high %v6429_v53, %v6433_v14  ;;  %v6440_v2 = vld [vmem:[#allocation6 + $0x1a0] sm:$0xff]  ;;  %v6437_v37 = vld [vmem:[#allocation6 + $0x188] sm:$0xff]  ;;  %v10769_v18 = vcombine.low %v6429_v53, %v6433_v14 }
 0x410   : > { %v13332_v55 = vpack.c.bf16 %v6371_v5, %v6365_v6  ;;  %6308 = vmatmul.mubr.bf16.vlgmr.msra.gmra.mrb[48].mxu0 %v13179_v60  ;;  %8693 = vmatpush1.bf16.msra.mxu1 %v10727_v16  ;;  %v10745_v60 = vcombine.low %v6405_v34, %v6409_v41  ;;  %v6441_v27 = vld [vmem:[#allocation6 + $0x1a8] sm:$0xff]  ;;  %v10767_v16 = vcombine.low %v6428_v11, %v6432_v13  ;;  %v6448_v6 = vld [vmem:[#allocation6 + $0x1e0] sm:$0xff] }
 0x411   : > { %8852 = vmatpush1.bf16.msra.mxu0 %v10729_v38  ;;  %8694 = vmatprep.subr.bf16.mxu1 %v10736_v20  ;;  %v10776_v1 = vcombine.high %v6436_v40, %v6440_v2  ;;  %v10778_v38 = vcombine.high %v6437_v37, %v6441_v27  ;;  %v6444_v20 = vld [vmem:[#allocation6 + $0x1c0] sm:$0xff]  ;;  %v6445_v5 = vld [vmem:[#allocation6 + $0x1c8] sm:$0xff]  ;;  %v10775_v30 = vcombine.low %v6436_v40, %v6440_v2 }
 0x412   : > { %8853 = vmatprep.subr.bf16.mxu0 %v10738_v50  ;;  %6105 = vmatprep.mubr.bf16.mxu1 %v12823_v0  ;;  %v6449_v50 = vld [vmem:[#allocation6 + $0x1e8] sm:$0xff]  ;;  %v10777_v33 = vcombine.low %v6437_v37, %v6441_v27  ;;  %v10784_v34 = vcombine.high %v6444_v20, %v6448_v6  ;;  %v6460_v56 = vld [vmem:[#allocation6 + $0x240] sm:$0xff] }
 0x413   : > { %6317 = vmatprep.mubr.bf16.mxu0 %v12823_v0  ;;  %v10751_v0 = vcombine.low %v6412_v35, %v6416_v39  ;;  %v10786_v41 = vcombine.high %v6445_v5, %v6449_v50  ;;  %v10783_v35 = vcombine.low %v6444_v20, %v6448_v6  ;;  %v10785_v39 = vcombine.low %v6445_v5, %v6449_v50  ;;  %v6465_v61 = vld [vmem:[#allocation6 + $0x268] sm:$0xff] }
 0x414   : > { %8695 = vmatpush1.bf16.msra.mxu1 %v10735_v25  ;;  %v6452_v25 = vld [vmem:[#allocation6 + $0x200] sm:$0xff] }
 0x415   : > { %8854 = vmatpush1.bf16.msra.mxu0 %v10737_v21  ;;  %8696 = vmatprep.subr.bf16.mxu1 %v10744_v36  ;;  %v6456_v21 = vld [vmem:[#allocation6 + $0x220] sm:$0xff]  ;;  %v6453_v36 = vld [vmem:[#allocation6 + $0x208] sm:$0xff] }
 0x416   : > { %8855 = vmatprep.subr.bf16.mxu0 %v10746_v42  ;;  %v6457_v42 = vld [vmem:[#allocation6 + $0x228] sm:$0xff]  ;;  %v10791_v3 = vcombine.low %v6452_v25, %v6456_v21 }
 0x417   : > { %6106 = vmatmul.mubr.bf16.gmra.mrb[44].mxu1 %v13187_v7  ;;  %v10794_v22 = vcombine.high %v6453_v36, %v6457_v42 }
 0x418   : > { %6318 = vmatmul.mubr.bf16.gmra.mrb[52].mxu0 %v13187_v7  ;;  %8697 = vmatpush1.bf16.msra.mxu1 %v10743_v57  ;;  %v10761_v7 = vcombine.low %v6421_v8, %v6425_v44  ;;  %v10792_v57 = vcombine.high %v6452_v25, %v6456_v21 }
 0x419   : > { %8724 = vmatprep.mubr.bf16.mxu1 %v13317_v29  ;;  %8856 = vmatpush1.bf16.msra.mxu0 %v10745_v60  ;;  %v6464_v60 = vld [vmem:[#allocation6 + $0x260] sm:$0xff] }
 0x41a   : > { %8883 = vmatprep.mubr.bf16.mxu0 %v13317_v29  ;;  %8698 = vmatprep.subr.bf16.mxu1 %v10752_v26  ;;  %v6461_v26 = vld [vmem:[#allocation6 + $0x248] sm:$0xff]  ;;  %v10800_v8 = vcombine.high %v6460_v56, %v6464_v60  ;;  %v10799_v11 = vcombine.low %v6460_v56, %v6464_v60 }
 0x41b   : > { %8857 = vmatprep.subr.bf16.mxu0 %v10754_v4  ;;  %v10793_v4 = vcombine.low %v6453_v36, %v6457_v42  ;;  %v10802_v44 = vcombine.high %v6461_v26, %v6465_v61  ;;  %v10801_v13 = vcombine.low %v6461_v26, %v6465_v61 }
 0x41c   : > { %8699 = vmatpush1.bf16.msra.mxu1 %v10751_v0  ;;  %v6468_v0 = vld [vmem:[#allocation6 + $0x280] sm:$0xff] }
 0x41d   : > { %8858 = vmatpush1.bf16.msra.mxu0 %v10753_v62  ;;  %8700 = vmatprep.subr.bf16.mxu1 %v10760_v24  ;;  %v6472_v62 = vld [vmem:[#allocation6 + $0x2a0] sm:$0xff]  ;;  %v6469_v24 = vld [vmem:[#allocation6 + $0x288] sm:$0xff] }
 0x41e   : > { %8859 = vmatprep.subr.bf16.mxu0 %v10762_v10  ;;  %v6473_v10 = vld [vmem:[#allocation6 + $0x2a8] sm:$0xff]  ;;  %v10808_v53 = vcombine.high %v6468_v0, %v6472_v62  ;;  %v10807_v40 = vcombine.low %v6468_v0, %v6472_v62 }
 0x41f   : > { %v10810_v14 = vcombine.high %v6469_v24, %v6473_v10  ;;  %v10809_v2 = vcombine.low %v6469_v24, %v6473_v10 }
 0x420   : > { %8701 = vmatpush1.bf16.msra.mxu1 %v10759_v15  ;;  %v6476_v15 = vld [vmem:[#allocation6 + $0x2c0] sm:$0xff] }
 0x421   : > { %8860 = vmatpush1.bf16.msra.mxu0 %v10761_v7  ;;  %8702 = vmatprep.subr.bf16.mxu1 %v10768_v12  ;;  %v6480_v7 = vld [vmem:[#allocation6 + $0x2e0] sm:$0xff]  ;;  %v6477_v12 = vld [vmem:[#allocation6 + $0x2c8] sm:$0xff] }
 0x422   : > { %8861 = vmatprep.subr.bf16.mxu0 %v10770_v43  ;;  %v6481_v43 = vld [vmem:[#allocation6 + $0x2e8] sm:$0xff]  ;;  %v10816_v37 = vcombine.high %v6476_v15, %v6480_v7  ;;  %v10815_v20 = vcombine.low %v6476_v15, %v6480_v7 }
 0x423   : > { %v10818_v27 = vcombine.high %v6477_v12, %v6481_v43  ;;  %v10817_v6 = vcombine.low %v6477_v12, %v6481_v43 }
 0x424   : > { %8703 = vmatpush1.bf16.msra.mxu1 %v10767_v16  ;;  %v6484_v16 = vld [vmem:[#allocation6 + $0x300] sm:$0xff] }
 0x425   : > { %8862 = vmatpush1.bf16.msra.mxu0 %v10769_v18  ;;  %8704 = vmatprep.subr.bf16.mxu1 %v10776_v1  ;;  %v6488_v18 = vld [vmem:[#allocation6 + $0x320] sm:$0xff]  ;;  %v6485_v1 = vld [vmem:[#allocation6 + $0x308] sm:$0xff] }
 0x426   : > { %8863 = vmatprep.subr.bf16.mxu0 %v10778_v38  ;;  %v6489_v38 = vld [vmem:[#allocation6 + $0x328] sm:$0xff]  ;;  %v10824_v5 = vcombine.high %v6484_v16, %v6488_v18  ;;  %v10823_v25 = vcombine.low %v6484_v16, %v6488_v18 }
 0x427   : > { %v10826_v50 = vcombine.high %v6485_v1, %v6489_v38  ;;  %v10825_v21 = vcombine.low %v6485_v1, %v6489_v38 }
 0x428   : > { %8705 = vmatpush1.bf16.msra.mxu1 %v10775_v30  ;;  %v6492_v30 = vld [vmem:[#allocation6 + $0x340] sm:$0xff] }
 0x429   : > { %8864 = vmatpush1.bf16.msra.mxu0 %v10777_v33  ;;  %8706 = vmatprep.subr.bf16.mxu1 %v10784_v34  ;;  %v6496_v33 = vld [vmem:[#allocation6 + $0x360] sm:$0xff]  ;;  %v6493_v34 = vld [vmem:[#allocation6 + $0x348] sm:$0xff] }
 0x42a   : > { %8865 = vmatprep.subr.bf16.mxu0 %v10786_v41  ;;  %v6497_v41 = vld [vmem:[#allocation6 + $0x368] sm:$0xff]  ;;  %v10832_v36 = vcombine.high %v6492_v30, %v6496_v33  ;;  %v10831_v56 = vcombine.low %v6492_v30, %v6496_v33 }
 0x42b   : > { %v10834_v42 = vcombine.high %v6493_v34, %v6497_v41  ;;  %v10833_v60 = vcombine.low %v6493_v34, %v6497_v41 }
 0x42c   : > { %8707 = vmatpush1.bf16.msra.mxu1 %v10783_v35  ;;  %v6500_v35 = vld [vmem:[#allocation6 + $0x380] sm:$0xff] }
 0x42d   : > { %8866 = vmatpush1.bf16.msra.mxu0 %v10785_v39  ;;  %8708 = vmatprep.subr.bf16.mxu1 %v10792_v57  ;;  %v6504_v39 = vld [vmem:[#allocation6 + $0x3a0] sm:$0xff]  ;;  %v6501_v57 = vld [vmem:[#allocation6 + $0x388] sm:$0xff] }
 0x42e   : > { %8867 = vmatprep.subr.bf16.mxu0 %v10794_v22  ;;  %v6505_v22 = vld [vmem:[#allocation6 + $0x3a8] sm:$0xff]  ;;  %v10840_v26 = vcombine.high %v6500_v35, %v6504_v39  ;;  %v10839_v0 = vcombine.low %v6500_v35, %v6504_v39 }
 0x42f   : > { %v10842_v61 = vcombine.high %v6501_v57, %v6505_v22  ;;  %v10841_v62 = vcombine.low %v6501_v57, %v6505_v22 }
 0x430   : > { %8709 = vmatpush1.bf16.msra.mxu1 %v10791_v3  ;;  %v6508_v3 = vld [vmem:[#allocation6 + $0x3c0] sm:$0xff] }
 0x431   : > { %8868 = vmatpush1.bf16.msra.mxu0 %v10793_v4  ;;  %8710 = vmatprep.subr.bf16.mxu1 %v10800_v8  ;;  %v6512_v4 = vld [vmem:[#allocation6 + $0x3e0] sm:$0xff]  ;;  %v6509_v8 = vld [vmem:[#allocation6 + $0x3c8] sm:$0xff] }
 0x432   : > { %8869 = vmatprep.subr.bf16.mxu0 %v10802_v44  ;;  %v6513_v44 = vld [vmem:[#allocation6 + $0x3e8] sm:$0xff]  ;;  %v10848_v24 = vcombine.high %v6508_v3, %v6512_v4  ;;  %v10847_v15 = vcombine.low %v6508_v3, %v6512_v4 }
 0x433   : > { %v10850_v10 = vcombine.high %v6509_v8, %v6513_v44  ;;  %v10849_v7 = vcombine.low %v6509_v8, %v6513_v44 }
 0x434   : > { %8711 = vmatpush1.bf16.msra.mxu1 %v10799_v11  ;;  %v6516_v11 = vld [vmem:[#allocation6 + $0x400] sm:$0xff] }
 0x435   : > { %8870 = vmatpush1.bf16.msra.mxu0 %v10801_v13  ;;  %8712 = vmatprep.subr.bf16.mxu1 %v10808_v53  ;;  %v6520_v13 = vld [vmem:[#allocation6 + $0x420] sm:$0xff]  ;;  %v6517_v53 = vld [vmem:[#allocation6 + $0x408] sm:$0xff] }
 0x436   : > { %8871 = vmatprep.subr.bf16.mxu0 %v10810_v14  ;;  %v6521_v14 = vld [vmem:[#allocation6 + $0x428] sm:$0xff]  ;;  %v10856_v12 = vcombine.high %v6516_v11, %v6520_v13  ;;  %v10855_v16 = vcombine.low %v6516_v11, %v6520_v13 }
 0x437   : > { %v10858_v43 = vcombine.high %v6517_v53, %v6521_v14  ;;  %v10857_v18 = vcombine.low %v6517_v53, %v6521_v14 }
 0x438   : > { %8713 = vmatpush1.bf16.msra.mxu1 %v10807_v40  ;;  %v6524_v40 = vld [vmem:[#allocation6 + $0x440] sm:$0xff] }
 0x439   : > { %8872 = vmatpush1.bf16.msra.mxu0 %v10809_v2  ;;  %8714 = vmatprep.subr.bf16.mxu1 %v10816_v37  ;;  %v6528_v2 = vld [vmem:[#allocation6 + $0x460] sm:$0xff]  ;;  %v6525_v37 = vld [vmem:[#allocation6 + $0x448] sm:$0xff] }
 0x43a   : > { %8873 = vmatprep.subr.bf16.mxu0 %v10818_v27  ;;  %v6529_v27 = vld [vmem:[#allocation6 + $0x468] sm:$0xff]  ;;  %v10864_v1 = vcombine.high %v6524_v40, %v6528_v2  ;;  %v10863_v30 = vcombine.low %v6524_v40, %v6528_v2 }
 0x43b   : > { %v10866_v38 = vcombine.high %v6525_v37, %v6529_v27  ;;  %v10865_v33 = vcombine.low %v6525_v37, %v6529_v27 }
 0x43c   : > { %8715 = vmatpush1.bf16.msra.mxu1 %v10815_v20  ;;  %v6532_v20 = vld [vmem:[#allocation6 + $0x480] sm:$0xff] }
 0x43d   : > { %8874 = vmatpush1.bf16.msra.mxu0 %v10817_v6  ;;  %8716 = vmatprep.subr.bf16.mxu1 %v10824_v5  ;;  %v6536_v6 = vld [vmem:[#allocation6 + $0x4a0] sm:$0xff]  ;;  %v6533_v5 = vld [vmem:[#allocation6 + $0x488] sm:$0xff] }
 0x43e   : > { %8875 = vmatprep.subr.bf16.mxu0 %v10826_v50  ;;  %v6537_v50 = vld [vmem:[#allocation6 + $0x4a8] sm:$0xff]  ;;  %v10872_v34 = vcombine.high %v6532_v20, %v6536_v6  ;;  %v10871_v35 = vcombine.low %v6532_v20, %v6536_v6 }
 0x43f   : > { %v10874_v41 = vcombine.high %v6533_v5, %v6537_v50  ;;  %v10873_v39 = vcombine.low %v6533_v5, %v6537_v50 }
 0x440   : > { %8717 = vmatpush1.bf16.msra.mxu1 %v10823_v25  ;;  %v6540_v25 = vld [vmem:[#allocation6 + $0x4c0] sm:$0xff] }
 0x441   : > { %8876 = vmatpush1.bf16.msra.mxu0 %v10825_v21  ;;  %8718 = vmatprep.subr.bf16.mxu1 %v10832_v36  ;;  %v6544_v21 = vld [vmem:[#allocation6 + $0x4e0] sm:$0xff]  ;;  %v6541_v36 = vld [vmem:[#allocation6 + $0x4c8] sm:$0xff] }
 0x442   : > { %8877 = vmatprep.subr.bf16.mxu0 %v10834_v42  ;;  %v6545_v42 = vld [vmem:[#allocation6 + $0x4e8] sm:$0xff]  ;;  %v10880_v57 = vcombine.high %v6540_v25, %v6544_v21  ;;  %v10879_v3 = vcombine.low %v6540_v25, %v6544_v21 }
 0x443   : > { %v10882_v22 = vcombine.high %v6541_v36, %v6545_v42  ;;  %v10881_v4 = vcombine.low %v6541_v36, %v6545_v42  ;;  %v6588_v42 = vld [vmem:[#allocation6 + $0x640] sm:$0xff] }
 0x444   : > { %8719 = vmatpush1.bf16.msra.mxu1 %v10831_v56  ;;  %v6548_v56 = vld [vmem:[#allocation6 + $0x500] sm:$0xff] }
 0x445   : > { %8878 = vmatpush1.bf16.msra.mxu0 %v10833_v60  ;;  %8720 = vmatprep.subr.bf16.mxu1 %v10840_v26  ;;  %v6552_v60 = vld [vmem:[#allocation6 + $0x520] sm:$0xff]  ;;  %v6549_v26 = vld [vmem:[#allocation6 + $0x508] sm:$0xff] }
 0x446   : > { %8879 = vmatprep.subr.bf16.mxu0 %v10842_v61  ;;  %v6553_v61 = vld [vmem:[#allocation6 + $0x528] sm:$0xff]  ;;  %v10888_v8 = vcombine.high %v6548_v56, %v6552_v60  ;;  %v10887_v11 = vcombine.low %v6548_v56, %v6552_v60 }
 0x447   : > { %v10890_v44 = vcombine.high %v6549_v26, %v6553_v61  ;;  %v10889_v13 = vcombine.low %v6549_v26, %v6553_v61  ;;  %v13351_v56 = vld [vmem:[#allocation6 + $0x808] sm:$0xff] }
 0x448   : > { %8721 = vmatpush1.bf16.msra.mxu1 %v10839_v0  ;;  %v6556_v0 = vld [vmem:[#allocation6 + $0x540] sm:$0xff]  ;;  %v6589_v60 = vld [vmem:[#allocation6 + $0x648] sm:$0xff] }
 0x449   : > { %8880 = vmatpush1.bf16.msra.mxu0 %v10841_v62  ;;  %8722 = vmatprep.subr.bf16.mxu1 %v10848_v24  ;;  %v6560_v62 = vld [vmem:[#allocation6 + $0x560] sm:$0xff]  ;;  %v6557_v24 = vld [vmem:[#allocation6 + $0x548] sm:$0xff] }
 0x44a   : > { %8881 = vmatprep.subr.bf16.mxu0 %v10850_v10  ;;  %v6561_v10 = vld [vmem:[#allocation6 + $0x568] sm:$0xff]  ;;  %v10896_v53 = vcombine.high %v6556_v0, %v6560_v62  ;;  %v10895_v40 = vcombine.low %v6556_v0, %v6560_v62 }
 0x44b   : > { %v10898_v14 = vcombine.high %v6557_v24, %v6561_v10  ;;  %v10897_v2 = vcombine.low %v6557_v24, %v6561_v10  ;;  %v6593_v26 = vld [vmem:[#allocation6 + $0x668] sm:$0xff]  ;;  %v6596_v24 = vld [vmem:[#allocation6 + $0x680] sm:$0xff] }
 0x44c   : > { %8723 = vmatpush1.bf16.msra.mxu1 %v10847_v15  ;;  %v6564_v15 = vld [vmem:[#allocation6 + $0x580] sm:$0xff]  ;;  %v13353_v61 = vld [vmem:[#allocation6 + $0x828] sm:$0xff]  ;;  %v10930_v62 = vcombine.high %v6589_v60, %v6593_v26 }
 0x44d   : > { %8882 = vmatpush1.bf16.msra.mxu0 %v10849_v7  ;;  %8745 = vmatprep.subr.bf16.mxu1 %v10856_v12  ;;  %v6568_v7 = vld [vmem:[#allocation6 + $0x5a0] sm:$0xff]  ;;  %v6565_v12 = vld [vmem:[#allocation6 + $0x588] sm:$0xff] }
 0x44e   : > { %8904 = vmatprep.subr.bf16.mxu0 %v10858_v43  ;;  %v6569_v43 = vld [vmem:[#allocation6 + $0x5a8] sm:$0xff]  ;;  %v10904_v37 = vcombine.high %v6564_v15, %v6568_v7  ;;  %v10903_v20 = vcombine.low %v6564_v15, %v6568_v7  ;;  %v6600_v10 = vld [vmem:[#allocation6 + $0x6a0] sm:$0xff] }
 0x44f   : > { %8725 = vmatmul.mubr.bf16.vlgmr.msra.gmra.mrb[48].mxu1 %v13313_v59  ;;  %v10906_v27 = vcombine.high %v6565_v12, %v6569_v43  ;;  %v10905_v6 = vcombine.low %v6565_v12, %v6569_v43  ;;  %v10936_v15 = vcombine.high %v6596_v24, %v6600_v10  ;;  %v6604_v12 = vld [vmem:[#allocation6 + $0x6c0] sm:$0xff] }
 0x450   : > { %8884 = vmatmul.mubr.bf16.vlgmr.msra.gmra.mrb[56].mxu0 %v13313_v59  ;;  %8734 = vmatprep.mubr.bf16.mxu1 %v13332_v55  ;;  %v6608_v43 = vld [vmem:[#allocation6 + $0x6e0] sm:$0xff] }
 0x451   : > { %8893 = vmatprep.mubr.bf16.mxu0 %v13332_v55  ;;  %8746 = vmatpush1.bf16.msra.mxu1 %v10855_v16  ;;  %v6572_v16 = vld [vmem:[#allocation6 + $0x5c0] sm:$0xff] }
 0x452   : > { %8905 = vmatpush1.bf16.msra.mxu0 %v10857_v18  ;;  %8747 = vmatprep.subr.bf16.mxu1 %v10864_v1  ;;  %v6576_v18 = vld [vmem:[#allocation6 + $0x5e0] sm:$0xff]  ;;  %v6573_v1 = vld [vmem:[#allocation6 + $0x5c8] sm:$0xff] }
 0x453   : > { %8906 = vmatprep.subr.bf16.mxu0 %v10866_v38  ;;  %v6577_v38 = vld [vmem:[#allocation6 + $0x5e8] sm:$0xff]  ;;  %v10912_v5 = vcombine.high %v6572_v16, %v6576_v18  ;;  %v10911_v25 = vcombine.low %v6572_v16, %v6576_v18  ;;  %v10944_v16 = vcombine.high %v6604_v12, %v6608_v43 }
 0x454   : > { %v10914_v50 = vcombine.high %v6573_v1, %v6577_v38  ;;  %v10913_v21 = vcombine.low %v6573_v1, %v6577_v38  ;;  %v6612_v1 = vld [vmem:[#allocation6 + $0x700] sm:$0xff] }
 0x455   : > { %8748 = vmatpush1.bf16.msra.mxu1 %v10863_v30  ;;  %v6580_v30 = vld [vmem:[#allocation6 + $0x600] sm:$0xff] }
 0x456   : > { %8907 = vmatpush1.bf16.msra.mxu0 %v10865_v33  ;;  %8749 = vmatprep.subr.bf16.mxu1 %v10872_v34  ;;  %v6584_v33 = vld [vmem:[#allocation6 + $0x620] sm:$0xff]  ;;  %v6581_v34 = vld [vmem:[#allocation6 + $0x608] sm:$0xff] }
 0x457   : > { %8735 = vmatmul.mubr.bf16.gmra.mrb[52].mxu1 %v13329_v46  ;;  %8908 = vmatprep.subr.bf16.mxu0 %v10874_v41  ;;  %v6585_v41 = vld [vmem:[#allocation6 + $0x628] sm:$0xff]  ;;  %v10920_v36 = vcombine.high %v6580_v30, %v6584_v33  ;;  %v6616_v38 = vld [vmem:[#allocation6 + $0x720] sm:$0xff] }
 0x458   : > { %8894 = vmatmul.mubr.bf16.gmra.mrb[60].mxu0 %v13329_v46 }
 0x459   : > { %8750 = vmatpush1.bf16.msra.mxu1 %v10871_v35  ;;  %v6592_v35 = vld [vmem:[#allocation6 + $0x660] sm:$0xff] }
 0x45a   : > { %8909 = vmatpush1.bf16.msra.mxu0 %v10873_v39  ;;  %8751 = vmatprep.subr.bf16.mxu1 %v10880_v57  ;;  %v10922_v39 = vcombine.high %v6581_v34, %v6585_v41  ;;  %v13347_v57 = vld [vmem:[#allocation6 + $0x800] sm:$0xff]  ;;  %v10928_v0 = vcombine.high %v6588_v42, %v6592_v35 }
 0x45b   : > { %8910 = vmatprep.subr.bf16.mxu0 %v10882_v22  ;;  %v13349_v22 = vld [vmem:[#allocation6 + $0x820] sm:$0xff] }
 0x45d   : > { %8752 = vmatpush1.bf16.msra.mxu1 %v10879_v3  ;;  %v10919_v3 = vcombine.low %v6580_v30, %v6584_v33  ;;  %v10952_v30 = vcombine.high %v6612_v1, %v6616_v38 }
 0x45e   : > { %8911 = vmatpush1.bf16.msra.mxu0 %v10881_v4  ;;  %8753 = vmatprep.subr.bf16.mxu1 %v10888_v8  ;;  %v10983_v4 = vcombine.low %v13347_v57, %v13349_v22  ;;  %v10985_v8 = vcombine.low %v13351_v56, %v13353_v61 }
 0x45f   : > { %8912 = vmatprep.subr.bf16.mxu0 %v10890_v44  ;;  %v10921_v44 = vcombine.low %v6581_v34, %v6585_v41  ;;  %v6620_v34 = vld [vmem:[#allocation6 + $0x740] sm:$0xff] }
 0x460   : > { %v6624_v41 = vld [vmem:[#allocation6 + $0x760] sm:$0xff] }
 0x461   : > { %8754 = vmatpush1.bf16.msra.mxu1 %v10887_v11  ;;  %v6597_v11 = vld [vmem:[#allocation6 + $0x688] sm:$0xff] }
 0x462   : > { %8913 = vmatpush1.bf16.msra.mxu0 %v10889_v13  ;;  %8755 = vmatprep.subr.bf16.mxu1 %v10896_v53  ;;  %v6601_v13 = vld [vmem:[#allocation6 + $0x6a8] sm:$0xff]  ;;  %v10927_v53 = vcombine.low %v6588_v42, %v6592_v35  ;;  %v10960_v35 = vcombine.high %v6620_v34, %v6624_v41 }
 0x463   : > { %8914 = vmatprep.subr.bf16.mxu0 %v10898_v14  ;;  %v10929_v14 = vcombine.low %v6589_v60, %v6593_v26  ;;  %v10938_v7 = vcombine.high %v6597_v11, %v6601_v13  ;;  %v6628_v60 = vld [vmem:[#allocation6 + $0x780] sm:$0xff] }
 0x464   : > { %v6632_v26 = vld [vmem:[#allocation6 + $0x7a0] sm:$0xff] }
 0x465   : > { %8756 = vmatpush1.bf16.msra.mxu1 %v10895_v40  ;;  %v6605_v40 = vld [vmem:[#allocation6 + $0x6c8] sm:$0xff] }
 0x466   : > { %8915 = vmatpush1.bf16.msra.mxu0 %v10897_v2  ;;  %8757 = vmatprep.subr.bf16.mxu1 %v10904_v37  ;;  %v6609_v2 = vld [vmem:[#allocation6 + $0x6e8] sm:$0xff]  ;;  %v10935_v37 = vcombine.low %v6596_v24, %v6600_v10  ;;  %v10968_v24 = vcombine.high %v6628_v60, %v6632_v26 }
 0x467   : > { %8916 = vmatprep.subr.bf16.mxu0 %v10906_v27  ;;  %v10937_v27 = vcombine.low %v6597_v11, %v6601_v13  ;;  %v10946_v18 = vcombine.high %v6605_v40, %v6609_v2  ;;  %v6636_v11 = vld [vmem:[#allocation6 + $0x7c0] sm:$0xff] }
 0x468   : > { %v6640_v13 = vld [vmem:[#allocation6 + $0x7e0] sm:$0xff] }
 0x469   : > { %8758 = vmatpush1.bf16.msra.mxu1 %v10903_v20  ;;  %v6613_v20 = vld [vmem:[#allocation6 + $0x708] sm:$0xff] }
 0x46a   : > { %8917 = vmatpush1.bf16.msra.mxu0 %v10905_v6  ;;  %8759 = vmatprep.subr.bf16.mxu1 %v10912_v5  ;;  %v6617_v6 = vld [vmem:[#allocation6 + $0x728] sm:$0xff]  ;;  %v10943_v5 = vcombine.low %v6604_v12, %v6608_v43  ;;  %v10976_v12 = vcombine.high %v6636_v11, %v6640_v13 }
 0x46b   : > { %8918 = vmatprep.subr.bf16.mxu0 %v10914_v50  ;;  %v10945_v50 = vcombine.low %v6605_v40, %v6609_v2  ;;  %v10954_v33 = vcombine.high %v6613_v20, %v6617_v6  ;;  %v10953_v42 = vcombine.low %v6613_v20, %v6617_v6  ;;  %v10975_v40 = vcombine.low %v6636_v11, %v6640_v13 }
 0x46d   : > { %8760 = vmatpush1.bf16.msra.mxu1 %v10911_v25  ;;  %v6621_v25 = vld [vmem:[#allocation6 + $0x748] sm:$0xff] }
 0x46e   : > { %8919 = vmatpush1.bf16.msra.mxu0 %v10913_v21  ;;  %8761 = vmatprep.subr.bf16.mxu1 %v10920_v36  ;;  %v6625_v21 = vld [vmem:[#allocation6 + $0x768] sm:$0xff]  ;;  %v10951_v36 = vcombine.low %v6612_v1, %v6616_v38 }
 0x46f   : > { %8920 = vmatprep.subr.bf16.mxu0 %v10922_v39  ;;  %v10962_v39 = vcombine.high %v6621_v25, %v6625_v21 }
 0x471   : > { %8762 = vmatpush1.bf16.msra.mxu1 %v10919_v3  ;;  %v6629_v3 = vld [vmem:[#allocation6 + $0x788] sm:$0xff] }
 0x472   : > { %8921 = vmatpush1.bf16.msra.mxu0 %v10921_v44  ;;  %8763 = vmatprep.subr.bf16.mxu1 %v10928_v0  ;;  %v6633_v44 = vld [vmem:[#allocation6 + $0x7a8] sm:$0xff]  ;;  %v10959_v0 = vcombine.low %v6620_v34, %v6624_v41 }
 0x473   : > { %8922 = vmatprep.subr.bf16.mxu0 %v10930_v62  ;;  %v10961_v62 = vcombine.low %v6621_v25, %v6625_v21  ;;  %v10970_v10 = vcombine.high %v6629_v3, %v6633_v44 }
 0x475   : > { %8764 = vmatpush1.bf16.msra.mxu1 %v10927_v53  ;;  %v6637_v53 = vld [vmem:[#allocation6 + $0x7c8] sm:$0xff] }
 0x476   : > { %8923 = vmatpush1.bf16.msra.mxu0 %v10929_v14  ;;  %8765 = vmatprep.subr.bf16.mxu1 %v10936_v15  ;;  %v6641_v14 = vld [vmem:[#allocation6 + $0x7e8] sm:$0xff]  ;;  %v10967_v15 = vcombine.low %v6628_v60, %v6632_v26 }
 0x477   : > { %8924 = vmatprep.subr.bf16.mxu0 %v10938_v7  ;;  %v10969_v7 = vcombine.low %v6629_v3, %v6633_v44  ;;  %v10978_v43 = vcombine.high %v6637_v53, %v6641_v14  ;;  %v10977_v2 = vcombine.low %v6637_v53, %v6641_v14  ;;  %v6657_v3 = vld [vmem:[#allocation6 + $0x868] sm:$0xff] }
 0x479   : > { %8766 = vmatpush1.bf16.msra.mxu1 %v10935_v37  ;;  %v10984_v37 = vcombine.high %v13347_v57, %v13349_v22 }
 0x47a   : > { %8925 = vmatpush1.bf16.msra.mxu0 %v10937_v27  ;;  %8767 = vmatprep.subr.bf16.mxu1 %v10944_v16  ;;  %v10986_v27 = vcombine.high %v13351_v56, %v13353_v61  ;;  %v6672_v56 = vld [vmem:[#allocation6 + $0x8e0] sm:$0xff]  ;;  %v6669_v61 = vld [vmem:[#allocation6 + $0x8c8] sm:$0xff] }
 0x47b   : > { %8926 = vmatprep.subr.bf16.mxu0 %v10946_v18 }
 0x47d   : > { %8768 = vmatpush1.bf16.msra.mxu1 %v10943_v5 }
 0x47e   : > { %8927 = vmatpush1.bf16.msra.mxu0 %v10945_v50  ;;  %8769 = vmatprep.subr.bf16.mxu1 %v10952_v30 }
 0x47f   : > { %8928 = vmatprep.subr.bf16.mxu0 %v10954_v33 }
 0x481   : > { %8770 = vmatpush1.bf16.msra.mxu1 %v10951_v36 }
 0x482   : > { %8929 = vmatpush1.bf16.msra.mxu0 %v10953_v42  ;;  %8771 = vmatprep.subr.bf16.mxu1 %v10960_v35 }
 0x483   : > { %8930 = vmatprep.subr.bf16.mxu0 %v10962_v39 }
 0x485   : > { %8772 = vmatpush1.bf16.msra.mxu1 %v10959_v0 }
 0x486   : > { %8931 = vmatpush1.bf16.msra.mxu0 %v10961_v62  ;;  %8773 = vmatprep.subr.bf16.mxu1 %v10968_v24 }
 0x487   : > { %8932 = vmatprep.subr.bf16.mxu0 %v10970_v10 }
 0x489   : > { %8774 = vmatpush1.bf16.msra.mxu1 %v10967_v15  ;;  %v6660_v15 = vld [vmem:[#allocation6 + $0x880] sm:$0xff] }
 0x48a   : > { %8933 = vmatpush1.bf16.msra.mxu0 %v10969_v7  ;;  %8775 = vmatprep.subr.bf16.mxu1 %v10976_v12  ;;  %v6664_v7 = vld [vmem:[#allocation6 + $0x8a0] sm:$0xff] }
 0x48b   : > { %8934 = vmatprep.subr.bf16.mxu0 %v10978_v43 }
 0x48d   : > { %8776 = vmatpush1.bf16.msra.mxu1 %v10975_v40 }
 0x48e   : > { %8935 = vmatpush1.bf16.msra.mxu0 %v10977_v2  ;;  %8798 = vmatprep.subr.bf16.mxu1 %v10984_v37  ;;  %v6661_v37 = vld [vmem:[#allocation6 + $0x888] sm:$0xff] }
 0x48f   : > { %8957 = vmatprep.subr.bf16.mxu0 %v10986_v27  ;;  %v6665_v27 = vld [vmem:[#allocation6 + $0x8a8] sm:$0xff] }
 0x4e2   : > { %v6097_v16 = vpop.f32.mrb[40].mxu1 }
 0x4e3   : > { %v6330_v18 = vmax.f32 %v13239_v48, %v6097_v16  ;;  %v6309_v1 = vpop.f32.mrb[48].mxu0  ;;  %v6099_v38 = vpop.f32.mrb[41].mxu1 }
 0x4e4   : > { %v6332_v20 = vmax.f32 %v13301_v63, %v6309_v1  ;;  %v6331_v6 = vmax.f32 %v13243_v49, %v6099_v38  ;;  %v6311_v5 = vpop.f32.mrb[49].mxu0  ;;  %v6101_v50 = vpop.f32.mrb[42].mxu1  ;;  %v13371_v63 = vld [vmem:[#allocation6 + $0x840] sm:$0xff] }
 0x4e5   : > { %v6333_v30 = vmax.f32 %v13303_v17, %v6311_v5  ;;  %v6336_v33 = vmax.f32 %v13247_v28, %v6101_v50  ;;  %v6313_v34 = vpop.f32.mrb[50].mxu0  ;;  %v6103_v41 = vpop.f32.mrb[43].mxu1  ;;  %v6354_v48 = vmax.f32 %v6330_v18, 0.0  ;;  %v13373_v49 = vld [vmem:[#allocation6 + $0x860] sm:$0xff]  ;;  %v6653_v28 = vld [vmem:[#allocation6 + $0x848] sm:$0xff] }
 0x4e6   : > { %v6338_v25 = vmax.f32 %v13306_v23, %v6313_v34  ;;  %v6337_v21 = vmax.f32 %v13251_v31, %v6103_v41  ;;  %v6315_v36 = vpop.f32.mrb[51].mxu0  ;;  %v6356_v39 = vmax.f32 %v6332_v20, 0.0  ;;  %v6355_v60 = vmax.f32 %v6331_v6, 0.0  ;;  %v6668_v41 = vld [vmem:[#allocation6 + $0x8c0] sm:$0xff] }
 0x4e7   : > { %v6360_v42 = vmax.f32 %v6336_v33, 0.0  ;;  %v6339_v35 = vmax.f32 %v13309_v32, %v6315_v36  ;;  %v6357_v44 = vmax.f32 %v6333_v30, 0.0  ;;  %v10992_v53 = vcombine.high %v13371_v63, %v13373_v49 }
 0x4e8   : > { %v6362_v17 = vmax.f32 %v6338_v25, 0.0  ;;  %v6361_v26 = vmax.f32 %v6337_v21, 0.0  ;;  %v10994_v14 = vcombine.high %v6653_v28, %v6657_v3  ;;  %v11002_v30 = vcombine.high %v6661_v37, %v6665_v27 }
 0x4e9   : > { %v13375_v0 = vpack.c.bf16 %v6360_v42, %v6354_v48  ;;  %v6363_v23 = vmax.f32 %v6339_v35, 0.0  ;;  %v6676_v42 = vld [vmem:[#allocation6 + $0x900] sm:$0xff]  ;;  %v11008_v35 = vcombine.high %v6668_v41, %v6672_v56 }
 0x4ea   : > { %v13377_v31 = vpack.c.bf16 %v6362_v17, %v6356_v39  ;;  %v13379_v62 = vpack.c.bf16 %v6361_v26, %v6355_v60  ;;  %v6107_v24 = vpop.f32.mrb[44].mxu1  ;;  %v6677_v39 = vld [vmem:[#allocation6 + $0x908] sm:$0xff]  ;;  %v11007_v17 = vcombine.low %v6668_v41, %v6672_v56 }
 0x4eb   : > { %v13381_v32 = vpack.c.bf16 %v6363_v23, %v6357_v44  ;;  %v6342_v10 = vmax.f32 %v13255_v52, %v6107_v24  ;;  %v6319_v11 = vpop.f32.mrb[52].mxu0  ;;  %v6109_v13 = vpop.f32.mrb[45].mxu1  ;;  %v10991_v52 = vcombine.low %v13371_v63, %v13373_v49  ;;  %v6680_v49 = vld [vmem:[#allocation6 + $0x920] sm:$0xff]  ;;  %v6681_v60 = vld [vmem:[#allocation6 + $0x928] sm:$0xff] }
 0x4ec   : > { %v6344_v12 = vmax.f32 %v13315_v47, %v6319_v11  ;;  %v6343_v43 = vmax.f32 %v13259_v51, %v6109_v13  ;;  %v6321_v40 = vpop.f32.mrb[53].mxu0  ;;  %v6111_v2 = vpop.f32.mrb[46].mxu1  ;;  %8777 = vmatprep.mubr.bf16.mxu1 %v13379_v62  ;;  %8936 = vmatprep.mubr.bf16.mxu0 %v13379_v62  ;;  %v10993_v51 = vcombine.low %v6653_v28, %v6657_v3  ;;  %v6684_v44 = vld [vmem:[#allocation6 + $0x940] sm:$0xff]  ;;  %v6685_v24 = vld [vmem:[#allocation6 + $0x948] sm:$0xff] }
 0x4ed   : > { %v6345_v16 = vmax.f32 %v13319_v9, %v6321_v40  ;;  %v6348_v18 = vmax.f32 %v13263_v54, %v6111_v2  ;;  %v6323_v1 = vpop.f32.mrb[54].mxu0  ;;  %v6113_v38 = vpop.f32.mrb[47].mxu1  ;;  %8778 = vmatmul.mubr.bf16.vlgmr.msra.gmra.mrb[48].mxu1 %v13375_v0  ;;  %8937 = vmatmul.mubr.bf16.vlgmr.msra.gmra.mrb[56].mxu0 %v13375_v0  ;;  %v11000_v54 = vcombine.high %v6660_v15, %v6664_v7  ;;  %v6366_v9 = vmax.f32 %v6342_v10, 0.0  ;;  %v6688_v23 = vld [vmem:[#allocation6 + $0x960] sm:$0xff]  ;;  %v6689_v10 = vld [vmem:[#allocation6 + $0x968] sm:$0xff] }
 0x4ee   : > { %v6350_v47 = vmax.f32 %v13322_v45, %v6323_v1  ;;  %v6349_v20 = vmax.f32 %v13267_v58, %v6113_v38  ;;  %v6325_v6 = vpop.f32.mrb[55].mxu0  ;;  %8799 = vmatpush1.bf16.msra.mxu1 %v10983_v4  ;;  %8958 = vmatpush1.bf16.msra.mxu0 %v10985_v8  ;;  %v6368_v45 = vmax.f32 %v6344_v12, 0.0  ;;  %v6367_v33 = vmax.f32 %v6343_v43, 0.0  ;;  %v6673_v8 = vld [vmem:[#allocation6 + $0x8e8] sm:$0xff] }
 0x4ef   : > { %v6372_v5 = vmax.f32 %v6348_v18, 0.0  ;;  %v6351_v50 = vmax.f32 %v13325_v19, %v6325_v6  ;;  %8800 = vmatprep.subr.bf16.mxu1 %v10992_v53  ;;  %8959 = vmatprep.subr.bf16.mxu0 %v10994_v14  ;;  %v6369_v25 = vmax.f32 %v6345_v16, 0.0  ;;  %v10999_v4 = vcombine.low %v6660_v15, %v6664_v7  ;;  %v6692_v15 = vld [vmem:[#allocation6 + $0x980] sm:$0xff]  ;;  %v6693_v12 = vld [vmem:[#allocation6 + $0x988] sm:$0xff] }
 0x4f0   : > { %v6374_v58 = vmax.f32 %v6350_v47, 0.0  ;;  %v6373_v34 = vmax.f32 %v6349_v20, 0.0  ;;  %v11001_v19 = vcombine.low %v6661_v37, %v6665_v27  ;;  %v11010_v63 = vcombine.high %v6669_v61, %v6673_v8  ;;  %v6696_v7 = vld [vmem:[#allocation6 + $0x9a0] sm:$0xff]  ;;  %v6697_v43 = vld [vmem:[#allocation6 + $0x9a8] sm:$0xff] }
 0x4f1   : > { %v13405_v57 = vpack.c.bf16 %v6372_v5, %v6366_v9  ;;  %v6375_v22 = vmax.f32 %v6351_v50, 0.0  ;;  %v11009_v26 = vcombine.low %v6669_v61, %v6673_v8  ;;  %v11016_v28 = vcombine.high %v6676_v42, %v6680_v49  ;;  %v6700_v27 = vld [vmem:[#allocation6 + $0x9c0] sm:$0xff]  ;;  %v6701_v18 = vld [vmem:[#allocation6 + $0x9c8] sm:$0xff] }
 0x4f2   : > { %v13407_v21 = vpack.c.bf16 %v6374_v58, %v6368_v45  ;;  %v13409_v36 = vpack.c.bf16 %v6373_v34, %v6367_v33  ;;  %8801 = vmatpush1.bf16.msra.mxu1 %v10991_v52  ;;  %8960 = vmatpush1.bf16.msra.mxu0 %v10993_v51  ;;  %v11018_v3 = vcombine.high %v6677_v39, %v6681_v60  ;;  %v6704_v16 = vld [vmem:[#allocation6 + $0x9e0] sm:$0xff]  ;;  %v6705_v1 = vld [vmem:[#allocation6 + $0x9e8] sm:$0xff] }
 0x4f3   : > { %v13411_v48 = vpack.c.bf16 %v6375_v22, %v6369_v25  ;;  %8802 = vmatprep.subr.bf16.mxu1 %v11000_v54  ;;  %8961 = vmatprep.subr.bf16.mxu0 %v11002_v30  ;;  %v11015_v11 = vcombine.low %v6676_v42, %v6680_v49  ;;  %v11017_v13 = vcombine.low %v6677_v39, %v6681_v60  ;;  %v6708_v6 = vld [vmem:[#allocation6 + $0xa00] sm:$0xff]  ;;  %v6709_v9 = vld [vmem:[#allocation6 + $0xa08] sm:$0xff] }
 0x4f4   : > { %8787 = vmatprep.mubr.bf16.mxu1 %v13409_v36  ;;  %8946 = vmatprep.mubr.bf16.mxu0 %v13409_v36  ;;  %v11024_v53 = vcombine.high %v6684_v44, %v6688_v23  ;;  %v11026_v14 = vcombine.high %v6685_v24, %v6689_v10  ;;  %v11023_v40 = vcombine.low %v6684_v44, %v6688_v23  ;;  %v6712_v54 = vld [vmem:[#allocation6 + $0xa20] sm:$0xff]  ;;  %v6713_v5 = vld [vmem:[#allocation6 + $0xa28] sm:$0xff] }
 0x4f5   : > { %8788 = vmatmul.mubr.bf16.gmra.mrb[52].mxu1 %v13405_v57  ;;  %8947 = vmatmul.mubr.bf16.gmra.mrb[60].mxu0 %v13405_v57  ;;  %v11025_v2 = vcombine.low %v6685_v24, %v6689_v10  ;;  %v11032_v52 = vcombine.high %v6692_v15, %v6696_v7  ;;  %v11034_v37 = vcombine.high %v6693_v12, %v6697_v43  ;;  %v6716_v58 = vld [vmem:[#allocation6 + $0xa40] sm:$0xff]  ;;  %v6717_v41 = vld [vmem:[#allocation6 + $0xa48] sm:$0xff] }
 0x4f6   : > { %8803 = vmatpush1.bf16.msra.mxu1 %v10999_v4  ;;  %8962 = vmatpush1.bf16.msra.mxu0 %v11001_v19  ;;  %v11031_v38 = vcombine.low %v6692_v15, %v6696_v7  ;;  %v11033_v51 = vcombine.low %v6693_v12, %v6697_v43  ;;  %v11040_v47 = vcombine.high %v6700_v27, %v6704_v16  ;;  %v6720_v34 = vld [vmem:[#allocation6 + $0xa60] sm:$0xff]  ;;  %v6721_v25 = vld [vmem:[#allocation6 + $0xa68] sm:$0xff] }
 0x4f7   : > { %8830 = vmatprep.mubr.bf16.mxu1 %v13381_v32  ;;  %8989 = vmatprep.mubr.bf16.mxu0 %v13381_v32  ;;  %v11042_v20 = vcombine.high %v6701_v18, %v6705_v1  ;;  %v11039_v50 = vcombine.low %v6700_v27, %v6704_v16  ;;  %v11041_v30 = vcombine.low %v6701_v18, %v6705_v1  ;;  %v6724_v8 = vld [vmem:[#allocation6 + $0xa80] sm:$0xff]  ;;  %v6725_v42 = vld [vmem:[#allocation6 + $0xa88] sm:$0xff] }
 0x4f8   : > { %8804 = vmatprep.subr.bf16.mxu1 %v11008_v35  ;;  %8963 = vmatprep.subr.bf16.mxu0 %v11010_v63  ;;  %v11048_v45 = vcombine.high %v6708_v6, %v6712_v54  ;;  %v11050_v33 = vcombine.high %v6709_v9, %v6713_v5  ;;  %v11047_v22 = vcombine.low %v6708_v6, %v6712_v54  ;;  %v6728_v19 = vld [vmem:[#allocation6 + $0xaa0] sm:$0xff]  ;;  %v6729_v35 = vld [vmem:[#allocation6 + $0xaa8] sm:$0xff] }
 0x4f9   : > { %v11049_v4 = vcombine.low %v6709_v9, %v6713_v5  ;;  %v11056_v56 = vcombine.high %v6716_v58, %v6720_v34  ;;  %v11058_v61 = vcombine.high %v6717_v41, %v6721_v25  ;;  %v11055_v63 = vcombine.low %v6716_v58, %v6720_v34 }
 0x4fa   : > { %8805 = vmatpush1.bf16.msra.mxu1 %v11007_v17  ;;  %8964 = vmatpush1.bf16.msra.mxu0 %v11009_v26  ;;  %v11057_v49 = vcombine.low %v6717_v41, %v6721_v25  ;;  %v11064_v39 = vcombine.high %v6724_v8, %v6728_v19  ;;  %v11066_v60 = vcombine.high %v6725_v42, %v6729_v35  ;;  %v6732_v17 = vld [vmem:[#allocation6 + $0xac0] sm:$0xff] }
 0x4fb   : > { %8806 = vmatprep.subr.bf16.mxu1 %v11016_v28  ;;  %8965 = vmatprep.subr.bf16.mxu0 %v11018_v3  ;;  %v6736_v26 = vld [vmem:[#allocation6 + $0xae0] sm:$0xff]  ;;  %v6733_v28 = vld [vmem:[#allocation6 + $0xac8] sm:$0xff]  ;;  %v11063_v44 = vcombine.low %v6724_v8, %v6728_v19  ;;  %v11065_v23 = vcombine.low %v6725_v42, %v6729_v35 }
 0x4fc   : > { %v6737_v3 = vld [vmem:[#allocation6 + $0xae8] sm:$0xff]  ;;  %v11072_v24 = vcombine.high %v6732_v17, %v6736_v26  ;;  %v11071_v15 = vcombine.low %v6732_v17, %v6736_v26 }
 0x4fd   : > { %v11074_v10 = vcombine.high %v6733_v28, %v6737_v3  ;;  %v11073_v7 = vcombine.low %v6733_v28, %v6737_v3 }
 0x4fe   : > { %8807 = vmatpush1.bf16.msra.mxu1 %v11015_v11  ;;  %8966 = vmatpush1.bf16.msra.mxu0 %v11017_v13  ;;  %v6740_v11 = vld [vmem:[#allocation6 + $0xb00] sm:$0xff] }
 0x4ff   : > { %8808 = vmatprep.subr.bf16.mxu1 %v11024_v53  ;;  %8967 = vmatprep.subr.bf16.mxu0 %v11026_v14  ;;  %v6744_v13 = vld [vmem:[#allocation6 + $0xb20] sm:$0xff]  ;;  %v6741_v53 = vld [vmem:[#allocation6 + $0xb08] sm:$0xff] }
 0x500   : > { %v6745_v14 = vld [vmem:[#allocation6 + $0xb28] sm:$0xff]  ;;  %v11080_v12 = vcombine.high %v6740_v11, %v6744_v13  ;;  %v11079_v27 = vcombine.low %v6740_v11, %v6744_v13 }
 0x501   : > { %v11082_v43 = vcombine.high %v6741_v53, %v6745_v14  ;;  %v11081_v16 = vcombine.low %v6741_v53, %v6745_v14 }
 0x502   : > { %8809 = vmatpush1.bf16.msra.mxu1 %v11023_v40  ;;  %8968 = vmatpush1.bf16.msra.mxu0 %v11025_v2  ;;  %v6748_v40 = vld [vmem:[#allocation6 + $0xb40] sm:$0xff] }
 0x503   : > { %8810 = vmatprep.subr.bf16.mxu1 %v11032_v52  ;;  %8969 = vmatprep.subr.bf16.mxu0 %v11034_v37  ;;  %v6752_v2 = vld [vmem:[#allocation6 + $0xb60] sm:$0xff]  ;;  %v6749_v52 = vld [vmem:[#allocation6 + $0xb48] sm:$0xff] }
 0x504   : > { %v6753_v37 = vld [vmem:[#allocation6 + $0xb68] sm:$0xff]  ;;  %v11088_v18 = vcombine.high %v6748_v40, %v6752_v2  ;;  %v11087_v6 = vcombine.low %v6748_v40, %v6752_v2 }
 0x505   : > { %v11090_v1 = vcombine.high %v6749_v52, %v6753_v37  ;;  %v11089_v54 = vcombine.low %v6749_v52, %v6753_v37 }
 0x506   : > { %8811 = vmatpush1.bf16.msra.mxu1 %v11031_v38  ;;  %8970 = vmatpush1.bf16.msra.mxu0 %v11033_v51  ;;  %v6756_v38 = vld [vmem:[#allocation6 + $0xb80] sm:$0xff] }
 0x507   : > { %8812 = vmatprep.subr.bf16.mxu1 %v11040_v47  ;;  %8971 = vmatprep.subr.bf16.mxu0 %v11042_v20  ;;  %v6760_v51 = vld [vmem:[#allocation6 + $0xba0] sm:$0xff]  ;;  %v6757_v47 = vld [vmem:[#allocation6 + $0xb88] sm:$0xff] }
 0x508   : > { %v6761_v20 = vld [vmem:[#allocation6 + $0xba8] sm:$0xff]  ;;  %v11096_v9 = vcombine.high %v6756_v38, %v6760_v51  ;;  %v11095_v58 = vcombine.low %v6756_v38, %v6760_v51 }
 0x509   : > { %v11098_v5 = vcombine.high %v6757_v47, %v6761_v20  ;;  %v11097_v34 = vcombine.low %v6757_v47, %v6761_v20 }
 0x50a   : > { %8813 = vmatpush1.bf16.msra.mxu1 %v11039_v50  ;;  %8972 = vmatpush1.bf16.msra.mxu0 %v11041_v30  ;;  %v6764_v50 = vld [vmem:[#allocation6 + $0xbc0] sm:$0xff] }
 0x50b   : > { %8814 = vmatprep.subr.bf16.mxu1 %v11048_v45  ;;  %8973 = vmatprep.subr.bf16.mxu0 %v11050_v33  ;;  %v6768_v30 = vld [vmem:[#allocation6 + $0xbe0] sm:$0xff]  ;;  %v6765_v45 = vld [vmem:[#allocation6 + $0xbc8] sm:$0xff] }
 0x50c   : > { %v6769_v33 = vld [vmem:[#allocation6 + $0xbe8] sm:$0xff]  ;;  %v11104_v41 = vcombine.high %v6764_v50, %v6768_v30  ;;  %v11103_v8 = vcombine.low %v6764_v50, %v6768_v30 }
 0x50d   : > { %v11106_v25 = vcombine.high %v6765_v45, %v6769_v33  ;;  %v11105_v19 = vcombine.low %v6765_v45, %v6769_v33  ;;  %v6438_v33 = vld [vmem:[#allocation6 + $0x190] sm:$0xff] }
 0x50e   : > { %8815 = vmatpush1.bf16.msra.mxu1 %v11047_v22  ;;  %8974 = vmatpush1.bf16.msra.mxu0 %v11049_v4  ;;  %v6390_v22 = vld [vmem:[#allocation6 + $0x10] sm:$0xff] }
 0x50f   : > { %8816 = vmatprep.subr.bf16.mxu1 %v11056_v56  ;;  %8975 = vmatprep.subr.bf16.mxu0 %v11058_v61  ;;  %v6394_v4 = vld [vmem:[#allocation6 + $0x30] sm:$0xff]  ;;  %v6391_v56 = vld [vmem:[#allocation6 + $0x18] sm:$0xff] }
 0x510   : > { %v6395_v61 = vld [vmem:[#allocation6 + $0x38] sm:$0xff]  ;;  %v10732_v42 = vcombine.high %v6390_v22, %v6394_v4  ;;  %v10731_v17 = vcombine.low %v6390_v22, %v6394_v4 }
 0x511   : > { %v10734_v35 = vcombine.high %v6391_v56, %v6395_v61  ;;  %v10733_v26 = vcombine.low %v6391_v56, %v6395_v61  ;;  %v6446_v61 = vld [vmem:[#allocation6 + $0x1d0] sm:$0xff] }
 0x512   : > { %8817 = vmatpush1.bf16.msra.mxu1 %v11055_v63  ;;  %8976 = vmatpush1.bf16.msra.mxu0 %v11057_v49  ;;  %v6398_v63 = vld [vmem:[#allocation6 + $0x50] sm:$0xff] }
 0x513   : > { %8818 = vmatprep.subr.bf16.mxu1 %v11064_v39  ;;  %8977 = vmatprep.subr.bf16.mxu0 %v11066_v60  ;;  %v6402_v49 = vld [vmem:[#allocation6 + $0x70] sm:$0xff]  ;;  %v6399_v39 = vld [vmem:[#allocation6 + $0x58] sm:$0xff] }
 0x514   : > { %v6403_v60 = vld [vmem:[#allocation6 + $0x78] sm:$0xff]  ;;  %v10740_v28 = vcombine.high %v6398_v63, %v6402_v49  ;;  %v10739_v11 = vcombine.low %v6398_v63, %v6402_v49 }
 0x515   : > { %v10742_v3 = vcombine.high %v6399_v39, %v6403_v60  ;;  %v10741_v13 = vcombine.low %v6399_v39, %v6403_v60  ;;  %v6454_v60 = vld [vmem:[#allocation6 + $0x210] sm:$0xff] }
 0x516   : > { %8819 = vmatpush1.bf16.msra.mxu1 %v11063_v44  ;;  %8978 = vmatpush1.bf16.msra.mxu0 %v11065_v23  ;;  %v6406_v44 = vld [vmem:[#allocation6 + $0x90] sm:$0xff] }
 0x517   : > { %8820 = vmatprep.subr.bf16.mxu1 %v11072_v24  ;;  %8979 = vmatprep.subr.bf16.mxu0 %v11074_v10  ;;  %v6410_v23 = vld [vmem:[#allocation6 + $0xb0] sm:$0xff]  ;;  %v6407_v24 = vld [vmem:[#allocation6 + $0x98] sm:$0xff] }
 0x518   : > { %v6411_v10 = vld [vmem:[#allocation6 + $0xb8] sm:$0xff]  ;;  %v10748_v53 = vcombine.high %v6406_v44, %v6410_v23  ;;  %v10747_v40 = vcombine.low %v6406_v44, %v6410_v23 }
 0x519   : > { %v10750_v14 = vcombine.high %v6407_v24, %v6411_v10  ;;  %v10749_v2 = vcombine.low %v6407_v24, %v6411_v10  ;;  %v6462_v10 = vld [vmem:[#allocation6 + $0x250] sm:$0xff] }
 0x51a   : > { %8821 = vmatpush1.bf16.msra.mxu1 %v11071_v15  ;;  %8980 = vmatpush1.bf16.msra.mxu0 %v11073_v7  ;;  %v6414_v15 = vld [vmem:[#allocation6 + $0xd0] sm:$0xff] }
 0x51b   : > { %8822 = vmatprep.subr.bf16.mxu1 %v11080_v12  ;;  %8981 = vmatprep.subr.bf16.mxu0 %v11082_v43  ;;  %v6418_v7 = vld [vmem:[#allocation6 + $0xf0] sm:$0xff]  ;;  %v6415_v12 = vld [vmem:[#allocation6 + $0xd8] sm:$0xff] }
 0x51c   : > { %v6419_v43 = vld [vmem:[#allocation6 + $0xf8] sm:$0xff]  ;;  %v10756_v52 = vcombine.high %v6414_v15, %v6418_v7  ;;  %v10755_v38 = vcombine.low %v6414_v15, %v6418_v7 }
 0x51d   : > { %v10758_v37 = vcombine.high %v6415_v12, %v6419_v43  ;;  %v10757_v51 = vcombine.low %v6415_v12, %v6419_v43  ;;  %v6470_v43 = vld [vmem:[#allocation6 + $0x290] sm:$0xff] }
 0x51e   : > { %8823 = vmatpush1.bf16.msra.mxu1 %v11079_v27  ;;  %8982 = vmatpush1.bf16.msra.mxu0 %v11081_v16  ;;  %v6422_v27 = vld [vmem:[#allocation6 + $0x110] sm:$0xff] }
 0x51f   : > { %8824 = vmatprep.subr.bf16.mxu1 %v11088_v18  ;;  %8983 = vmatprep.subr.bf16.mxu0 %v11090_v1  ;;  %v6426_v16 = vld [vmem:[#allocation6 + $0x130] sm:$0xff]  ;;  %v6423_v18 = vld [vmem:[#allocation6 + $0x118] sm:$0xff] }
 0x520   : > { %v6427_v1 = vld [vmem:[#allocation6 + $0x138] sm:$0xff]  ;;  %v10764_v47 = vcombine.high %v6422_v27, %v6426_v16  ;;  %v10763_v50 = vcombine.low %v6422_v27, %v6426_v16 }
 0x521   : > { %v10766_v20 = vcombine.high %v6423_v18, %v6427_v1  ;;  %v10765_v30 = vcombine.low %v6423_v18, %v6427_v1  ;;  %v6478_v1 = vld [vmem:[#allocation6 + $0x2d0] sm:$0xff] }
 0x522   : > { %8825 = vmatpush1.bf16.msra.mxu1 %v11087_v6  ;;  %8984 = vmatpush1.bf16.msra.mxu0 %v11089_v54  ;;  %v6430_v6 = vld [vmem:[#allocation6 + $0x150] sm:$0xff] }
 0x523   : > { %8826 = vmatprep.subr.bf16.mxu1 %v11096_v9  ;;  %8985 = vmatprep.subr.bf16.mxu0 %v11098_v5  ;;  %v6434_v54 = vld [vmem:[#allocation6 + $0x170] sm:$0xff]  ;;  %v6431_v9 = vld [vmem:[#allocation6 + $0x158] sm:$0xff] }
 0x524   : > { %v6435_v5 = vld [vmem:[#allocation6 + $0x178] sm:$0xff]  ;;  %v10772_v45 = vcombine.high %v6430_v6, %v6434_v54 }
 0x525   : > { %v10773_v22 = vcombine.low %v6431_v9, %v6435_v5 }
 0x526   : > { %8827 = vmatpush1.bf16.msra.mxu1 %v11095_v58  ;;  %8986 = vmatpush1.bf16.msra.mxu0 %v11097_v34  ;;  %v6442_v58 = vld [vmem:[#allocation6 + $0x1b0] sm:$0xff]  ;;  %v6439_v34 = vld [vmem:[#allocation6 + $0x198] sm:$0xff] }
 0x527   : > { %8828 = vmatprep.subr.bf16.mxu1 %v11104_v41  ;;  %8987 = vmatprep.subr.bf16.mxu0 %v11106_v25  ;;  %v6443_v41 = vld [vmem:[#allocation6 + $0x1b8] sm:$0xff]  ;;  %v10771_v25 = vcombine.low %v6430_v6, %v6434_v54  ;;  %v10780_v4 = vcombine.high %v6438_v33, %v6442_v58 }
 0x528   : > { %v10782_v56 = vcombine.high %v6439_v34, %v6443_v41  ;;  %v10781_v63 = vcombine.low %v6439_v34, %v6443_v41  ;;  %v6494_v41 = vld [vmem:[#allocation6 + $0x350] sm:$0xff] }
 0x52a   : > { %8829 = vmatpush1.bf16.msra.mxu1 %v11103_v8  ;;  %8988 = vmatpush1.bf16.msra.mxu0 %v11105_v19  ;;  %v6450_v8 = vld [vmem:[#allocation6 + $0x1f0] sm:$0xff]  ;;  %v6447_v19 = vld [vmem:[#allocation6 + $0x1d8] sm:$0xff] }
 0x52b   : > { %9010 = vmatprep.subr.bf16.mxu1 %v10732_v42  ;;  %9169 = vmatprep.subr.bf16.mxu0 %v10734_v35  ;;  %v6451_v42 = vld [vmem:[#allocation6 + $0x1f8] sm:$0xff]  ;;  %v10779_v35 = vcombine.low %v6438_v33, %v6442_v58  ;;  %v10788_v49 = vcombine.high %v6446_v61, %v6450_v8 }
 0x52c   : > { %v10790_v39 = vcombine.high %v6447_v19, %v6451_v42  ;;  %v10789_v44 = vcombine.low %v6447_v19, %v6451_v42  ;;  %v6502_v42 = vld [vmem:[#allocation6 + $0x390] sm:$0xff] }
 0x52d   : > { %8831 = vmatmul.mubr.bf16.vlgmr.msra.gmra.mrb[48].mxu1 %v13377_v31  ;;  %8990 = vmatmul.mubr.bf16.vlgmr.msra.gmra.mrb[56].mxu0 %v13377_v31 }
 0x52e   : > { %8840 = vmatprep.mubr.bf16.mxu1 %v13411_v48  ;;  %8999 = vmatprep.mubr.bf16.mxu0 %v13411_v48 }
 0x52f   : > { %9011 = vmatpush1.bf16.msra.mxu1 %v10731_v17  ;;  %9170 = vmatpush1.bf16.msra.mxu0 %v10733_v26  ;;  %v6458_v17 = vld [vmem:[#allocation6 + $0x230] sm:$0xff]  ;;  %v6455_v26 = vld [vmem:[#allocation6 + $0x218] sm:$0xff] }
 0x530   : > { %9012 = vmatprep.subr.bf16.mxu1 %v10740_v28  ;;  %9171 = vmatprep.subr.bf16.mxu0 %v10742_v3  ;;  %v6459_v28 = vld [vmem:[#allocation6 + $0x238] sm:$0xff]  ;;  %v10787_v3 = vcombine.low %v6446_v61, %v6450_v8  ;;  %v10796_v23 = vcombine.high %v6454_v60, %v6458_v17 }
 0x531   : > { %v10798_v24 = vcombine.high %v6455_v26, %v6459_v28  ;;  %v10797_v15 = vcombine.low %v6455_v26, %v6459_v28  ;;  %v6510_v28 = vld [vmem:[#allocation6 + $0x3d0] sm:$0xff] }
 0x533   : > { %9013 = vmatpush1.bf16.msra.mxu1 %v10739_v11  ;;  %9172 = vmatpush1.bf16.msra.mxu0 %v10741_v13  ;;  %v6466_v11 = vld [vmem:[#allocation6 + $0x270] sm:$0xff]  ;;  %v6463_v13 = vld [vmem:[#allocation6 + $0x258] sm:$0xff] }
 0x534   : > { %9014 = vmatprep.subr.bf16.mxu1 %v10748_v53  ;;  %9173 = vmatprep.subr.bf16.mxu0 %v10750_v14  ;;  %v6467_v53 = vld [vmem:[#allocation6 + $0x278] sm:$0xff]  ;;  %v10795_v14 = vcombine.low %v6454_v60, %v6458_v17  ;;  %v10804_v7 = vcombine.high %v6462_v10, %v6466_v11 }
 0x535   : > { %8841 = vmatmul.mubr.bf16.gmra.mrb[52].mxu1 %v13407_v21  ;;  %9000 = vmatmul.mubr.bf16.gmra.mrb[60].mxu0 %v13407_v21  ;;  %v10806_v12 = vcombine.high %v6463_v13, %v6467_v53  ;;  %v10805_v27 = vcombine.low %v6463_v13, %v6467_v53  ;;  %v6518_v53 = vld [vmem:[#allocation6 + $0x410] sm:$0xff] }
 0x536   : > { %9042 = vmatprep.mubr.bf16.mxu1 %v13317_v29  ;;  %9201 = vmatprep.mubr.bf16.mxu0 %v13317_v29  ;;  %v10774_v29 = vcombine.high %v6431_v9, %v6435_v5  ;;  %v6486_v5 = vld [vmem:[#allocation6 + $0x310] sm:$0xff] }
 0x537   : > { %9015 = vmatpush1.bf16.msra.mxu1 %v10747_v40  ;;  %9174 = vmatpush1.bf16.msra.mxu0 %v10749_v2  ;;  %v6474_v40 = vld [vmem:[#allocation6 + $0x2b0] sm:$0xff]  ;;  %v6471_v2 = vld [vmem:[#allocation6 + $0x298] sm:$0xff] }
 0x538   : > { %9016 = vmatprep.subr.bf16.mxu1 %v10756_v52  ;;  %9175 = vmatprep.subr.bf16.mxu0 %v10758_v37  ;;  %v6475_v52 = vld [vmem:[#allocation6 + $0x2b8] sm:$0xff]  ;;  %v10803_v37 = vcombine.low %v6462_v10, %v6466_v11  ;;  %v10812_v16 = vcombine.high %v6470_v43, %v6474_v40 }
 0x539   : > { %v10814_v18 = vcombine.high %v6471_v2, %v6475_v52  ;;  %v10813_v6 = vcombine.low %v6471_v2, %v6475_v52  ;;  %v6526_v52 = vld [vmem:[#allocation6 + $0x450] sm:$0xff] }
 0x53b   : > { %9017 = vmatpush1.bf16.msra.mxu1 %v10755_v38  ;;  %9176 = vmatpush1.bf16.msra.mxu0 %v10757_v51  ;;  %v6482_v38 = vld [vmem:[#allocation6 + $0x2f0] sm:$0xff]  ;;  %v6479_v51 = vld [vmem:[#allocation6 + $0x2d8] sm:$0xff] }
 0x53c   : > { %9018 = vmatprep.subr.bf16.mxu1 %v10764_v47  ;;  %9177 = vmatprep.subr.bf16.mxu0 %v10766_v20  ;;  %v6483_v47 = vld [vmem:[#allocation6 + $0x2f8] sm:$0xff]  ;;  %v10811_v20 = vcombine.low %v6470_v43, %v6474_v40  ;;  %v10820_v54 = vcombine.high %v6478_v1, %v6482_v38 }
 0x53d   : > { %v10822_v9 = vcombine.high %v6479_v51, %v6483_v47  ;;  %v10821_v33 = vcombine.low %v6479_v51, %v6483_v47  ;;  %v6534_v47 = vld [vmem:[#allocation6 + $0x490] sm:$0xff] }
 0x53f   : > { %9019 = vmatpush1.bf16.msra.mxu1 %v10763_v50  ;;  %9178 = vmatpush1.bf16.msra.mxu0 %v10765_v30  ;;  %v6490_v50 = vld [vmem:[#allocation6 + $0x330] sm:$0xff]  ;;  %v6487_v30 = vld [vmem:[#allocation6 + $0x318] sm:$0xff] }
 0x540   : > { %9020 = vmatprep.subr.bf16.mxu1 %v10772_v45  ;;  %9179 = vmatprep.subr.bf16.mxu0 %v10774_v29  ;;  %v6491_v45 = vld [vmem:[#allocation6 + $0x338] sm:$0xff]  ;;  %v10819_v29 = vcombine.low %v6478_v1, %v6482_v38  ;;  %v10828_v58 = vcombine.high %v6486_v5, %v6490_v50 }
 0x541   : > { %v10830_v34 = vcombine.high %v6487_v30, %v6491_v45  ;;  %v10829_v61 = vcombine.low %v6487_v30, %v6491_v45  ;;  %v6542_v45 = vld [vmem:[#allocation6 + $0x4d0] sm:$0xff] }
 0x543   : > { %9021 = vmatpush1.bf16.msra.mxu1 %v10771_v25  ;;  %9180 = vmatpush1.bf16.msra.mxu0 %v10773_v22  ;;  %v6498_v25 = vld [vmem:[#allocation6 + $0x370] sm:$0xff]  ;;  %v6495_v22 = vld [vmem:[#allocation6 + $0x358] sm:$0xff] }
 0x544   : > { %9022 = vmatprep.subr.bf16.mxu1 %v10780_v4  ;;  %9181 = vmatprep.subr.bf16.mxu0 %v10782_v56  ;;  %v6499_v4 = vld [vmem:[#allocation6 + $0x378] sm:$0xff]  ;;  %v10827_v56 = vcombine.low %v6486_v5, %v6490_v50  ;;  %v10836_v8 = vcombine.high %v6494_v41, %v6498_v25 }
 0x545   : > { %v10838_v19 = vcombine.high %v6495_v22, %v6499_v4  ;;  %v10837_v60 = vcombine.low %v6495_v22, %v6499_v4  ;;  %v6550_v22 = vld [vmem:[#allocation6 + $0x510] sm:$0xff]  ;;  %v6551_v4 = vld [vmem:[#allocation6 + $0x518] sm:$0xff] }
 0x547   : > { %9023 = vmatpush1.bf16.msra.mxu1 %v10779_v35  ;;  %9182 = vmatpush1.bf16.msra.mxu0 %v10781_v63  ;;  %v6506_v35 = vld [vmem:[#allocation6 + $0x3b0] sm:$0xff]  ;;  %v6503_v63 = vld [vmem:[#allocation6 + $0x398] sm:$0xff] }
 0x548   : > { %9024 = vmatprep.subr.bf16.mxu1 %v10788_v49  ;;  %9183 = vmatprep.subr.bf16.mxu0 %v10790_v39  ;;  %v6507_v49 = vld [vmem:[#allocation6 + $0x3b8] sm:$0xff]  ;;  %v10835_v39 = vcombine.low %v6494_v41, %v6498_v25  ;;  %v10844_v17 = vcombine.high %v6502_v42, %v6506_v35 }
 0x549   : > { %v10846_v26 = vcombine.high %v6503_v63, %v6507_v49  ;;  %v10845_v10 = vcombine.low %v6503_v63, %v6507_v49  ;;  %v6562_v63 = vld [vmem:[#allocation6 + $0x570] sm:$0xff]  ;;  %v6559_v49 = vld [vmem:[#allocation6 + $0x558] sm:$0xff] }
 0x54b   : > { %9025 = vmatpush1.bf16.msra.mxu1 %v10787_v3  ;;  %9184 = vmatpush1.bf16.msra.mxu0 %v10789_v44  ;;  %v6514_v3 = vld [vmem:[#allocation6 + $0x3f0] sm:$0xff]  ;;  %v6511_v44 = vld [vmem:[#allocation6 + $0x3d8] sm:$0xff] }
 0x54c   : > { %9026 = vmatprep.subr.bf16.mxu1 %v10796_v23  ;;  %9185 = vmatprep.subr.bf16.mxu0 %v10798_v24  ;;  %v6515_v23 = vld [vmem:[#allocation6 + $0x3f8] sm:$0xff]  ;;  %v10843_v24 = vcombine.low %v6502_v42, %v6506_v35  ;;  %v10852_v11 = vcombine.high %v6510_v28, %v6514_v3  ;;  %v6558_v35 = vld [vmem:[#allocation6 + $0x550] sm:$0xff] }
 0x54d   : > { %v10854_v13 = vcombine.high %v6511_v44, %v6515_v23  ;;  %v10853_v43 = vcombine.low %v6511_v44, %v6515_v23  ;;  %v6571_v44 = vld [vmem:[#allocation6 + $0x5b8] sm:$0xff]  ;;  %v10899_v23 = vcombine.low %v6558_v35, %v6562_v63 }
 0x54f   : > { %9027 = vmatpush1.bf16.msra.mxu1 %v10795_v14  ;;  %9186 = vmatpush1.bf16.msra.mxu0 %v10797_v15  ;;  %v6522_v14 = vld [vmem:[#allocation6 + $0x430] sm:$0xff]  ;;  %v6519_v15 = vld [vmem:[#allocation6 + $0x418] sm:$0xff] }
 0x550   : > { %9028 = vmatprep.subr.bf16.mxu1 %v10804_v7  ;;  %9187 = vmatprep.subr.bf16.mxu0 %v10806_v12  ;;  %v6523_v7 = vld [vmem:[#allocation6 + $0x438] sm:$0xff]  ;;  %v10851_v12 = vcombine.low %v6510_v28, %v6514_v3  ;;  %v10860_v40 = vcombine.high %v6518_v53, %v6522_v14  ;;  %v6566_v28 = vld [vmem:[#allocation6 + $0x590] sm:$0xff] }
 0x551   : > { %v10862_v2 = vcombine.high %v6519_v15, %v6523_v7  ;;  %v10861_v1 = vcombine.low %v6519_v15, %v6523_v7  ;;  %v6570_v3 = vld [vmem:[#allocation6 + $0x5b0] sm:$0xff]  ;;  %v6579_v15 = vld [vmem:[#allocation6 + $0x5f8] sm:$0xff] }
 0x552   : > { %v10907_v7 = vcombine.low %v6566_v28, %v6570_v3 }
 0x553   : > { %9029 = vmatpush1.bf16.msra.mxu1 %v10803_v37  ;;  %9188 = vmatpush1.bf16.msra.mxu0 %v10805_v27  ;;  %v6530_v37 = vld [vmem:[#allocation6 + $0x470] sm:$0xff]  ;;  %v6527_v27 = vld [vmem:[#allocation6 + $0x458] sm:$0xff] }
 0x554   : > { %9030 = vmatprep.subr.bf16.mxu1 %v10812_v16  ;;  %9189 = vmatprep.subr.bf16.mxu0 %v10814_v18  ;;  %v6531_v16 = vld [vmem:[#allocation6 + $0x478] sm:$0xff]  ;;  %v10859_v18 = vcombine.low %v6518_v53, %v6522_v14  ;;  %v10868_v38 = vcombine.high %v6526_v52, %v6530_v37  ;;  %v6578_v53 = vld [vmem:[#allocation6 + $0x5f0] sm:$0xff] }
 0x555   : > { %v10870_v51 = vcombine.high %v6527_v27, %v6531_v16  ;;  %v10869_v5 = vcombine.low %v6527_v27, %v6531_v16  ;;  %v6575_v14 = vld [vmem:[#allocation6 + $0x5d8] sm:$0xff] }
 0x556   : > { %v6587_v27 = vld [vmem:[#allocation6 + $0x638] sm:$0xff] }
 0x557   : > { %9031 = vmatpush1.bf16.msra.mxu1 %v10811_v20  ;;  %9190 = vmatpush1.bf16.msra.mxu0 %v10813_v6  ;;  %v6538_v20 = vld [vmem:[#allocation6 + $0x4b0] sm:$0xff]  ;;  %v6535_v6 = vld [vmem:[#allocation6 + $0x498] sm:$0xff] }
 0x558   : > { %9032 = vmatprep.subr.bf16.mxu1 %v10820_v54  ;;  %9191 = vmatprep.subr.bf16.mxu0 %v10822_v9  ;;  %v6539_v54 = vld [vmem:[#allocation6 + $0x4b8] sm:$0xff]  ;;  %v10867_v9 = vcombine.low %v6526_v52, %v6530_v37  ;;  %v10876_v50 = vcombine.high %v6534_v47, %v6538_v20  ;;  %v6586_v52 = vld [vmem:[#allocation6 + $0x630] sm:$0xff] }
 0x559   : > { %v10878_v30 = vcombine.high %v6535_v6, %v6539_v54  ;;  %v6583_v37 = vld [vmem:[#allocation6 + $0x618] sm:$0xff] }
 0x55b   : > { %9033 = vmatpush1.bf16.msra.mxu1 %v10819_v29  ;;  %9192 = vmatpush1.bf16.msra.mxu0 %v10821_v33  ;;  %v6546_v29 = vld [vmem:[#allocation6 + $0x4f0] sm:$0xff]  ;;  %v6543_v33 = vld [vmem:[#allocation6 + $0x4d8] sm:$0xff] }
 0x55c   : > { %9034 = vmatprep.subr.bf16.mxu1 %v10828_v58  ;;  %9193 = vmatprep.subr.bf16.mxu0 %v10830_v34  ;;  %v6547_v58 = vld [vmem:[#allocation6 + $0x4f8] sm:$0xff]  ;;  %v10877_v34 = vcombine.low %v6535_v6, %v6539_v54  ;;  %v10884_v41 = vcombine.high %v6542_v45, %v6546_v29 }
 0x55d   : > { %v10886_v25 = vcombine.high %v6543_v33, %v6547_v58  ;;  %v6595_v6 = vld [vmem:[#allocation6 + $0x678] sm:$0xff] }
 0x55f   : > { %9035 = vmatpush1.bf16.msra.mxu1 %v10827_v56  ;;  %9194 = vmatpush1.bf16.msra.mxu0 %v10829_v61  ;;  %v6555_v56 = vld [vmem:[#allocation6 + $0x538] sm:$0xff]  ;;  %v10883_v61 = vcombine.low %v6542_v45, %v6546_v29  ;;  %v6602_v45 = vld [vmem:[#allocation6 + $0x6b0] sm:$0xff] }
 0x560   : > { %9036 = vmatprep.subr.bf16.mxu1 %v10836_v8  ;;  %9195 = vmatprep.subr.bf16.mxu0 %v10838_v19  ;;  %v10885_v8 = vcombine.low %v6543_v33, %v6547_v58  ;;  %v10894_v42 = vcombine.high %v6551_v4, %v6555_v56  ;;  %v6599_v29 = vld [vmem:[#allocation6 + $0x698] sm:$0xff] }
 0x561   : > { %v6603_v33 = vld [vmem:[#allocation6 + $0x6b8] sm:$0xff] }
 0x563   : > { %9037 = vmatpush1.bf16.msra.mxu1 %v10835_v39  ;;  %9196 = vmatpush1.bf16.msra.mxu0 %v10837_v60  ;;  %v6563_v39 = vld [vmem:[#allocation6 + $0x578] sm:$0xff]  ;;  %v10893_v60 = vcombine.low %v6551_v4, %v6555_v56 }
 0x564   : > { %9038 = vmatprep.subr.bf16.mxu1 %v10844_v17  ;;  %9197 = vmatprep.subr.bf16.mxu0 %v10846_v26  ;;  %v10900_v17 = vcombine.high %v6558_v35, %v6562_v63  ;;  %v10902_v26 = vcombine.high %v6559_v49, %v6563_v39  ;;  %v6611_v4 = vld [vmem:[#allocation6 + $0x6f8] sm:$0xff]  ;;  %v6618_v35 = vld [vmem:[#allocation6 + $0x730] sm:$0xff] }
 0x565   : > { %v6615_v63 = vld [vmem:[#allocation6 + $0x718] sm:$0xff] }
 0x567   : > { %9039 = vmatpush1.bf16.msra.mxu1 %v10843_v24  ;;  %9198 = vmatpush1.bf16.msra.mxu0 %v10845_v10  ;;  %v10901_v24 = vcombine.low %v6559_v49, %v6563_v39  ;;  %v10908_v10 = vcombine.high %v6566_v28, %v6570_v3  ;;  %v6619_v49 = vld [vmem:[#allocation6 + $0x738] sm:$0xff]  ;;  %v6626_v28 = vld [vmem:[#allocation6 + $0x770] sm:$0xff] }
 0x568   : > { %9040 = vmatprep.subr.bf16.mxu1 %v10852_v11  ;;  %9199 = vmatprep.subr.bf16.mxu0 %v10854_v13  ;;  %v6574_v13 = vld [vmem:[#allocation6 + $0x5d0] sm:$0xff]  ;;  %v6623_v3 = vld [vmem:[#allocation6 + $0x758] sm:$0xff] }
 0x569   : > { %v10915_v16 = vcombine.low %v6574_v13, %v6578_v53 }
 0x56b   : > { %9041 = vmatpush1.bf16.msra.mxu1 %v10851_v12  ;;  %9200 = vmatpush1.bf16.msra.mxu0 %v10853_v43  ;;  %v10916_v43 = vcombine.high %v6574_v13, %v6578_v53  ;;  %v6634_v13 = vld [vmem:[#allocation6 + $0x7b0] sm:$0xff]  ;;  %v6631_v53 = vld [vmem:[#allocation6 + $0x798] sm:$0xff] }
 0x56c   : > { %9063 = vmatprep.subr.bf16.mxu1 %v10860_v40  ;;  %9222 = vmatprep.subr.bf16.mxu0 %v10862_v2  ;;  %v10918_v40 = vcombine.high %v6575_v14, %v6579_v15  ;;  %v6582_v2 = vld [vmem:[#allocation6 + $0x610] sm:$0xff] }
 0x56d   : > { %v10923_v54 = vcombine.low %v6582_v2, %v6586_v52 }
 0x56e   : > { %9043 = vmatmul.mubr.bf16.vlgmr.msra.gmra.mrb[56].mxu1 %v13313_v59  ;;  %9202 = vmatmul.mubr.bf16.vlgmr.msra.gmra.mrb[64].mxu0 %v13313_v59  ;;  %v10875_v59 = vcombine.low %v6534_v47, %v6538_v20  ;;  %v6594_v47 = vld [vmem:[#allocation6 + $0x670] sm:$0xff]  ;;  %v6591_v20 = vld [vmem:[#allocation6 + $0x658] sm:$0xff] }
 0x56f   : > { %9052 = vmatprep.mubr.bf16.mxu1 %v13332_v55  ;;  %9064 = vmatpush1.bf16.msra.mxu1 %v10859_v18  ;;  %v10917_v18 = vcombine.low %v6575_v14, %v6579_v15  ;;  %v6635_v14 = vld [vmem:[#allocation6 + $0x7b8] sm:$0xff] }
 0x570   : > { %9211 = vmatprep.mubr.bf16.mxu0 %v13332_v55  ;;  %9223 = vmatpush1.bf16.msra.mxu0 %v10861_v1  ;;  %v6554_v55 = vld [vmem:[#allocation6 + $0x530] sm:$0xff]  ;;  %v10924_v1 = vcombine.high %v6582_v2, %v6586_v52  ;;  %v6639_v52 = vld [vmem:[#allocation6 + $0x7d8] sm:$0xff] }
 0x571   : > { %9065 = vmatprep.subr.bf16.mxu1 %v10868_v38  ;;  %9224 = vmatprep.subr.bf16.mxu0 %v10870_v51  ;;  %v10892_v19 = vcombine.high %v6550_v22, %v6554_v55  ;;  %v10926_v38 = vcombine.high %v6583_v37, %v6587_v27  ;;  %v6590_v51 = vld [vmem:[#allocation6 + $0x650] sm:$0xff] }
 0x572   : > { %v10931_v58 = vcombine.low %v6590_v51, %v6594_v47  ;;  %v6642_v2 = vld [vmem:[#allocation6 + $0x7f0] sm:$0xff] }
 0x573   : > { %9066 = vmatpush1.bf16.msra.mxu1 %v10867_v9  ;;  %v10925_v9 = vcombine.low %v6583_v37, %v6587_v27  ;;  %v6643_v37 = vld [vmem:[#allocation6 + $0x7f8] sm:$0xff] }
 0x574   : > { %9225 = vmatpush1.bf16.msra.mxu0 %v10869_v5  ;;  %9067 = vmatprep.subr.bf16.mxu1 %v10876_v50  ;;  %v10932_v5 = vcombine.high %v6590_v51, %v6594_v47  ;;  %v10934_v50 = vcombine.high %v6591_v20, %v6595_v6  ;;  %v6650_v51 = vld [vmem:[#allocation6 + $0x830] sm:$0xff]  ;;  %v6647_v47 = vld [vmem:[#allocation6 + $0x818] sm:$0xff] }
 0x575   : > { %9226 = vmatprep.subr.bf16.mxu0 %v10878_v30  ;;  %v6598_v30 = vld [vmem:[#allocation6 + $0x690] sm:$0xff] }
 0x576   : > { %9053 = vmatmul.mubr.bf16.gmra.mrb[60].mxu1 %v13329_v46  ;;  %9212 = vmatmul.mubr.bf16.gmra.mrb[68].mxu0 %v13329_v46  ;;  %v10891_v46 = vcombine.low %v6550_v22, %v6554_v55  ;;  %v6610_v22 = vld [vmem:[#allocation6 + $0x6f0] sm:$0xff]  ;;  %v6607_v55 = vld [vmem:[#allocation6 + $0x6d8] sm:$0xff]  ;;  %v10939_v56 = vcombine.low %v6598_v30, %v6602_v45 }
 0x577   : > { %9068 = vmatpush1.bf16.msra.mxu1 %v10875_v59  ;;  %9095 = vmatprep.mubr.bf16.mxu1 %v13379_v62  ;;  %v10933_v59 = vcombine.low %v6591_v20, %v6595_v6  ;;  %v6651_v20 = vld [vmem:[#allocation6 + $0x838] sm:$0xff] }
 0x578   : > { %9227 = vmatpush1.bf16.msra.mxu0 %v10877_v34  ;;  %9254 = vmatprep.mubr.bf16.mxu0 %v13379_v62  ;;  %v6567_v62 = vld [vmem:[#allocation6 + $0x598] sm:$0xff]  ;;  %v10940_v34 = vcombine.high %v6598_v30, %v6602_v45  ;;  %v6658_v30 = vld [vmem:[#allocation6 + $0x870] sm:$0xff] }
 0x579   : > { %9069 = vmatprep.subr.bf16.mxu1 %v10884_v41  ;;  %9228 = vmatprep.subr.bf16.mxu0 %v10886_v25  ;;  %v10910_v11 = vcombine.high %v6567_v62, %v6571_v44  ;;  %v10909_v12 = vcombine.low %v6567_v62, %v6571_v44  ;;  %v10942_v41 = vcombine.high %v6599_v29, %v6603_v33  ;;  %v6606_v25 = vld [vmem:[#allocation6 + $0x6d0] sm:$0xff]  ;;  %v6627_v62 = vld [vmem:[#allocation6 + $0x778] sm:$0xff] }
 0x57a   : > { %v10947_v39 = vcombine.low %v6606_v25, %v6610_v22  ;;  %v6655_v45 = vld [vmem:[#allocation6 + $0x858] sm:$0xff] }
 0x57b   : > { %9070 = vmatpush1.bf16.msra.mxu1 %v10883_v61  ;;  %v10941_v61 = vcombine.low %v6599_v29, %v6603_v33  ;;  %v6659_v29 = vld [vmem:[#allocation6 + $0x878] sm:$0xff] }
 0x57c   : > { %9229 = vmatpush1.bf16.msra.mxu0 %v10885_v8  ;;  %9071 = vmatprep.subr.bf16.mxu1 %v10892_v19  ;;  %v10948_v8 = vcombine.high %v6606_v25, %v6610_v22  ;;  %v10950_v19 = vcombine.high %v6607_v55, %v6611_v4  ;;  %v6666_v25 = vld [vmem:[#allocation6 + $0x8b0] sm:$0xff]  ;;  %v6663_v22 = vld [vmem:[#allocation6 + $0x898] sm:$0xff] }
 0x57d   : > { %9230 = vmatprep.subr.bf16.mxu0 %v10894_v42  ;;  %v6614_v42 = vld [vmem:[#allocation6 + $0x710] sm:$0xff] }
 0x57e   : > { %v10955_v44 = vcombine.low %v6614_v42, %v6618_v35 }
 0x57f   : > { %9072 = vmatpush1.bf16.msra.mxu1 %v10891_v46  ;;  %v10949_v46 = vcombine.low %v6607_v55, %v6611_v4  ;;  %v6667_v55 = vld [vmem:[#allocation6 + $0x8b8] sm:$0xff] }
 0x580   : > { %9231 = vmatpush1.bf16.msra.mxu0 %v10893_v60  ;;  %9073 = vmatprep.subr.bf16.mxu1 %v10900_v17  ;;  %v10956_v60 = vcombine.high %v6614_v42, %v6618_v35  ;;  %v10958_v17 = vcombine.high %v6615_v63, %v6619_v49  ;;  %v6674_v42 = vld [vmem:[#allocation6 + $0x8f0] sm:$0xff]  ;;  %v6671_v35 = vld [vmem:[#allocation6 + $0x8d8] sm:$0xff] }
 0x581   : > { %9232 = vmatprep.subr.bf16.mxu0 %v10902_v26  ;;  %v6622_v26 = vld [vmem:[#allocation6 + $0x750] sm:$0xff] }
 0x582   : > { %v10963_v15 = vcombine.low %v6622_v26, %v6626_v28 }
 0x583   : > { %9074 = vmatpush1.bf16.msra.mxu1 %v10899_v23  ;;  %v10957_v23 = vcombine.low %v6615_v63, %v6619_v49  ;;  %v6675_v63 = vld [vmem:[#allocation6 + $0x8f8] sm:$0xff]  ;;  %v11005_v49 = vcombine.low %v6663_v22, %v6667_v55 }
 0x584   : > { %9233 = vmatpush1.bf16.msra.mxu0 %v10901_v24  ;;  %9075 = vmatprep.subr.bf16.mxu1 %v10908_v10  ;;  %v10964_v24 = vcombine.high %v6622_v26, %v6626_v28  ;;  %v10966_v10 = vcombine.high %v6623_v3, %v6627_v62  ;;  %v6683_v26 = vld [vmem:[#allocation6 + $0x938] sm:$0xff] }
 0x585   : > { %9234 = vmatprep.subr.bf16.mxu0 %v10910_v11  ;;  %v6630_v11 = vld [vmem:[#allocation6 + $0x790] sm:$0xff] }
 0x586   : > { %v10971_v27 = vcombine.low %v6630_v11, %v6634_v13 }
 0x587   : > { %9076 = vmatpush1.bf16.msra.mxu1 %v10907_v7  ;;  %v10965_v7 = vcombine.low %v6623_v3, %v6627_v62  ;;  %v11013_v3 = vcombine.low %v6671_v35, %v6675_v63 }
 0x588   : > { %9235 = vmatpush1.bf16.msra.mxu0 %v10909_v12  ;;  %9077 = vmatprep.subr.bf16.mxu1 %v10916_v43  ;;  %v10972_v12 = vcombine.high %v6630_v11, %v6634_v13  ;;  %v10974_v43 = vcombine.high %v6631_v53, %v6635_v14  ;;  %v6691_v11 = vld [vmem:[#allocation6 + $0x978] sm:$0xff] }
 0x589   : > { %9236 = vmatprep.subr.bf16.mxu0 %v10918_v40  ;;  %v6638_v40 = vld [vmem:[#allocation6 + $0x7d0] sm:$0xff] }
 0x58a   : > { %v10979_v6 = vcombine.low %v6638_v40, %v6642_v2 }
 0x58b   : > { %9078 = vmatpush1.bf16.msra.mxu1 %v10915_v16  ;;  %v10973_v16 = vcombine.low %v6631_v53, %v6635_v14 }
 0x58c   : > { %9237 = vmatpush1.bf16.msra.mxu0 %v10917_v18  ;;  %9079 = vmatprep.subr.bf16.mxu1 %v10924_v1  ;;  %v10980_v18 = vcombine.high %v6638_v40, %v6642_v2  ;;  %v10982_v1 = vcombine.high %v6639_v52, %v6643_v37 }
 0x58d   : > { %9238 = vmatprep.subr.bf16.mxu0 %v10926_v38  ;;  %v6646_v38 = vld [vmem:[#allocation6 + $0x810] sm:$0xff] }
 0x58e   : > { %v10987_v33 = vcombine.low %v6646_v38, %v6650_v51 }
 0x58f   : > { %9080 = vmatpush1.bf16.msra.mxu1 %v10923_v54  ;;  %v10981_v54 = vcombine.low %v6639_v52, %v6643_v37  ;;  %v6702_v37 = vld [vmem:[#allocation6 + $0x9d0] sm:$0xff] }
 0x590   : > { %9239 = vmatpush1.bf16.msra.mxu0 %v10925_v9  ;;  %9081 = vmatprep.subr.bf16.mxu1 %v10932_v5  ;;  %v10988_v9 = vcombine.high %v6646_v38, %v6650_v51  ;;  %v10990_v5 = vcombine.high %v6647_v47, %v6651_v20 }
 0x591   : > { %9240 = vmatprep.subr.bf16.mxu0 %v10934_v50  ;;  %v6654_v50 = vld [vmem:[#allocation6 + $0x850] sm:$0xff] }
 0x592   : > { %v10995_v4 = vcombine.low %v6654_v50, %v6658_v30 }
 0x593   : > { %9082 = vmatpush1.bf16.msra.mxu1 %v10931_v58  ;;  %v10989_v58 = vcombine.low %v6647_v47, %v6651_v20  ;;  %v6710_v20 = vld [vmem:[#allocation6 + $0xa10] sm:$0xff] }
 0x594   : > { %9241 = vmatpush1.bf16.msra.mxu0 %v10933_v59  ;;  %9083 = vmatprep.subr.bf16.mxu1 %v10940_v34  ;;  %v10996_v59 = vcombine.high %v6654_v50, %v6658_v30  ;;  %v10998_v34 = vcombine.high %v6655_v45, %v6659_v29 }
 0x595   : > { %9242 = vmatprep.subr.bf16.mxu0 %v10942_v41  ;;  %v6662_v41 = vld [vmem:[#allocation6 + $0x890] sm:$0xff] }
 0x597   : > { %9084 = vmatpush1.bf16.msra.mxu1 %v10939_v56  ;;  %v10997_v56 = vcombine.low %v6655_v45, %v6659_v29  ;;  %v6718_v29 = vld [vmem:[#allocation6 + $0xa50] sm:$0xff] }
 0x598   : > { %9243 = vmatpush1.bf16.msra.mxu0 %v10941_v61  ;;  %9085 = vmatprep.subr.bf16.mxu1 %v10948_v8  ;;  %v11004_v61 = vcombine.high %v6662_v41, %v6666_v25  ;;  %v11006_v8 = vcombine.high %v6663_v22, %v6667_v55  ;;  %v6726_v55 = vld [vmem:[#allocation6 + $0xa90] sm:$0xff] }
 0x599   : > { %9244 = vmatprep.subr.bf16.mxu0 %v10950_v19  ;;  %v6670_v19 = vld [vmem:[#allocation6 + $0x8d0] sm:$0xff] }
 0x59a   : > { %v11011_v28 = vcombine.low %v6670_v19, %v6674_v42 }
 0x59b   : > { %9086 = vmatpush1.bf16.msra.mxu1 %v10947_v39  ;;  %v11012_v39 = vcombine.high %v6670_v19, %v6674_v42 }
 0x59c   : > { %9245 = vmatpush1.bf16.msra.mxu0 %v10949_v46  ;;  %9087 = vmatprep.subr.bf16.mxu1 %v10956_v60  ;;  %v6678_v46 = vld [vmem:[#allocation6 + $0x910] sm:$0xff] }
 0x59d   : > { %9246 = vmatprep.subr.bf16.mxu0 %v10958_v17  ;;  %v6682_v60 = vld [vmem:[#allocation6 + $0x930] sm:$0xff]  ;;  %v6679_v17 = vld [vmem:[#allocation6 + $0x918] sm:$0xff] }
 0x59e   : > { %v11020_v62 = vcombine.high %v6678_v46, %v6682_v60  ;;  %v11021_v13 = vcombine.low %v6679_v17, %v6683_v26 }
 0x59f   : > { %9088 = vmatpush1.bf16.msra.mxu1 %v10955_v44  ;;  %v11022_v44 = vcombine.high %v6679_v17, %v6683_v26  ;;  %v6742_v26 = vld [vmem:[#allocation6 + $0xb10] sm:$0xff] }
 0x5a0   : > { %9247 = vmatpush1.bf16.msra.mxu0 %v10957_v23  ;;  %9089 = vmatprep.subr.bf16.mxu1 %v10964_v24  ;;  %v6686_v23 = vld [vmem:[#allocation6 + $0x950] sm:$0xff] }
 0x5a1   : > { %9248 = vmatprep.subr.bf16.mxu0 %v10966_v10  ;;  %v6690_v24 = vld [vmem:[#allocation6 + $0x970] sm:$0xff]  ;;  %v6687_v10 = vld [vmem:[#allocation6 + $0x958] sm:$0xff] }
 0x5a2   : > { %v11028_v53 = vcombine.high %v6686_v23, %v6690_v24  ;;  %v11030_v14 = vcombine.high %v6687_v10, %v6691_v11  ;;  %v11029_v40 = vcombine.low %v6687_v10, %v6691_v11  ;;  %v6750_v11 = vld [vmem:[#allocation6 + $0xb50] sm:$0xff] }
 0x5a3   : > { %9090 = vmatpush1.bf16.msra.mxu1 %v10963_v15  ;;  %v6698_v15 = vld [vmem:[#allocation6 + $0x9b0] sm:$0xff] }
 0x5a4   : > { %9249 = vmatpush1.bf16.msra.mxu0 %v10965_v7  ;;  %9091 = vmatprep.subr.bf16.mxu1 %v10972_v12  ;;  %v6695_v7 = vld [vmem:[#allocation6 + $0x998] sm:$0xff] }
 0x5a5   : > { %9250 = vmatprep.subr.bf16.mxu0 %v10974_v43  ;;  %v6699_v12 = vld [vmem:[#allocation6 + $0x9b8] sm:$0xff]  ;;  %v11027_v43 = vcombine.low %v6686_v23, %v6690_v24 }
 0x5a6   : > { %v11038_v52 = vcombine.high %v6695_v7, %v6699_v12  ;;  %v11037_v38 = vcombine.low %v6695_v7, %v6699_v12  ;;  %v6758_v12 = vld [vmem:[#allocation6 + $0xb90] sm:$0xff] }
 0x5a7   : > { %9092 = vmatpush1.bf16.msra.mxu1 %v10971_v27  ;;  %v6706_v27 = vld [vmem:[#allocation6 + $0x9f0] sm:$0xff] }
 0x5a8   : > { %9251 = vmatpush1.bf16.msra.mxu0 %v10973_v16  ;;  %9093 = vmatprep.subr.bf16.mxu1 %v10980_v18  ;;  %v6703_v16 = vld [vmem:[#allocation6 + $0x9d8] sm:$0xff]  ;;  %v11044_v51 = vcombine.high %v6702_v37, %v6706_v27 }
 0x5a9   : > { %9252 = vmatprep.subr.bf16.mxu0 %v10982_v1  ;;  %v6707_v18 = vld [vmem:[#allocation6 + $0x9f8] sm:$0xff] }
 0x5aa   : > { %v11046_v47 = vcombine.high %v6703_v16, %v6707_v18  ;;  %v11045_v50 = vcombine.low %v6703_v16, %v6707_v18  ;;  %v6766_v18 = vld [vmem:[#allocation6 + $0xbd0] sm:$0xff] }
 0x5ab   : > { %9094 = vmatpush1.bf16.msra.mxu1 %v10979_v6  ;;  %v6714_v6 = vld [vmem:[#allocation6 + $0xa30] sm:$0xff] }
 0x5ac   : > { %9253 = vmatpush1.bf16.msra.mxu0 %v10981_v54  ;;  %9116 = vmatprep.subr.bf16.mxu1 %v10988_v9  ;;  %v6711_v54 = vld [vmem:[#allocation6 + $0xa18] sm:$0xff]  ;;  %v11052_v30 = vcombine.high %v6710_v20, %v6714_v6 }
 0x5ad   : > { %9275 = vmatprep.subr.bf16.mxu0 %v10990_v5  ;;  %v6715_v9 = vld [vmem:[#allocation6 + $0xa38] sm:$0xff]  ;;  %v11043_v5 = vcombine.low %v6702_v37, %v6706_v27 }
 0x5ae   : > { %9096 = vmatmul.mubr.bf16.vlgmr.msra.gmra.mrb[56].mxu1 %v13375_v0  ;;  %v11054_v45 = vcombine.high %v6711_v54, %v6715_v9 }
 0x5af   : > { %9255 = vmatmul.mubr.bf16.vlgmr.msra.gmra.mrb[64].mxu0 %v13375_v0  ;;  %9105 = vmatprep.mubr.bf16.mxu1 %v13409_v36  ;;  %v11003_v0 = vcombine.low %v6662_v41, %v6666_v25  ;;  %v11053_v41 = vcombine.low %v6711_v54, %v6715_v9 }
 0x5b0   : > { %9117 = vmatpush1.bf16.msra.mxu1 %v10987_v33  ;;  %9264 = vmatprep.mubr.bf16.mxu0 %v13409_v36  ;;  %v11014_v36 = vcombine.high %v6671_v35, %v6675_v63  ;;  %v6722_v33 = vld [vmem:[#allocation6 + $0xa70] sm:$0xff] }
 0x5b1   : > { %9276 = vmatpush1.bf16.msra.mxu0 %v10989_v58  ;;  %9118 = vmatprep.subr.bf16.mxu1 %v10996_v59  ;;  %v6719_v58 = vld [vmem:[#allocation6 + $0xa58] sm:$0xff]  ;;  %v11060_v25 = vcombine.high %v6718_v29, %v6722_v33  ;;  %v6734_v63 = vld [vmem:[#allocation6 + $0xad0] sm:$0xff] }
 0x5b2   : > { %9277 = vmatprep.subr.bf16.mxu0 %v10998_v34  ;;  %v6723_v59 = vld [vmem:[#allocation6 + $0xa78] sm:$0xff]  ;;  %v11051_v34 = vcombine.low %v6710_v20, %v6714_v6 }
 0x5b3   : > { %v11062_v22 = vcombine.high %v6719_v58, %v6723_v59  ;;  %v11061_v19 = vcombine.low %v6719_v58, %v6723_v59  ;;  %v12570_v58 = vld [vmem:[%s13580_s4 + $0xc8] sm:$0xff]  }
 0x5b4   : > { %9119 = vmatpush1.bf16.msra.mxu1 %v10995_v4  ;;  %v6730_v4 = vld [vmem:[#allocation6 + $0xab0] sm:$0xff]  ;;  %v12571_v59 = vld [vmem:[%s13580_s4 + $0x8] sm:$0xff]  }
 0x5b5   : > { %9278 = vmatpush1.bf16.msra.mxu0 %v10997_v56  ;;  %9120 = vmatprep.subr.bf16.mxu1 %v11004_v61  ;;  %v6727_v56 = vld [vmem:[#allocation6 + $0xa98] sm:$0xff]  ;;  %v11068_v42 = vcombine.high %v6726_v55, %v6730_v4 }
 0x5b6   : > { %9106 = vmatmul.mubr.bf16.gmra.mrb[60].mxu1 %v13405_v57  ;;  %9279 = vmatprep.subr.bf16.mxu0 %v11006_v8  ;;  %v6731_v61 = vld [vmem:[#allocation6 + $0xab8] sm:$0xff]  ;;  %v11059_v8 = vcombine.low %v6718_v29, %v6722_v33  ;;  %v12568_v29 = vld [vmem:[%s13580_s4 + $0x80] sm:$0xff]   ;;  %v12569_v33 = vld [vmem:[%s13580_s4 + $0x48] sm:$0xff]  }
 0x5b7   : > { %9265 = vmatmul.mubr.bf16.gmra.mrb[68].mxu0 %v13405_v57  ;;  %9148 = vmatprep.mubr.bf16.mxu1 %v13381_v32  ;;  %v11019_v57 = vcombine.low %v6678_v46, %v6682_v60  ;;  %v11070_v35 = vcombine.high %v6727_v56, %v6731_v61  ;;  %v11069_v46 = vcombine.low %v6727_v56, %v6731_v61  ;;  %v12580_v56 = vld [vmem:[%s13580_s4 + $0x98] sm:$0xff]   ;;  %v12581_v61 = vld [vmem:[%s13580_s4 + $0x60] sm:$0xff]  }
 0x5b8   : > { %9121 = vmatpush1.bf16.msra.mxu1 %v11003_v0  ;;  %9307 = vmatprep.mubr.bf16.mxu0 %v13381_v32  ;;  %v6694_v32 = vld [vmem:[#allocation6 + $0x990] sm:$0xff] }
 0x5b9   : > { %9280 = vmatpush1.bf16.msra.mxu0 %v11005_v49  ;;  %9122 = vmatprep.subr.bf16.mxu1 %v11012_v39  ;;  %v11036_v2 = vcombine.high %v6694_v32, %v6698_v15  ;;  %v11035_v1 = vcombine.low %v6694_v32, %v6698_v15  ;;  %v6738_v0 = vld [vmem:[#allocation6 + $0xaf0] sm:$0xff]  ;;  %v6735_v49 = vld [vmem:[#allocation6 + $0xad8] sm:$0xff] }
 0x5ba   : > { %9281 = vmatprep.subr.bf16.mxu0 %v11014_v36  ;;  %v6739_v39 = vld [vmem:[#allocation6 + $0xaf8] sm:$0xff]  ;;  %v11067_v36 = vcombine.low %v6726_v55, %v6730_v4  ;;  %v11076_v60 = vcombine.high %v6734_v63, %v6738_v0 }
 0x5bb   : > { %v11078_v17 = vcombine.high %v6735_v49, %v6739_v39  ;;  %v11077_v23 = vcombine.low %v6735_v49, %v6739_v39  ;;  %v12578_v55 = vld [vmem:[%s13580_s4 + $0xd8] sm:$0xff]  }
 0x5bc   : > { %9123 = vmatpush1.bf16.msra.mxu1 %v11011_v28  ;;  %v6746_v28 = vld [vmem:[#allocation6 + $0xb30] sm:$0xff]  ;;  %v12579_v4 = vld [vmem:[%s13580_s4 + $0x18] sm:$0xff]  }
 0x5bd   : > { %9282 = vmatpush1.bf16.msra.mxu0 %v11013_v3  ;;  %9124 = vmatprep.subr.bf16.mxu1 %v11020_v62  ;;  %v6743_v3 = vld [vmem:[#allocation6 + $0xb18] sm:$0xff]  ;;  %v11084_v24 = vcombine.high %v6742_v26, %v6746_v28 }
 0x5be   : > { %9283 = vmatprep.subr.bf16.mxu0 %v11022_v44  ;;  %v6747_v62 = vld [vmem:[#allocation6 + $0xb38] sm:$0xff]  ;;  %v11075_v44 = vcombine.low %v6734_v63, %v6738_v0 }
 0x5bf   : > { %v11086_v10 = vcombine.high %v6743_v3, %v6747_v62  ;;  %v11085_v32 = vcombine.low %v6743_v3, %v6747_v62 }
 0x5c0   : > { %9125 = vmatpush1.bf16.msra.mxu1 %v11019_v57  ;;  %v6754_v57 = vld [vmem:[#allocation6 + $0xb70] sm:$0xff] }
 0x5c1   : > { %9284 = vmatpush1.bf16.msra.mxu0 %v11021_v13  ;;  %9126 = vmatprep.subr.bf16.mxu1 %v11028_v53  ;;  %v6751_v13 = vld [vmem:[#allocation6 + $0xb58] sm:$0xff]  ;;  %v11092_v15 = vcombine.high %v6750_v11, %v6754_v57 }
 0x5c2   : > { %9285 = vmatprep.subr.bf16.mxu0 %v11030_v14  ;;  %v6755_v53 = vld [vmem:[#allocation6 + $0xb78] sm:$0xff]  ;;  %v11083_v14 = vcombine.low %v6742_v26, %v6746_v28 }
 0x5c3   : > { %v11094_v7 = vcombine.high %v6751_v13, %v6755_v53  ;;  %v11093_v37 = vcombine.low %v6751_v13, %v6755_v53  ;;  %v12589_v13 = vld [vmem:[%s13580_s4 + $0x70] sm:$0xff]  }
 0x5c4   : > { %9127 = vmatpush1.bf16.msra.mxu1 %v11027_v43  ;;  %v6762_v43 = vld [vmem:[#allocation6 + $0xbb0] sm:$0xff] }
 0x5c5   : > { %9286 = vmatpush1.bf16.msra.mxu0 %v11029_v40  ;;  %9128 = vmatprep.subr.bf16.mxu1 %v11036_v2  ;;  %v6759_v40 = vld [vmem:[#allocation6 + $0xb98] sm:$0xff]  ;;  %v11100_v27 = vcombine.high %v6758_v12, %v6762_v43  ;;  %v12590_v53 = vld [vmem:[%s13580_s4 + $0xf0] sm:$0xff]  }
 0x5c6   : > { %9287 = vmatprep.subr.bf16.mxu0 %v11038_v52  ;;  %v6763_v2 = vld [vmem:[#allocation6 + $0xbb8] sm:$0xff]  ;;  %v11091_v52 = vcombine.low %v6750_v11, %v6754_v57  ;;  %v12587_v11 = vld [vmem:[%s13580_s4 + $0x28] sm:$0xff]  }
 0x5c7   : > { %v11102_v16 = vcombine.high %v6759_v40, %v6763_v2  ;;  %v11101_v20 = vcombine.low %v6759_v40, %v6763_v2  ;;  %v12588_v57 = vld [vmem:[%s13580_s4 + $0xa8] sm:$0xff]  }
 0x5c8   : > { %9129 = vmatpush1.bf16.msra.mxu1 %v11035_v1  ;;  %v6770_v1 = vld [vmem:[#allocation6 + $0xbf0] sm:$0xff] }
 0x5c9   : > { %9288 = vmatpush1.bf16.msra.mxu0 %v11037_v38  ;;  %9130 = vmatprep.subr.bf16.mxu1 %v11044_v51  ;;  %v6767_v38 = vld [vmem:[#allocation6 + $0xbd8] sm:$0xff]  ;;  %v11108_v6 = vcombine.high %v6766_v18, %v6770_v1  ;;  %v11107_v9 = vcombine.low %v6766_v18, %v6770_v1 }
 0x5ca   : > { %9289 = vmatprep.subr.bf16.mxu0 %v11046_v47  ;;  %v6771_v51 = vld [vmem:[#allocation6 + $0xbf8] sm:$0xff]  ;;  %v11099_v47 = vcombine.low %v6758_v12, %v6762_v43 }
 0x5cb   : > { %v11110_v54 = vcombine.high %v6767_v38, %v6771_v51  ;;  %v12595_v12 = vld [vmem:[%s13580_s4 + $0x38] sm:$0xff]  }
 0x5cc   : > { %9131 = vmatpush1.bf16.msra.mxu1 %v11043_v5  ;;  %v11109_v5 = vcombine.low %v6767_v38, %v6771_v51  ;;  %v12596_v43 = vld [vmem:[%s13580_s4 + $0xb8] sm:$0xff]  }
 0x5cd   : > { %9290 = vmatpush1.bf16.msra.mxu0 %v11045_v50  ;;  %9132 = vmatprep.subr.bf16.mxu1 %v11052_v30  ;;  %v12565_v50 = vld [vmem:[%s13580_s4 + $0x40] sm:$0xff]  }
 0x5ce   : > { %9291 = vmatprep.subr.bf16.mxu0 %v11054_v45  ;;  %v12566_v30 = vld [vmem:[%s13580_s4 + $0xc0] sm:$0xff]  }
 0x5cf   : > { %v12567_v45 = vld [vmem:[%s13580_s4] sm:$0xff]  }
 0x5d0   : > { %9133 = vmatpush1.bf16.msra.mxu1 %v11051_v34  ;;  %v12572_v34 = vld [vmem:[%s13580_s4 + $0x88] sm:$0xff]  }
 0x5d1   : > { %9292 = vmatpush1.bf16.msra.mxu0 %v11053_v41  ;;  %9134 = vmatprep.subr.bf16.mxu1 %v11060_v25  ;;  %v12573_v41 = vld [vmem:[%s13580_s4 + $0x50] sm:$0xff]  }
 0x5d2   : > { %9293 = vmatprep.subr.bf16.mxu0 %v11062_v22  ;;  %v12576_v25 = vld [vmem:[%s13580_s4 + $0x90] sm:$0xff]   ;;  %v12577_v22 = vld [vmem:[%s13580_s4 + $0x58] sm:$0xff]  }
 0x5d4   : > { %9135 = vmatpush1.bf16.msra.mxu1 %v11059_v8  ;;  %v12583_v8 = vld [vmem:[%s13580_s4 + $0x20] sm:$0xff]  }
 0x5d5   : > { %9294 = vmatpush1.bf16.msra.mxu0 %v11061_v19  ;;  %9136 = vmatprep.subr.bf16.mxu1 %v11068_v42  ;;  %v12584_v19 = vld [vmem:[%s13580_s4 + $0xa0] sm:$0xff]   ;;  %v12585_v42 = vld [vmem:[%s13580_s4 + $0x68] sm:$0xff]  }
 0x5d6   : > { %9295 = vmatprep.subr.bf16.mxu0 %v11070_v35  ;;  %v12586_v35 = vld [vmem:[%s13580_s4 + $0xe8] sm:$0xff]  }
 0x5d8   : > { %9137 = vmatpush1.bf16.msra.mxu1 %v11067_v36 }
 0x5d9   : > { %9296 = vmatpush1.bf16.msra.mxu0 %v11069_v46  ;;  %9138 = vmatprep.subr.bf16.mxu1 %v11076_v60 }
 0x5da   : > { %9297 = vmatprep.subr.bf16.mxu0 %v11078_v17 }
 0x5dc   : > { %9139 = vmatpush1.bf16.msra.mxu1 %v11075_v44 }
 0x5dd   : > { %9298 = vmatpush1.bf16.msra.mxu0 %v11077_v23  ;;  %9140 = vmatprep.subr.bf16.mxu1 %v11084_v24 }
 0x5de   : > { %9299 = vmatprep.subr.bf16.mxu0 %v11086_v10 }
 0x5e0   : > { %9141 = vmatpush1.bf16.msra.mxu1 %v11083_v14  ;;  %v12591_v14 = vld [vmem:[%s13580_s4 + $0x30] sm:$0xff]  }
 0x5e1   : > { %9300 = vmatpush1.bf16.msra.mxu0 %v11085_v32  ;;  %9142 = vmatprep.subr.bf16.mxu1 %v11092_v15  ;;  %v12592_v32 = vld [vmem:[%s13580_s4 + $0xb0] sm:$0xff]   ;;  %v12593_v15 = vld [vmem:[%s13580_s4 + $0x78] sm:$0xff]  }
 0x5e2   : > { %9301 = vmatprep.subr.bf16.mxu0 %v11094_v7  ;;  %v12594_v7 = vld [vmem:[%s13580_s4 + $0xf8] sm:$0xff]  }
 0x5e4   : > { %9143 = vmatpush1.bf16.msra.mxu1 %v11091_v52 }
 0x5e5   : > { %9302 = vmatpush1.bf16.msra.mxu0 %v11093_v37  ;;  %9144 = vmatprep.subr.bf16.mxu1 %v11100_v27 }
 0x5e6   : > { %9303 = vmatprep.subr.bf16.mxu0 %v11102_v16 }
 0x5e8   : > { %9145 = vmatpush1.bf16.msra.mxu1 %v11099_v47 }
 0x5e9   : > { %9304 = vmatpush1.bf16.msra.mxu0 %v11101_v20  ;;  %9146 = vmatprep.subr.bf16.mxu1 %v11108_v6 }
 0x5ea   : > { %9305 = vmatprep.subr.bf16.mxu0 %v11110_v54 }
 0x5ec   : > { %9147 = vmatpush1.bf16.msra.mxu1 %v11107_v9 }
 0x5ed   : > { %9306 = vmatpush1.bf16.msra.mxu0 %v11109_v5  ;;  %11153 = vmatprep.subr.bf16.mxu1 %v12565_v50 }
 0x5ee   : > { %11181 = vmatprep.subr.bf16.mxu0 %v12566_v30 }
 0x5ef   : > { %9149 = vmatmul.mubr.bf16.vlgmr.msra.gmra.mrb[56].mxu1 %v13377_v31 }
 0x5f0   : > { %9308 = vmatmul.mubr.bf16.vlgmr.msra.gmra.mrb[64].mxu0 %v13377_v31  ;;  %9158 = vmatprep.mubr.bf16.mxu1 %v13411_v48  ;;  %v12574_v31 = vld [vmem:[%s13580_s4 + $0xd0] sm:$0xff]  }
 0x5f1   : > { %9317 = vmatprep.mubr.bf16.mxu0 %v13411_v48  ;;  %11154 = vmatpush3.bf16.msra.mxu1 %v12567_v45  ;;  %v12575_v48 = vld [vmem:[%s13580_s4 + $0x10] sm:$0xff]  }
 0x5f2   : > { %11182 = vmatpush3.bf16.msra.mxu0 %v12568_v29  ;;  %11155 = vmatprep.subr.bf16.mxu1 %v12569_v33 }
 0x5f3   : > { %11183 = vmatprep.subr.bf16.mxu0 %v12570_v58 }
 0x5f5   : > { %11156 = vmatpush3.bf16.msra.mxu1 %v12571_v59 }
 0x5f6   : > { %11184 = vmatpush3.bf16.msra.mxu0 %v12572_v34  ;;  %11157 = vmatprep.subr.bf16.mxu1 %v12573_v41 }
 0x5f7   : > { %9159 = vmatmul.mubr.bf16.gmra.mrb[60].mxu1 %v13407_v21  ;;  %11185 = vmatprep.subr.bf16.mxu0 %v12574_v31 }
 0x5f8   : > { %9318 = vmatmul.mubr.bf16.gmra.mrb[68].mxu0 %v13407_v21  ;;  %v12582_v21 = vld [vmem:[%s13580_s4 + $0xe0] sm:$0xff]  }
 0x5f9   : > { %11158 = vmatpush3.bf16.msra.mxu1 %v12575_v48 }
 0x5fa   : > { %11186 = vmatpush3.bf16.msra.mxu0 %v12576_v25  ;;  %11159 = vmatprep.subr.bf16.mxu1 %v12577_v22 }
 0x5fb   : > { %11187 = vmatprep.subr.bf16.mxu0 %v12578_v55 }
 0x5fd   : > { %11160 = vmatpush3.bf16.msra.mxu1 %v12579_v4 }
 0x5fe   : > { %11188 = vmatpush3.bf16.msra.mxu0 %v12580_v56  ;;  %11161 = vmatprep.subr.bf16.mxu1 %v12581_v61 }
 0x5ff   : > { %11189 = vmatprep.subr.bf16.mxu0 %v12582_v21 }
 0x600   : > { %v8832_v63 = vpop.f32.mrb[48].mxu1  ;;  %v8991_v0 = vpop.f32.mrb[56].mxu0 }
 0x601   : > { %v8834_v49 = vpop.f32.mrb[49].mxu1  ;;  %v8993_v39 = vpop.f32.mrb[57].mxu0  ;;  %11162 = vmatpush3.bf16.msra.mxu1 %v12583_v8 }
 0x602   : > { %v8836_v36 = vpop.f32.mrb[50].mxu1  ;;  %v8995_v46 = vpop.f32.mrb[58].mxu0  ;;  %11190 = vmatpush3.bf16.msra.mxu0 %v12584_v19  ;;  %11163 = vmatprep.subr.bf16.mxu1 %v12585_v42 }
 0x603   : > { %v8838_v60 = vpop.f32.mrb[51].mxu1  ;;  %v8997_v17 = vpop.f32.mrb[59].mxu0  ;;  %11191 = vmatprep.subr.bf16.mxu0 %v12586_v35 }
 0x605   : > { %11164 = vmatpush3.bf16.msra.mxu1 %v12587_v11 }
 0x606   : > { %11192 = vmatpush3.bf16.msra.mxu0 %v12588_v57  ;;  %11165 = vmatprep.subr.bf16.mxu1 %v12589_v13 }
 0x607   : > { %11193 = vmatprep.subr.bf16.mxu0 %v12590_v53 }
 0x608   : > { %v13515_v26 = vpop.f32.mrb[52].mxu1  ;;  %v13517_v28 = vpop.f32.mrb[60].mxu0 }
 0x609   : > { %v13519_v3 = vpop.f32.mrb[53].mxu1  ;;  %v13521_v62 = vpop.f32.mrb[61].mxu0  ;;  %11166 = vmatpush3.bf16.msra.mxu1 %v12591_v14 }
 0x60a   : > { %v13523_v44 = vpop.f32.mrb[54].mxu1  ;;  %v13525_v23 = vpop.f32.mrb[62].mxu0  ;;  %11194 = vmatpush3.bf16.msra.mxu0 %v12592_v32  ;;  %11167 = vmatprep.subr.bf16.mxu1 %v12593_v15  ;;  %v12600_v32 = vld [vmem:[#allocation9 + $0x18] sm:$0xff]  }
 0x60b   : > { %v13527_v24 = vpop.f32.mrb[55].mxu1  ;;  %v13529_v10 = vpop.f32.mrb[63].mxu0  ;;  %11195 = vmatprep.subr.bf16.mxu0 %v12594_v7 }
 0x60d   : > { %11168 = vmatpush3.bf16.msra.mxu1 %v12595_v12  ;;  %v11111_v12 = vld [vmem:[#allocation7] ss:$0 sm:$0xff] }
 0x60e   : > { %11196 = vmatpush3.bf16.msra.mxu0 %v12596_v43 }
 0x6c2   : > { %v9150_v40 = vpop.f32.mrb[56].mxu1 }
 0x6c3   : > { %v9328_v2 = vmax.f32 %v8832_v63, %v9150_v40  ;;  %v9309_v52 = vpop.f32.mrb[64].mxu0  ;;  %v9152_v37 = vpop.f32.mrb[57].mxu1 }
 0x6c4   : > { %v9330_v27 = vmax.f32 %v8991_v0, %v9309_v52  ;;  %v9329_v16 = vmax.f32 %v8834_v49, %v9152_v37  ;;  %v9311_v18 = vpop.f32.mrb[65].mxu0  ;;  %v9154_v1 = vpop.f32.mrb[58].mxu1 }
 0x6c5   : > { %v9331_v38 = vmax.f32 %v8993_v39, %v9311_v18  ;;  %v9332_v51 = vmax.f32 %v8836_v36, %v9154_v1  ;;  %v9313_v47 = vpop.f32.mrb[66].mxu0  ;;  %v9156_v20 = vpop.f32.mrb[59].mxu1  ;;  %v9344_v5 = vmax.f32 %v9328_v2, 0.0 }
 0x6c6   : > { %v9334_v6 = vmax.f32 %v8995_v46, %v9313_v47  ;;  %v9333_v54 = vmax.f32 %v8838_v60, %v9156_v20  ;;  %v9315_v9 = vpop.f32.mrb[67].mxu0  ;;  %v9346_v45 = vmax.f32 %v9330_v27, 0.0  ;;  %v9345_v29 = vmax.f32 %v9329_v16, 0.0 }
 0x6c7   : > { %v9348_v50 = vmax.f32 %v9332_v51, 0.0  ;;  %v9335_v30 = vmax.f32 %v8997_v17, %v9315_v9  ;;  %v9347_v59 = vmax.f32 %v9331_v38, 0.0 }
 0x6c8   : > { %v9350_v33 = vmax.f32 %v9334_v6, 0.0  ;;  %v9349_v58 = vmax.f32 %v9333_v54, 0.0 }
 0x6c9   : > { %v9360_v34 = vpack.c.bf16 %v9348_v50, %v9344_v5  ;;  %v9351_v41 = vmax.f32 %v9335_v30, 0.0 }
 0x6ca   : > { %v9362_v31 = vpack.c.bf16 %v9350_v33, %v9346_v45  ;;  %v9361_v48 = vpack.c.bf16 %v9349_v58, %v9345_v29  ;;  %v9160_v25 = vpop.f32.mrb[60].mxu1 }
 0x6cb   : > { %v9363_v22 = vpack.c.bf16 %v9351_v41, %v9347_v59  ;;  %v9336_v55 = vmax.f32 %v13515_v26, %v9160_v25  ;;  %v9319_v4 = vpop.f32.mrb[68].mxu0  ;;  %v9162_v56 = vpop.f32.mrb[61].mxu1 }
 0x6cc   : > { %v9338_v61 = vmax.f32 %v13517_v28, %v9319_v4  ;;  %v9337_v21 = vmax.f32 %v13519_v3, %v9162_v56  ;;  %v9321_v8 = vpop.f32.mrb[69].mxu0  ;;  %v9164_v19 = vpop.f32.mrb[62].mxu1  ;;  %9663 = vmatprep.mubr.bf16.mxu1 %v9361_v48 }
 0x6cd   : > { %v9339_v42 = vmax.f32 %v13521_v62, %v9321_v8  ;;  %v9340_v35 = vmax.f32 %v13523_v44, %v9164_v19  ;;  %v9323_v63 = vpop.f32.mrb[70].mxu0  ;;  %9712 = vmatprep.mubr.bf16.mxu0 %v9363_v22  ;;  %v9166_v0 = vpop.f32.mrb[63].mxu1  ;;  %9664 = vmatmul.mubr.bf16.vlgmr.msra.gmra.mrb[64].mxu1 %v9360_v34  ;;  %v9352_v46 = vmax.f32 %v9336_v55, 0.0  ;;  %v11144_v19 = vld [vmem:[#allocation10] ss:$0 sm:$0xff] }
 0x6ce   : > { %v9342_v49 = vmax.f32 %v13525_v23, %v9323_v63  ;;  %v9341_v39 = vmax.f32 %v13527_v24, %v9166_v0  ;;  %v9325_v36 = vpop.f32.mrb[71].mxu0  ;;  %9713 = vmatmul.mubr.bf16.vlgmr.msra.gmra.mrb[72].mxu0 %v9362_v31  ;;  %v9354_v26 = vmax.f32 %v9338_v61, 0.0  ;;  %v9353_v28 = vmax.f32 %v9337_v21, 0.0  ;;  %v12597_v23 = vld [vmem:[#allocation9] sm:$0xff]   ;;  %v12598_v24 = vld [vmem:[#allocation9 + $0x8] sm:$0xff]  }
 0x6cf   : > { %v9356_v60 = vmax.f32 %v9340_v35, 0.0  ;;  %v9343_v17 = vmax.f32 %v13529_v10, %v9325_v36  ;;  %v9355_v11 = vmax.f32 %v9339_v42, 0.0  ;;  %11215 = vmatprep.subr.bf16.mxu1 %v12597_v23  ;;  %v12599_v10 = vld [vmem:[#allocation9 + $0x10] sm:$0xff]  }
 0x6d0   : > { %v9358_v3 = vmax.f32 %v9342_v49, 0.0  ;;  %v9357_v62 = vmax.f32 %v9341_v39, 0.0  ;;  %11216 = vmatpush3.bf16.msra.mxu1 %v12597_v23 }
 0x6d1   : > { %v9364_v44 = vpack.c.bf16 %v9356_v60, %v9352_v46  ;;  %v9359_v57 = vmax.f32 %v9343_v17, 0.0  ;;  %11217 = vmatprep.subr.bf16.mxu1 %v12598_v24 }
 0x6d2   : > { %v9366_v13 = vpack.c.bf16 %v9358_v3, %v9354_v26  ;;  %v9365_v53 = vpack.c.bf16 %v9357_v62, %v9353_v28 }
 0x6d3   : > { %v9367_v14 = vpack.c.bf16 %v9359_v57, %v9355_v11 }
 0x6d4   : > { %9671 = vmatprep.mubr.bf16.mxu1 %v9365_v53  ;;  %11218 = vmatpush3.bf16.msra.mxu1 %v12598_v24 }
 0x6d5   : > { %9720 = vmatprep.mubr.bf16.mxu0 %v9367_v14  ;;  %9672 = vmatmul.mubr.bf16.gmra.mrb[68].mxu1 %v9364_v44 }
 0x6d6   : > { %9721 = vmatmul.mubr.bf16.gmra.mrb[76].mxu0 %v9366_v13  ;;  %11219 = vmatprep.subr.bf16.mxu1 %v12599_v10 }
 0x6d8   : > { %11220 = vmatpush3.bf16.msra.mxu1 %v12599_v10 }
 0x6d9   : > { %11221 = vmatprep.subr.bf16.mxu1 %v12600_v32 }
 0x6dc   : > { %11222 = vmatpush3.bf16.msra.mxu1 %v12600_v32 }
 0x7a0   : > { %v11169_v15 = vpop.f32.mrb[64].mxu1 }
 0x7a1   : > { %v11197_v7 = vpop.f32.mrb[72].mxu0  ;;  %v11170_v43 = vpop.f32.mrb[65].mxu1 }
 0x7a2   : > { %v11171_v40 = vadd.f32 %v11170_v43, %v11169_v15  ;;  %v11198_v2 = vpop.f32.mrb[73].mxu0  ;;  %v11172_v52 = vpop.f32.mrb[66].mxu1 }
 0x7a3   : > { %v11199_v37 = vadd.f32 %v11198_v2, %v11197_v7  ;;  %v11200_v27 = vpop.f32.mrb[74].mxu0  ;;  %v11173_v16 = vpop.f32.mrb[67].mxu1 }
 0x7a4   : > { %v9666_v18 = vadd.f32 %v11171_v40, %v11111_v12  ;;  %v11174_v1 = vadd.f32 %v11173_v16, %v11172_v52  ;;  %v11201_v38 = vpop.f32.mrb[75].mxu0 }
 0x7a5   : > { %v11202_v51 = vadd.f32 %v11201_v38, %v11200_v27 }
 0x7a6   : > { %v9715_v47 = vadd.f32 %v11199_v37, %v9666_v18  ;;  %v9669_v20 = vadd.f32 %v11174_v1, %v11111_v12 }
 0x7a8   : > { %v9718_v6 = vadd.f32 %v11202_v51, %v9669_v20  ;;  %v11175_v54 = vpop.f32.mrb[68].mxu1  ;;  %v9729_v50 = vmax.f32 %v9715_v47, 0.0 }
 0x7a9   : > { %v11203_v9 = vpop.f32.mrb[76].mxu0  ;;  %v11176_v5 = vpop.f32.mrb[69].mxu1 }
 0x7aa   : > { %v9730_v30 = vmax.f32 %v9718_v6, 0.0  ;;  %v11177_v45 = vadd.f32 %v11176_v5, %v11175_v54  ;;  %v11204_v29 = vpop.f32.mrb[77].mxu0  ;;  %v11178_v33 = vpop.f32.mrb[70].mxu1 }
 0x7ab   : > { %v11205_v58 = vadd.f32 %v11204_v29, %v11203_v9  ;;  %v11206_v59 = vpop.f32.mrb[78].mxu0  ;;  %v11179_v34 = vpop.f32.mrb[71].mxu1 }
 0x7ac   : > { %v9733_v41 = vpack.c.bf16 %v9730_v30, %v9729_v50  ;;  %v9674_v31 = vadd.f32 %v11177_v45, %v11111_v12  ;;  %v11180_v48 = vadd.f32 %v11179_v34, %v11178_v33  ;;  %v11207_v25 = vpop.f32.mrb[79].mxu0 }
 0x7ad   : > { %v11208_v22 = vadd.f32 %v11207_v25, %v11206_v59 }
 0x7ae   : > { %v9723_v55 = vadd.f32 %v11205_v58, %v9674_v31  ;;  %v9677_v4 = vadd.f32 %v11180_v48, %v11111_v12  ;;  %11223 = vmatprep.mubr.msk.bf16.mxu1 %vm9774_vm1, %v9733_v41 }
 0x7b0   : > { %v9726_v56 = vadd.f32 %v11208_v22, %v9677_v4  ;;  %v9731_v61 = vmax.f32 %v9723_v55, 0.0 }
 0x7b2   : > { %v9732_v21 = vmax.f32 %v9726_v56, 0.0 }
 0x7b4   : > { %v9734_v8 = vpack.c.bf16 %v9732_v21, %v9731_v61 }
 0x7b6   : > { %11224 = vmatmul.mubr.msk.bf16.vlgmr.msra.gmra.mrb[72].mxu1 %vm9774_vm1, %v9734_v8 }
 0x889   : > { %v11225_v42 = vpop.f32.mrb[72].mxu1 }
 0x88a   : > { %v9824_v35 = vadd.f32 %v11225_v42, %v11144_v19  ;;  %v9815_v63 = vpop.f32.mrb[73].mxu1 }
 0x88b   : > { %v9816_v0 = vadd.f32 %v11144_v19, %v9815_v63  ;;  %v11226_v49 = vpop.f32.mrb[74].mxu1 }
 0x88c   : > { %9834 = vmax.xlane.f32.xlu1 %v9824_v35  ;;  %v9818_v39 = vpop.f32.mrb[75].mxu1  ;;  %v9827_v36 = vadd.f32 %v11226_v49, %v11144_v19 }
 0x88d   : > { %9830 = vmax.xlane.f32.xlu0 %v9816_v0  ;;  %v9819_v46 = vadd.f32 %v11144_v19, %v9818_v39 }
 0x890   : > { %9836 = vmax.xlane.f32.xlu1 %v9827_v36 }
 0x891   : > { %9832 = vmax.xlane.f32.xlu0 %v9819_v46 }
 0x919   : > { %v9835_v60 = vpop.xlane.xlu1 %9834 }
 0x91a   : > { %v9840_v17 = vsub.f32 %v9824_v35, %v9835_v60  ;;  %v9831_v26 = vpop.xlane.xlu0 %9830 }
 0x91b   : > { %v9838_v28 = vsub.f32 %v9816_v0, %v9831_v26 }
 0x91c   : > { %v9846_v11 = vmul.f32 1.442695, %v9840_v17 }
 0x91d   : > { %v9842_v3 = vmul.f32 1.442695, %v9838_v28  ;;  %v9837_v62 = vpop.xlane.xlu1 %9836 }
 0x91e   : > { %v9833_v44 = vpop.xlane.xlu0 %9832  ;;  %v9841_v57 = vsub.f32 %v9827_v36, %v9837_v62 }
 0x91f   : > { %12601 = vpow2.f32 %v9842_v3  ;;  %v9839_v13 = vsub.f32 %v9819_v46, %v9833_v44 }
 0x920   : > { %12603 = vpow2.f32 %v9846_v11  ;;  %v9848_v14 = vmul.f32 1.442695, %v9841_v57 }
 0x921   : > { %v9844_v53 = vmul.f32 1.442695, %v9839_v13 }
 0x923   : > { %12605 = vpow2.f32 %v9844_v53 }
 0x924   : > { %12607 = vpow2.f32 %v9848_v14 }
 0x929   : > { %v12602_v23 = vpop.eup %12601 }
 0x92a   : > { %9850 = vadd.xlane.f32.xlu0 %v12602_v23  ;;  %v12604_v24 = vpop.eup %12603 }
 0x92d   : > { %v12606_v10 = vpop.eup %12605 }
 0x92e   : > { %9854 = vadd.xlane.f32.xlu0 %v12604_v24  ;;  %9852 = vadd.xlane.f32.xlu1 %v12606_v10  ;;  %v12608_v32 = vpop.eup %12607 }
 0x932   : > { %9856 = vadd.xlane.f32.xlu1 %v12608_v32 }
 0x9b7   : > { %v9851_v15 = vpop.xlane.xlu0 %9850 }
 0x9b8   : > { %12609 = vlog2.f32 %v9851_v15 }
 0x9bb   : > { %v9853_v7 = vpop.xlane.xlu1 %9852  ;;  %v9855_v12 = vpop.xlane.xlu0 %9854 }
 0x9bc   : > { %12611 = vlog2.f32 %v9853_v7 }
 0x9bd   : > { %12613 = vlog2.f32 %v9855_v12 }
 0x9bf   : > { %v9857_v43 = vpop.xlane.xlu1 %9856 }
 0x9c0   : > { %12615 = vlog2.f32 %v9857_v43 }
 0x9c2   : > { %v12610_v40 = vpop.eup %12609 }
 0x9c3   : > { %v9859_v2 = vmul.f32 0.6931472, %v12610_v40 }
 0x9c5   : > { %v9866_v52 = vsub.f32 %v9838_v28, %v9859_v2 }
 0x9c6   : > { %v12612_v37 = vpop.eup %12611 }
 0x9c7   : > { %v12614_v27 = vpop.eup %12613  ;;  %9870 = vst [vmem:[%s391_s25] sm:$0xff] %v9866_v52  ;;  %v9861_v16 = vmul.f32 0.6931472, %v12612_v37 }
 0x9c8   : > { %v9863_v18 = vmul.f32 0.6931472, %v12614_v27 }
 0x9c9   : > { %v9867_v1 = vsub.f32 %v9839_v13, %v9861_v16 }
 0x9ca   : > { %v12616_v38 = vpop.eup %12615  ;;  %v9868_v51 = vsub.f32 %v9840_v17, %v9863_v18 }
 0x9cb   : > { %9871 = vst [vmem:[%s391_s25 + $0x8] sm:$0xff] %v9867_v1  ;;  %v9865_v47 = vmul.f32 0.6931472, %v12616_v38 }
 0x9cc   : > { %9872 = vst [vmem:[%s391_s25 + $0x10] sm:$0xff] %v9868_v51 }
 0x9cd   : > { %v9869_v20 = vsub.f32 %v9841_v57, %v9865_v47 }
 0x9cf   : > { %9873 = vst [vmem:[%s391_s25 + $0x18] sm:$0xff] %v9869_v20 }
 0x9d0 PF: > { %s22_s27 = sadd.s32 1, %s12807_s27  }
 0x9d1   : > { %p19_p7 = scmp.ge.s32.totalorder %s22_s27, 4  }
 0x9d3   :  { %21 = sbr.rel (!%p19_p7) target bundleno = 4 (0x4), region = 107 }
 0x9da   :  { %9896 = vsyncpa [#allocation3], 1 }
 0x9db   :  { %9898 = vsyncpa [#allocation3 + $0x1], 1 }
 0x9dc   :  { %9899 = vsyncpa [#allocation5], 1 }
 0x9dd   :  { %9900 = vsyncpa [#allocation8], 1 }
 0x9de   :  { %9901 = vsyncpa [#allocation11], 1 }

</bundles_post_ra>
